<compile_context>
chip_gen: v6e
topology: v6e:2x2x1
jax: 0.10.0
libtpu: 0.0.40
codegen_flags: <defaults>
</compile_context>

<pallas_src>
import functools

import jax
import jax.numpy as jnp
from jax.experimental import pallas as pl
from jax.experimental.pallas import tpu as pltpu


def _rotated_kernel(x_ref, w_ref, b_ref, last_ref, sum_ref, *,
                    world_size, last_shard, compute_dtype):
    """One grid step == one M tile; the whole W-step rotation loop runs in-body.

    x_ref:    (W, TM, D_in)   activation of every virtual rank for this M tile
    w_ref:    (D_in, D_out)   local module weight, pre-transposed, compute dtype
    b_ref:    (1, D_out) f32  local module bias
    last_ref: (TM, D_out) f32 module output of the LAST rotation step (what forward returns)
    sum_ref:  (TM, D_out) f32 accumulated `output_parallel`
    """
    w = w_ref[...]
    b = b_ref[...]

    def shard_out(k):
        # Per-shard cast to the MXU compute dtype (no wrapper-side cast pass);
        # MXU matmul with f32 accumulation; bias add stays in f32.
        xk = x_ref[k].astype(compute_dtype)
        return jnp.dot(xk, w, preferred_element_type=jnp.float32) + b

    # Last rotation step delivers the original input of rank (rank + 1) % W.
    y_last = shard_out(last_shard)
    last_ref[...] = y_last.astype(last_ref.dtype)

    # output_parallel: order-independent sum over all W shards, accumulated directly
    # into the VMEM-resident output block (no scratch, no finalize copy).
    sum_ref[...] = y_last
    for k in range(world_size):          # world_size is static & small -> fully unrolled
        if k != last_shard:
            sum_ref[...] += shard_out(k)


@functools.partial(jax.jit,
                   static_argnames=("rank", "world_size", "tile_m", "compute_dtype"))
def rotated_forward(x_all_ranks, weight, bias, *, rank, world_size,
                    tile_m=512, compute_dtype=jnp.bfloat16):
    """Equivalent of RotatedWarpper(nn.Linear(D_in, D_out)).forward(x) on `rank`.

    x_all_ranks: (W, B, S, D_in)  activation held by each virtual rank
    weight:      (D_out, D_in)    local module weight (PyTorch Linear convention)
    bias:        (D_out,)         local module bias
    compute_dtype: MXU operand dtype (bf16 by default -- an explicit precision choice
                   relative to the f32 PyTorch Linear; pass jnp.float32 for exactness)
    returns      (output, output_parallel), each (B, S, D_out), f32:
                   output          == what the PyTorch module returns (last rotation step)
                   output_parallel == the accumulated sum the module computes and discards
    """
    W, B, S, D_in = x_all_ranks.shape
    D_out, D_in_w = weight.shape
    assert W == world_size and D_in == D_in_w
    M = B * S
    TM = min(tile_m, M)
    # TODO(synk): ragged M would need a padded/masked last tile; demo keeps M % TM == 0.
    assert M % TM == 0, "B*S must be a multiple of the M tile"
    n_m = M // TM

    # Reshape is metadata-only; x is streamed in its original dtype (cast in-kernel),
    # so no extra full-tensor HBM pass in the wrapper.
    x2d = x_all_ranks.reshape(W, M, D_in)
    w_t = jnp.transpose(weight).astype(compute_dtype)   # (D_in, D_out): no in-kernel .T
    b2d = bias.reshape(1, D_out).astype(jnp.float32)

    last_shard = (rank + 1) % world_size   # shard delivered on the final rotation step

    # VMEM budget (per TensorCore, double-buffered pipeline):
    #   2 * x block  +  2 * (two f32 output blocks)  +  2 * params  +  headroom
    # At TM=512, W=4, D=256, f32 x: ~4 MiB + 2 MiB + ~0.3 MiB + 4 MiB  ->  ~10 MiB,
    # well under v7x's 64 MiB physical / 32 MiB scoped default and v5e/v6e's 128 MiB.
    x_block_bytes = W * TM * D_in * x2d.dtype.itemsize
    out_block_bytes = TM * D_out * 4
    param_bytes = D_in * D_out * w_t.dtype.itemsize + D_out * 4
    vmem_limit = 2 * x_block_bytes + 2 * 2 * out_block_bytes + 2 * param_bytes + (4 << 20)
    vmem_limit = int(max(vmem_limit, 16 << 20))

    out_last, out_sum = pl.pallas_call(
        functools.partial(_rotated_kernel, world_size=world_size,
                          last_shard=last_shard, compute_dtype=compute_dtype),
        out_shape=(
            jax.ShapeDtypeStruct((M, D_out), jnp.float32),
            jax.ShapeDtypeStruct((M, D_out), jnp.float32),
        ),
        grid_spec=pltpu.PrefetchScalarGridSpec(
            num_scalar_prefetch=0,
            # one grid step per M tile; the W rotation loop runs inside the body
            grid=(n_m,),
            in_specs=[
                # all W shards of M tile i in one block (streamed, double-buffered)
                pl.BlockSpec((W, TM, D_in), lambda i: (0, i, 0)),
                # local module parameters: constant block index -> stay resident
                pl.BlockSpec((D_in, D_out), lambda i: (0, 0)),
                pl.BlockSpec((1, D_out), lambda i: (0, 0)),
            ],
            out_specs=[
                # lane-dense (D_out multiple of 128); each tile written to HBM once
                pl.BlockSpec((TM, D_out), lambda i: (i, 0)),
                pl.BlockSpec((TM, D_out), lambda i: (i, 0)),
            ],
        ),
        compiler_params=pltpu.CompilerParams(
            # single grid axis over independent M tiles -> megacore-parallel on v7x
            dimension_semantics=("parallel",),
            vmem_limit_bytes=vmem_limit,
        ),
    )(x2d, w_t, b2d)

    return out_last.reshape(B, S, D_out), out_sum.reshape(B, S, D_out)


if __name__ == "__main__":
    # Small deterministic setup: 4 virtual ranks, local module = nn.Linear(256, 256).
    # M = B*S = 1024, TM = 512  ->  n_m = 2 grid steps (both v7x TensorCores get work).
    world_size = 4
    rank = 0
    B, S = 2, 512
    D_in, D_out = 256, 256

    key = jax.random.PRNGKey(0)
    kx, kw, kb = jax.random.split(key, 3)
    x_all = jax.random.normal(kx, (world_size, B, S, D_in), dtype=jnp.float32)
    weight = jax.random.normal(kw, (D_out, D_in), dtype=jnp.float32) * 0.05
    bias = jax.random.normal(kb, (D_out,), dtype=jnp.float32) * 0.05

    out_last, out_sum = rotated_forward(
        x_all, weight, bias, rank=rank, world_size=world_size
    )
    out_last, out_sum = jax.block_until_ready((out_last, out_sum))

    # Pure-JAX reference with the same bf16 operands / f32 accumulation.
    def ref_module(x3d):
        xb = x3d.reshape(-1, D_in).astype(jnp.bfloat16)
        wb = weight.T.astype(jnp.bfloat16)
        y = jnp.dot(xb, wb, preferred_element_type=jnp.float32) + bias
        return y.reshape(B, S, D_out)

    # rotation order seen by `rank`: step i uses the input of rank (rank - i) mod W
    rot_order = [(rank - i) % world_size for i in range(world_size)]
    ref_last = ref_module(x_all[rot_order[-1]])                 # what forward() returns
    ref_sum = sum(ref_module(x_all[r]) for r in rot_order)      # output_parallel

    assert out_last.shape == (B, S, D_out) and out_sum.shape == (B, S, D_out)
    assert jnp.allclose(out_last, ref_last, atol=2e-2, rtol=2e-2)
    assert jnp.allclose(out_sum, ref_sum, atol=2e-2, rtol=2e-2)

    print("KERNEL_OK")
</pallas_src>

<mosaic_0001>
module attributes {stable_mosaic.version = 11 : i64} {
  func.func @_rotated_kernel(%arg0: i32, %arg1: memref<4x512x256xf32, #tpu.memory_space<vmem>>, %arg2: memref<256x256xbf16, #tpu.memory_space<vmem>>, %arg3: memref<1x256xf32, #tpu.memory_space<vmem>>, %arg4: memref<512x256xf32, #tpu.memory_space<vmem>>, %arg5: memref<512x256xf32, #tpu.memory_space<vmem>>) attributes {dimension_semantics = [#tpu.dimension_semantics<parallel>], iteration_bounds = array<i64: 2>, scalar_prefetch = 0 : i64, scratch_operands = 0 : i64, tpu.core_type = #tpu.core_type<tc>, window_params = [{transform_indices = @transform_0, window_bounds = array<i64: 4, 512, 256>}, {pipeline_mode = #tpu.pipeline_mode<synchronous>, transform_indices = @transform_1, window_bounds = array<i64: 256, 256>}, {pipeline_mode = #tpu.pipeline_mode<synchronous>, transform_indices = @transform_2, window_bounds = array<i64: 1, 256>}, {transform_indices = @transform_3, window_bounds = array<i64: 512, 256>}, {transform_indices = @transform_4, window_bounds = array<i64: 512, 256>}]} {
    %c0 = arith.constant 0 : index
    %c0_0 = arith.constant 0 : index
    %0 = vector.load %arg2[%c0, %c0_0] : memref<256x256xbf16, #tpu.memory_space<vmem>>, vector<256x256xbf16>
    %c0_1 = arith.constant 0 : index
    %c0_2 = arith.constant 0 : index
    %1 = vector.load %arg3[%c0_1, %c0_2] : memref<1x256xf32, #tpu.memory_space<vmem>>, vector<1x256xf32>
    %c1 = arith.constant 1 : index
    %c0_3 = arith.constant 0 : index
    %c0_4 = arith.constant 0 : index
    %2 = vector.load %arg1[%c1, %c0_3, %c0_4] : memref<4x512x256xf32, #tpu.memory_space<vmem>>, vector<1x512x256xf32>
    %3 = vector.shape_cast %2 : vector<1x512x256xf32> to vector<512x256xf32>
    %4 = arith.truncf %3 : vector<512x256xf32> to vector<512x256xbf16>
    %cst = arith.constant dense<0.000000e+00> : vector<512x256xf32>
    %5 = tpu.matmul %4, %0, %cst {dimension_numbers = #tpu.dot_dimension_numbers<[1], [0], [0], [1], [0, 0, 1, 1], [], []>} : vector<512x256xbf16>, vector<256x256xbf16>, vector<512x256xf32> -> vector<512x256xf32>
    %6 = vector.broadcast %1 : vector<1x256xf32> to vector<512x256xf32>
    %7 = arith.addf %5, %6 : vector<512x256xf32>
    %c0_5 = arith.constant 0 : index
    %c0_6 = arith.constant 0 : index
    %8 = vector.load %arg4[%c0_5, %c0_6] : memref<512x256xf32, #tpu.memory_space<vmem>>, vector<512x256xf32>
    tpu.vector_store %arg4[%c0_5, %c0_6], %7 {strides = array<i32>} : memref<512x256xf32, #tpu.memory_space<vmem>>, vector<512x256xf32>,
    %c0_7 = arith.constant 0 : index
    %c0_8 = arith.constant 0 : index
    %9 = vector.load %arg5[%c0_7, %c0_8] : memref<512x256xf32, #tpu.memory_space<vmem>>, vector<512x256xf32>
    tpu.vector_store %arg5[%c0_7, %c0_8], %7 {strides = array<i32>} : memref<512x256xf32, #tpu.memory_space<vmem>>, vector<512x256xf32>,
    %c0_9 = arith.constant 0 : index
    %c0_10 = arith.constant 0 : index
    %10 = vector.load %arg5[%c0_9, %c0_10] : memref<512x256xf32, #tpu.memory_space<vmem>>, vector<512x256xf32>
    %c0_11 = arith.constant 0 : index
    %c0_12 = arith.constant 0 : index
    %c0_13 = arith.constant 0 : index
    %11 = vector.load %arg1[%c0_11, %c0_12, %c0_13] : memref<4x512x256xf32, #tpu.memory_space<vmem>>, vector<1x512x256xf32>
    %12 = vector.shape_cast %11 : vector<1x512x256xf32> to vector<512x256xf32>
    %13 = arith.truncf %12 : vector<512x256xf32> to vector<512x256xbf16>
    %cst_14 = arith.constant dense<0.000000e+00> : vector<512x256xf32>
    %14 = tpu.matmul %13, %0, %cst_14 {dimension_numbers = #tpu.dot_dimension_numbers<[1], [0], [0], [1], [0, 0, 1, 1], [], []>} : vector<512x256xbf16>, vector<256x256xbf16>, vector<512x256xf32> -> vector<512x256xf32>
    %15 = vector.broadcast %1 : vector<1x256xf32> to vector<512x256xf32>
    %16 = arith.addf %14, %15 : vector<512x256xf32>
    %17 = arith.addf %10, %16 : vector<512x256xf32>
    %c0_15 = arith.constant 0 : index
    %c0_16 = arith.constant 0 : index
    %18 = vector.load %arg5[%c0_15, %c0_16] : memref<512x256xf32, #tpu.memory_space<vmem>>, vector<512x256xf32>
    tpu.vector_store %arg5[%c0_15, %c0_16], %17 {strides = array<i32>} : memref<512x256xf32, #tpu.memory_space<vmem>>, vector<512x256xf32>,
    %c0_17 = arith.constant 0 : index
    %c0_18 = arith.constant 0 : index
    %19 = vector.load %arg5[%c0_17, %c0_18] : memref<512x256xf32, #tpu.memory_space<vmem>>, vector<512x256xf32>
    %c2 = arith.constant 2 : index
    %c0_19 = arith.constant 0 : index
    %c0_20 = arith.constant 0 : index
    %20 = vector.load %arg1[%c2, %c0_19, %c0_20] : memref<4x512x256xf32, #tpu.memory_space<vmem>>, vector<1x512x256xf32>
    %21 = vector.shape_cast %20 : vector<1x512x256xf32> to vector<512x256xf32>
    %22 = arith.truncf %21 : vector<512x256xf32> to vector<512x256xbf16>
    %cst_21 = arith.constant dense<0.000000e+00> : vector<512x256xf32>
    %23 = tpu.matmul %22, %0, %cst_21 {dimension_numbers = #tpu.dot_dimension_numbers<[1], [0], [0], [1], [0, 0, 1, 1], [], []>} : vector<512x256xbf16>, vector<256x256xbf16>, vector<512x256xf32> -> vector<512x256xf32>
    %24 = vector.broadcast %1 : vector<1x256xf32> to vector<512x256xf32>
    %25 = arith.addf %23, %24 : vector<512x256xf32>
    %26 = arith.addf %19, %25 : vector<512x256xf32>
    %c0_22 = arith.constant 0 : index
    %c0_23 = arith.constant 0 : index
    %27 = vector.load %arg5[%c0_22, %c0_23] : memref<512x256xf32, #tpu.memory_space<vmem>>, vector<512x256xf32>
    tpu.vector_store %arg5[%c0_22, %c0_23], %26 {strides = array<i32>} : memref<512x256xf32, #tpu.memory_space<vmem>>, vector<512x256xf32>,
    %c0_24 = arith.constant 0 : index
    %c0_25 = arith.constant 0 : index
    %28 = vector.load %arg5[%c0_24, %c0_25] : memref<512x256xf32, #tpu.memory_space<vmem>>, vector<512x256xf32>
    %c3 = arith.constant 3 : index
    %c0_26 = arith.constant 0 : index
    %c0_27 = arith.constant 0 : index
    %29 = vector.load %arg1[%c3, %c0_26, %c0_27] : memref<4x512x256xf32, #tpu.memory_space<vmem>>, vector<1x512x256xf32>
    %30 = vector.shape_cast %29 : vector<1x512x256xf32> to vector<512x256xf32>
    %31 = arith.truncf %30 : vector<512x256xf32> to vector<512x256xbf16>
    %cst_28 = arith.constant dense<0.000000e+00> : vector<512x256xf32>
    %32 = tpu.matmul %31, %0, %cst_28 {dimension_numbers = #tpu.dot_dimension_numbers<[1], [0], [0], [1], [0, 0, 1, 1], [], []>} : vector<512x256xbf16>, vector<256x256xbf16>, vector<512x256xf32> -> vector<512x256xf32>
    %33 = vector.broadcast %1 : vector<1x256xf32> to vector<512x256xf32>
    %34 = arith.addf %32, %33 : vector<512x256xf32>
    %35 = arith.addf %28, %34 : vector<512x256xf32>
    %c0_29 = arith.constant 0 : index
    %c0_30 = arith.constant 0 : index
    %36 = vector.load %arg5[%c0_29, %c0_30] : memref<512x256xf32, #tpu.memory_space<vmem>>, vector<512x256xf32>
    tpu.vector_store %arg5[%c0_29, %c0_30], %35 {strides = array<i32>} : memref<512x256xf32, #tpu.memory_space<vmem>>, vector<512x256xf32>,
    return
  }
  func.func @transform_0(%arg0: i32) -> (i32, i32, i32) {
    %c0_i32 = arith.constant 0 : i32
    %c0_i32_0 = arith.constant 0 : i32
    %c0_i32_1 = arith.constant 0 : i32
    return %c0_i32, %arg0, %c0_i32_0 : i32, i32, i32
  }
  func.func @transform_1(%arg0: i32) -> (i32, i32) {
    %c0_i32 = arith.constant 0 : i32
    %c0_i32_0 = arith.constant 0 : i32
    %c0_i32_1 = arith.constant 0 : i32
    return %c0_i32, %c0_i32_0 : i32, i32
  }
  func.func @transform_2(%arg0: i32) -> (i32, i32) {
    %c0_i32 = arith.constant 0 : i32
    %c0_i32_0 = arith.constant 0 : i32
    %c0_i32_1 = arith.constant 0 : i32
    return %c0_i32, %c0_i32_0 : i32, i32
  }
  func.func @transform_3(%arg0: i32) -> (i32, i32) {
    %c0_i32 = arith.constant 0 : i32
    %c0_i32_0 = arith.constant 0 : i32
    return %arg0, %c0_i32 : i32, i32
  }
  func.func @transform_4(%arg0: i32) -> (i32, i32) {
    %c0_i32 = arith.constant 0 : i32
    %c0_i32_0 = arith.constant 0 : i32
    return %arg0, %c0_i32 : i32, i32
  }
}

</mosaic_0001>

<bundles_post_ra>
// kernel: rotated_forward.1
= control target key start
LH: loop header
LB: loop body
LE: loop exit
PB: predicated region body
PF: predicated region fallthrough
CT: control target
= control target key end

     0   :  { %10 = vsyncpa [#allocation3], 0  ;;  %s6983_s0 = inlined_call_operand.hbm [shape: f32[4,1024,256], index: 0, kind: input, shape index: {}]   ;;  %s6984_s1 = inlined_call_operand.vmem [shape: bf16[256,256], index: 1, kind: input, shape index: {}]   ;;  %s6985_s2 = inlined_call_operand.hbm [shape: f32[1,256], index: 2, kind: input, shape index: {}]   ;;  %s6986_s3 = inlined_call_operand.hbm [shape: f32[1024,256], index: 3, kind: output, shape index: {0}]   ;;  %s6987_s4 = inlined_call_operand.hbm [shape: f32[1024,256], index: 4, kind: output, shape index: {1}]  }
   0x1   :  { %12 = vsyncpa [#allocation3 + $0x1], 0 }
   0x2   :  { %13 = vsyncpa [#allocation6], 0 }
   0x3   :  { %14 = vsyncpa [#allocation4], 0 }
   0x4   :  { %16 = vsyncpa [#allocation4 + $0x1], 0 }
   0x5   :  { %17 = vsyncpa [#allocation9], 0 }
   0x6   :  { %19 = vsyncpa [#allocation9 + $0x1], 0  ;;  %s4945_s15 = smov 0   ;;  %s4947_s16 = smov 0  }
   0x7   :  { %s4949_s17 = smov 0   ;;  %s4951_s18 = smov 0  }
   0x8 LB: > { %s4966_s19 = sadd.s32 4294967295, %s4907_s18   ;;  %s4216_s20 = sadd.s32 4294967294, %s4907_s18   ;;  %s4907_s18 = sphi %s4951_s18, %s7001_s18   ;;  %s4903_s17 = sphi %s4949_s17, %s7000_s17   ;;  %s4899_s16 = sphi %s4947_s16, %s6999_s16   ;;  %s4895_s15 = sphi %s4945_s15, %s6998_s15  }
   0x9   : > { %s4970_s21 = sadd.s32 1, %s4907_s18   ;;  %s32_s22 = sadd.s32 1, %s4903_s17 }
   0xa   : > { %s29_s23 = ssub.s32 %s4907_s18, %s4970_s21  ;;  %p39_p0 = scmp.ne.s32.totalorder %s4903_s17, %s4899_s16 }
   0xb   : > { %p30_p1 = scmp.eq.s32.totalorder %s29_s23, 0  ;;  %p40_p2 = scmp.eq.s32.totalorder %s4907_s18, 0 }
   0xc   : > { %p45_p3 = scmp.ne.s32.totalorder %s4899_s16, %s4895_s15  ;;  %p46_p4 = scmp.eq.s32.totalorder %s4966_s19, 0 }
   0xd   : > { %s4982_s24 = scalar_select %p30_p1, %s4903_s17, %s32_s22  }
   0xe   : > { %p4984_p5 = por %p40_p2, %p39_p0  ;;  %p4990_p6 = por %p46_p4, %p45_p3 }
   0xf   : > { %p111_p7 = scmp.eq.s32.totalorder %s4966_s19, 1  ;;  %p117_p8 = scmp.eq.s32.totalorder %s4216_s20, 1 }
  0x10   : > { %s6991_s26 = scalar_select %p4990_p6, 1, 0 }
  0x11   : > { %p4217_p9 = scmp.ge.s32.totalorder %s4907_s18, 1  ;;  %p150_p10 = scmp.lt.s32.totalorder %s4907_s18, 3 }
  0x12   : > { %p4997_p11 = por %p111_p7, %p39_p0  ;;  %p5001_p12 = por %p117_p8, %p45_p3 }
  0x13   : > { %p5005_p13 = pnand %p4217_p9, %p150_p10  ;;  %s4909_s30 = smov [#allocation5]  }
  0x14   : > { %s6992_s27 = scalar_select %p4997_p11, 1, 0 }
  0x15   : > { %s6993_s28 = scalar_select %p5001_p12, 1, 0 }
  0x16   : > { %p4680_p1 = pneg %p5005_p13  ;;  %s166_s5 = sshll.u32 %s4909_s30, 4  ;;  %s167_s5 = int_to_ptr.vmem [resolvable:$true] %s166_s5 }
  0x17   : > { %s4794_s6 = scalar_lea.vmem %s167_s5, 32  ;;  %p4802_p8 = scmp.lt.s32.totalorder %s167_s5, %s167_s5 }
  0x18   : > { %p4681_p2 = pnand %p4680_p1, %p46_p4  ;;  %p4795_p7 = scmp.ne.s32.totalorder %s167_s5, %s4794_s6 }
  0x19   : > { %p4803_p6 = scmp.lt.s32.totalorder %s4794_s6, %s4794_s6 }
  0x1a   : > { %p4785_p0 = pneg %p4681_p2 }
  0x1b   : > { %p4804_p12 = por %p4803_p6, %p4802_p8 }
  0x1c   : > { %p4797_p11 = pnand %p4795_p7, %p4785_p0 }
  0x1e   : > { %p4798_p3 = pneg %p4797_p11 }
  0x20   : > { %p4805_p9 = pnand %p4804_p12, %p4798_p3 }
  0x22   : > { %4808 = shalt.err (!%p4805_p9)
}
  0x23   : > { %4683 = dma.hbm_to_vmem [thread:$0]  (!%p4681_p2), %s6985_s2, 32, %s167_s5, [#allocation6]  }
  0x24   : > { %p4219_p10 = scmp.ge.s32.totalorder %s4907_s18, 2 }
  0x26   : > { %173 = sbr.rel (%p4219_p10) target bundleno = 56 (0x38), region = 24 }
  0x2b   : > { %s177_s9 = sand.u32 1, %s4903_s17   ;;  %s4658_s10 = sshll.u32 %s4907_s18, 14 }
  0x2c   : > { %s4220_s11 = sshll.u32 %s177_s9, 12  ;;  %s188_s14 = scalar_lea.hbm %s6983_s0, %s4658_s10 }
  0x2d   : > { %s4665_s20 = scalar_select %p4984_p5, [#allocation0], [#allocation12] }
  0x2e   : > { %s181_s22 = scalar_lea.vmem [#allocation2], %s4220_s11  ;;  %s4910_s5 = smov 32768  }
  0x2f   : > { %s201_s23 = sshll.u32 %s181_s22, 4  ;;  %s193_s30 = sld [smem:[%s4665_s20]]   ;;  %s202_s23 = int_to_ptr.vmem [resolvable:$true] %s201_s23 }
  0x30   : > { %4666 = sst [smem:[#allocation11]] (%p4984_p5), %s4910_s5  ;;  %s4911_s6 = smov 16384  }
  0x31   : > { %4667 = sst [smem:[#allocation11 + $0x1]] (%p4984_p5), %s4911_s6  ;;  %s4912_s7 = smov 64  }
  0x32   : > { %4668 = sst [smem:[#allocation11 + $0x2]] (%p4984_p5), %s4912_s7  ;;  %s4913_s8 = smov 256  }
  0x33   : > { %4669 = sst [smem:[#allocation11 + $0x3]] (%p4984_p5), %s4913_s8  ;;  %s4914_s11 = smov 16  }
  0x34   : > { %4670 = sst [smem:[#allocation11 + $0x4]] (%p4984_p5), %s4913_s8  ;;  %s178_s13 = scalar_lea.sflag [#allocation3], %s177_s9 }
  0x35   : > { %s4224_s10 = sshll.u32 %s193_s30, 26  ;;  %4671 = sst [smem:[#allocation11 + $0x5]] (%p4984_p5), %s4914_s11 }
  0x36   : > { %s4225_s12 = sadd.s32 134217728, %s4224_s10  ;;  %s4915_s20 = smov 131072  }
  0x37   : > { %4672 = dma.general (%p4984_p5), %s188_s14, 65536, %s202_s23, %s178_s13, %s4915_s20, [#allocation11], %s4225_s12, 0  }
  0x38 PF: > { %226 = sbr.rel (%p5005_p13) target bundleno = 862 (0x35e), region = 32  ;;  %s5043_s22 = sand.u32 (!%p5005_p13), 1, %s4899_s16  }
  0x39   : > { %s4227_s5 = sshll.u32 (!%p5005_p13), %s5043_s22, 12  ;;  %s229_s30 = scalar_lea.sflag (!%p5005_p13), [#allocation3], %s5043_s22 }
  0x3a   : > { %s5047_s6 = scalar_lea.vmem (!%p5005_p13), [#allocation2], %s4227_s5  ;;  %p6995_p6 = scmp.ne.s32.totalorder (!%p5005_p13), %s6991_s26, 0 }
  0x3d   : > { %4878 = dma.done.wait (%p6995_p6), %s229_s30, 65536  }
  0x3e   : > { %4880 = vsyncadd (%p6995_p6), %s229_s30, 4294901760 }
  0x3f   : > { %4882 = dma.done.wait (%p46_p4), [#allocation6], 32  }
  0x40   : > { %4884 = vsyncadd (%p46_p4), [#allocation6], 4294967264  ;;  %v5060_v0 = vld [vmem:[%s6984_s1 + $0x74] ss:$8 sps:$4 sm:$0xff]   ;;  %v5065_v1 = vld [vmem:[%s6984_s1 + $0x70] ss:$8 sps:$4 sm:$0xff]  }
  0x41   : > { %666 = vmatprep.subr.bf16.mxu0 %v5060_v0  ;;  %v5071_v2 = vld [vmem:[%s6984_s1 + $0x64] ss:$8 sps:$4 sm:$0xff]   ;;  %1595 = vmatprep.subr.bf16.mxu1 %v5060_v0  ;;  %v5078_v3 = vld [vmem:[%s6984_s1 + $0x60] ss:$8 sps:$4 sm:$0xff]   ;;  %v5085_v4 = vld [vmem:[%s6984_s1 + $0x54] ss:$8 sps:$4 sm:$0xff]  }
  0x42   : > { %667 = vmatpush1.bf16.msra.mxu0 %v5065_v1  ;;  %1596 = vmatpush1.bf16.msra.mxu1 %v5065_v1  ;;  %v5092_v5 = vld [vmem:[%s6984_s1 + $0x50] ss:$8 sps:$4 sm:$0xff]   ;;  %v5099_v6 = vld [vmem:[%s6984_s1 + $0x44] ss:$8 sps:$4 sm:$0xff]   ;;  %v5106_v7 = vld [vmem:[%s6984_s1 + $0x40] ss:$8 sps:$4 sm:$0xff]  }
  0x43   : > { %668 = vmatprep.subr.bf16.mxu0 %v5071_v2  ;;  %1597 = vmatprep.subr.bf16.mxu1 %v5071_v2  ;;  %v5113_v8 = vld [vmem:[%s6984_s1 + $0x34] ss:$8 sps:$4 sm:$0xff]   ;;  %v5120_v9 = vld [vmem:[%s6984_s1 + $0x30] ss:$8 sps:$4 sm:$0xff]   ;;  %v5127_v10 = vld [vmem:[%s6984_s1 + $0x24] ss:$8 sps:$4 sm:$0xff]  }
  0x44   : > { %v5134_v11 = vld [vmem:[%s6984_s1 + $0x20] ss:$8 sps:$4 sm:$0xff]   ;;  %v5141_v12 = vld [vmem:[%s6984_s1 + $0x14] ss:$8 sps:$4 sm:$0xff]   ;;  %v5151_v17 = vld [vmem:[%s6984_s1 + $0x10] ss:$8 sps:$4 sm:$0xff]  }
  0x45   : > { %v4232_v13 = vld [vmem:[%s5047_s6 + $0x408] sm:$0xff]  ;;  %v4234_v14 = vld [vmem:[%s5047_s6 + $0x418] sm:$0xff]  ;;  %v4231_v38 = vld [vmem:[%s5047_s6 + $0x400] sm:$0xff]  ;;  %s4229_s26 = sshll.u32 %s5043_s22, 10  ;;  %s4065_s13 = scalar_lea.sflag [#allocation4], %s5043_s22 }
  0x46   : > { %669 = vmatpush1.bf16.msra.mxu0 %v5078_v3  ;;  %1598 = vmatpush1.bf16.msra.mxu1 %v5078_v3  ;;  %v432_v15 = vpack.c.bf16 %v4234_v14, %v4232_v13  ;;  %v1404_v16 = vld [vmem:[%s5047_s6 + $0x8] sm:$0xff]  ;;  %v1406_v18 = vld [vmem:[%s5047_s6 + $0x18] sm:$0xff]  ;;  %v4233_v39 = vld [vmem:[%s5047_s6 + $0x410] sm:$0xff]  ;;  %s5566_s23 = scalar_lea.vmem [#allocation7], %s4229_s26  ;;  %s5575_s7 = scalar_lea.vmem [#allocation8], %s4229_s26 }
  0x47   : > { %670 = vmatprep.subr.bf16.mxu0 %v5085_v4  ;;  %1599 = vmatprep.subr.bf16.mxu1 %v5085_v4  ;;  %v5159_v19 = vld [vmem:[%s6984_s1 + $0x4] ss:$8 sps:$4 sm:$0xff]   ;;  %v1532_v20 = vpack.c.bf16 %v1406_v18, %v1404_v16  ;;  %v5166_v21 = vld [vmem:[%s6984_s1] ss:$8 sps:$4 sm:$0xff]   ;;  %v5173_v22 = vld [vmem:[%s6984_s1 + $0xf4] ss:$8 sps:$4 sm:$0xff]   ;;  %v431_v46 = vpack.c.bf16 %v4233_v39, %v4231_v38 }
  0x48   : > { %698 = vmatprep.mubr.bf16.mxu0 %v432_v15  ;;  %v5180_v23 = vld [vmem:[%s6984_s1 + $0xf0] ss:$8 sps:$4 sm:$0xff]   ;;  %v5187_v24 = vld [vmem:[%s6984_s1 + $0xe4] ss:$8 sps:$4 sm:$0xff]   ;;  %v5194_v25 = vld [vmem:[%s6984_s1 + $0xe0] ss:$8 sps:$4 sm:$0xff]  }
  0x49   : > { %1627 = vmatprep.mubr.bf16.mxu1 %v1532_v20  ;;  %v5201_v26 = vld [vmem:[%s6984_s1 + $0xd4] ss:$8 sps:$4 sm:$0xff]   ;;  %v5208_v27 = vld [vmem:[%s6984_s1 + $0xd0] ss:$8 sps:$4 sm:$0xff]   ;;  %v5215_v28 = vld [vmem:[%s6984_s1 + $0xc4] ss:$8 sps:$4 sm:$0xff]  }
  0x4a   : > { %671 = vmatpush1.bf16.msra.mxu0 %v5092_v5  ;;  %1600 = vmatpush1.bf16.msra.mxu1 %v5092_v5  ;;  %v5222_v29 = vld [vmem:[%s6984_s1 + $0xc0] ss:$8 sps:$4 sm:$0xff]   ;;  %v5229_v30 = vld [vmem:[%s6984_s1 + $0xb4] ss:$8 sps:$4 sm:$0xff]   ;;  %v5236_v31 = vld [vmem:[%s6984_s1 + $0xb0] ss:$8 sps:$4 sm:$0xff]  }
  0x4b   : > { %672 = vmatprep.subr.bf16.mxu0 %v5099_v6  ;;  %1601 = vmatprep.subr.bf16.mxu1 %v5099_v6  ;;  %v5243_v32 = vld [vmem:[%s6984_s1 + $0xa4] ss:$8 sps:$4 sm:$0xff]   ;;  %v5250_v33 = vld [vmem:[%s6984_s1 + $0xa0] ss:$8 sps:$4 sm:$0xff]   ;;  %v5257_v34 = vld [vmem:[%s6984_s1 + $0x94] ss:$8 sps:$4 sm:$0xff]  }
  0x4c   : > { %v5264_v35 = vld [vmem:[%s6984_s1 + $0x90] ss:$8 sps:$4 sm:$0xff]   ;;  %v5271_v36 = vld [vmem:[%s6984_s1 + $0x84] ss:$8 sps:$4 sm:$0xff]   ;;  %v5277_v37 = vld [vmem:[%s6984_s1 + $0x80] ss:$8 sps:$4 sm:$0xff]  }
  0x4d   : > { %v1403_v40 = vld [vmem:[%s5047_s6] sm:$0xff]  ;;  %v1405_v41 = vld [vmem:[%s5047_s6 + $0x10] sm:$0xff]  ;;  %v4236_v42 = vld [vmem:[%s5047_s6 + $0x428] sm:$0xff]  ;;  %s4084_s12 = sshll.u32 %s5566_s23, 4  ;;  %p6996_p5 = scmp.ne.s32.totalorder %s6992_s27, 0  ;;  %s6658_s12 = int_to_ptr.vmem [resolvable:$true] %s4084_s12 }
  0x4e   : > { %673 = vmatpush1.bf16.msra.mxu0 %v5106_v7  ;;  %1602 = vmatpush1.bf16.msra.mxu1 %v5106_v7  ;;  %v4238_v43 = vld [vmem:[%s5047_s6 + $0x438] sm:$0xff]  ;;  %v1408_v44 = vld [vmem:[%s5047_s6 + $0x28] sm:$0xff]  ;;  %v1531_v47 = vpack.c.bf16 %v1405_v41, %v1403_v40  ;;  %v4235_v50 = vld [vmem:[%s5047_s6 + $0x420] sm:$0xff]  ;;  %s4809_s20 = scalar_lea.vmem %s6658_s12, 16384  ;;  %s4916_s5 = smov [#allocation7]  }
  0x4f   : > { %674 = vmatprep.subr.bf16.mxu0 %v5113_v8  ;;  %1603 = vmatprep.subr.bf16.mxu1 %v5113_v8  ;;  %v1410_v45 = vld [vmem:[%s5047_s6 + $0x38] sm:$0xff]  ;;  %v434_v48 = vpack.c.bf16 %v4238_v43, %v4236_v42  ;;  %v4237_v51 = vld [vmem:[%s5047_s6 + $0x430] sm:$0xff]  ;;  %v1407_v52 = vld [vmem:[%s5047_s6 + $0x20] sm:$0xff]  ;;  %p4810_p4 = scmp.ne.s32.totalorder %s6658_s12, %s4809_s20  ;;  %s4813_s30 = sshll.u32 %s4916_s5, 4  ;;  %s4814_s30 = int_to_ptr.vmem [resolvable:$false] %s4813_s30 }
  0x50   : > { %v1534_v49 = vpack.c.bf16 %v1410_v45, %v1408_v44  ;;  %v1409_v53 = vld [vmem:[%s5047_s6 + $0x30] sm:$0xff]  ;;  %v4240_v54 = vld [vmem:[%s5047_s6 + $0x448] sm:$0xff]  ;;  %v4242_v55 = vld [vmem:[%s5047_s6 + $0x458] sm:$0xff]  ;;  %v433_v58 = vpack.c.bf16 %v4237_v51, %v4235_v50  ;;  %s4815_s25 = scalar_lea.vmem %s4814_s30, 32768  ;;  %p4816_p13 = scmp.lt.s32.totalorder %s6658_s12, %s4814_s30 }
  0x51   : > { %v1412_v56 = vld [vmem:[%s5047_s6 + $0x48] sm:$0xff]  ;;  %v1414_v57 = vld [vmem:[%s5047_s6 + $0x58] sm:$0xff]  ;;  %v1533_v59 = vpack.c.bf16 %v1409_v53, %v1407_v52  ;;  %v436_v60 = vpack.c.bf16 %v4242_v55, %v4240_v54  ;;  %v4239_v62 = vld [vmem:[%s5047_s6 + $0x440] sm:$0xff]  ;;  %p4811_p11 = pnand %p4810_p4, %p6996_p5  ;;  %p4817_p1 = scmp.lt.s32.totalorder %s4815_s25, %s4809_s20 }
  0x52   : > { %675 = vmatpush1.bf16.msra.mxu0 %v5120_v9  ;;  %1604 = vmatpush1.bf16.msra.mxu1 %v5120_v9  ;;  %v1536_v61 = vpack.c.bf16 %v1414_v57, %v1412_v56  ;;  %v4241_v63 = vld [vmem:[%s5047_s6 + $0x450] sm:$0xff]  ;;  %v4246_v13 = vld [vmem:[%s5047_s6 + $0x478] sm:$0xff]  ;;  %v1416_v14 = vld [vmem:[%s5047_s6 + $0x68] sm:$0xff] }
  0x53   : > { %676 = vmatprep.subr.bf16.mxu0 %v5127_v10  ;;  %1605 = vmatprep.subr.bf16.mxu1 %v5127_v10  ;;  %v1418_v15 = vld [vmem:[%s5047_s6 + $0x78] sm:$0xff]  ;;  %v1415_v20 = vld [vmem:[%s5047_s6 + $0x60] sm:$0xff]  ;;  %v1417_v38 = vld [vmem:[%s5047_s6 + $0x70] sm:$0xff]  ;;  %p4812_p12 = pneg %p4811_p11  ;;  %p4818_p2 = por %p4817_p1, %p4816_p13 }
  0x54   : > { %v1538_v18 = vpack.c.bf16 %v1418_v15, %v1416_v14  ;;  %v4248_v39 = vld [vmem:[%s5047_s6 + $0x488] sm:$0xff]  ;;  %v4250_v40 = vld [vmem:[%s5047_s6 + $0x498] sm:$0xff]  ;;  %v1419_v45 = vld [vmem:[%s5047_s6 + $0x80] sm:$0xff] }
  0x55   : > { %v1420_v41 = vld [vmem:[%s5047_s6 + $0x88] sm:$0xff]  ;;  %v1422_v42 = vld [vmem:[%s5047_s6 + $0x98] sm:$0xff]  ;;  %v440_v43 = vpack.c.bf16 %v4250_v40, %v4248_v39  ;;  %v1423_v53 = vld [vmem:[%s5047_s6 + $0xa0] sm:$0xff]  ;;  %p4819_p0 = pnand %p4818_p2, %p4812_p12 }
  0x56   : > { %677 = vmatpush1.bf16.msra.mxu0 %v5134_v11  ;;  %1606 = vmatpush1.bf16.msra.mxu1 %v5134_v11  ;;  %v1540_v44 = vpack.c.bf16 %v1422_v42, %v1420_v41  ;;  %v1426_v50 = vld [vmem:[%s5047_s6 + $0xb8] sm:$0xff]  ;;  %v1425_v54 = vld [vmem:[%s5047_s6 + $0xb0] sm:$0xff]  ;;  %v4256_v55 = vld [vmem:[%s5047_s6 + $0x4c8] sm:$0xff] }
  0x57   : > { %678 = vmatprep.subr.bf16.mxu0 %v5141_v12  ;;  %1607 = vmatprep.subr.bf16.mxu1 %v5141_v12  ;;  %v4258_v56 = vld [vmem:[%s5047_s6 + $0x4d8] sm:$0xff]  ;;  %v1428_v57 = vld [vmem:[%s5047_s6 + $0xc8] sm:$0xff]  ;;  %v1431_v15 = vld [vmem:[%s5047_s6 + $0xe0] sm:$0xff] }
  0x58   : > { %v1437_v39 = vld [vmem:[%s5047_s6 + $0x110] sm:$0xff]  ;;  %v4268_v40 = vld [vmem:[%s5047_s6 + $0x528] sm:$0xff]  ;;  %v4270_v41 = vld [vmem:[%s5047_s6 + $0x538] sm:$0xff] }
  0x59   : > { %v1440_v42 = vld [vmem:[%s5047_s6 + $0x128] sm:$0xff] }
  0x5a   : > { %679 = vmatpush1.bf16.msra.mxu0 %v5151_v17  ;;  %1608 = vmatpush1.bf16.msra.mxu1 %v5151_v17 }
  0x5b   : > { %680 = vmatprep.subr.bf16.mxu0 %v5159_v19  ;;  %1609 = vmatprep.subr.bf16.mxu1 %v5159_v19 }
  0x5e   : > { %681 = vmatpush1.bf16.msra.mxu0 %v5166_v21  ;;  %1610 = vmatpush1.bf16.msra.mxu1 %v5166_v21 }
  0x5f   : > { %682 = vmatprep.subr.bf16.mxu0 %v5173_v22  ;;  %1611 = vmatprep.subr.bf16.mxu1 %v5173_v22 }
  0x62   : > { %683 = vmatpush2.bf16.msra.mxu0 %v5180_v23  ;;  %1612 = vmatpush2.bf16.msra.mxu1 %v5180_v23 }
  0x63   : > { %684 = vmatprep.subr.bf16.mxu0 %v5187_v24  ;;  %1613 = vmatprep.subr.bf16.mxu1 %v5187_v24 }
  0x66   : > { %685 = vmatpush2.bf16.msra.mxu0 %v5194_v25  ;;  %1614 = vmatpush2.bf16.msra.mxu1 %v5194_v25 }
  0x67   : > { %686 = vmatprep.subr.bf16.mxu0 %v5201_v26  ;;  %1615 = vmatprep.subr.bf16.mxu1 %v5201_v26 }
  0x6a   : > { %687 = vmatpush2.bf16.msra.mxu0 %v5208_v27  ;;  %1616 = vmatpush2.bf16.msra.mxu1 %v5208_v27 }
  0x6b   : > { %688 = vmatprep.subr.bf16.mxu0 %v5215_v28  ;;  %1617 = vmatprep.subr.bf16.mxu1 %v5215_v28 }
  0x6e   : > { %689 = vmatpush2.bf16.msra.mxu0 %v5222_v29  ;;  %1618 = vmatpush2.bf16.msra.mxu1 %v5222_v29 }
  0x6f   : > { %690 = vmatprep.subr.bf16.mxu0 %v5229_v30  ;;  %1619 = vmatprep.subr.bf16.mxu1 %v5229_v30 }
  0x72   : > { %691 = vmatpush2.bf16.msra.mxu0 %v5236_v31  ;;  %1620 = vmatpush2.bf16.msra.mxu1 %v5236_v31 }
  0x73   : > { %692 = vmatprep.subr.bf16.mxu0 %v5243_v32  ;;  %1621 = vmatprep.subr.bf16.mxu1 %v5243_v32 }
  0x76   : > { %693 = vmatpush2.bf16.msra.mxu0 %v5250_v33  ;;  %1622 = vmatpush2.bf16.msra.mxu1 %v5250_v33 }
  0x77   : > { %694 = vmatprep.subr.bf16.mxu0 %v5257_v34  ;;  %1623 = vmatprep.subr.bf16.mxu1 %v5257_v34 }
  0x7a   : > { %695 = vmatpush2.bf16.msra.mxu0 %v5264_v35  ;;  %1624 = vmatpush2.bf16.msra.mxu1 %v5264_v35 }
  0x7b   : > { %696 = vmatprep.subr.bf16.mxu0 %v5271_v36  ;;  %1625 = vmatprep.subr.bf16.mxu1 %v5271_v36 }
  0x7e   : > { %697 = vmatpush2.bf16.msra.mxu0 %v5277_v37  ;;  %1626 = vmatpush2.bf16.msra.mxu1 %v5277_v37 }
  0x7f   : > { %2525 = vmatprep.subr.bf16.mxu0 %v5060_v0  ;;  %3455 = vmatprep.subr.bf16.mxu1 %v5060_v0  ;;  %v1411_v0 = vld [vmem:[%s5047_s6 + $0x40] sm:$0xff] }
  0x81   : > { %699 = vmatmul.mubr.bf16.vlgmr.msra.gmra.mxu0 %v431_v46  ;;  %1628 = vmatmul.mubr.bf16.vlgmr.msra.gmra.mxu1 %v1531_v47  ;;  %v1421_v46 = vld [vmem:[%s5047_s6 + $0x90] sm:$0xff]  ;;  %v4252_v47 = vld [vmem:[%s5047_s6 + $0x4a8] sm:$0xff] }
  0x82   : > { %2526 = vmatpush1.bf16.msra.mxu0 %v5065_v1  ;;  %708 = vmatprep.mubr.bf16.mxu0 %v434_v48  ;;  %v4254_v48 = vld [vmem:[%s5047_s6 + $0x4b8] sm:$0xff] }
  0x83   : > { %3456 = vmatpush1.bf16.msra.mxu1 %v5065_v1  ;;  %1637 = vmatprep.mubr.bf16.mxu1 %v1534_v49  ;;  %v1413_v1 = vld [vmem:[%s5047_s6 + $0x50] sm:$0xff]  ;;  %v1424_v49 = vld [vmem:[%s5047_s6 + $0xa8] sm:$0xff]  ;;  %v442_v51 = vpack.c.bf16 %v4254_v48, %v4252_v47  ;;  %v1446_v47 = vld [vmem:[%s5047_s6 + $0x158] sm:$0xff] }
  0x84   : > { %2527 = vmatprep.subr.bf16.mxu0 %v5071_v2  ;;  %3457 = vmatprep.subr.bf16.mxu1 %v5071_v2  ;;  %v4244_v2 = vld [vmem:[%s5047_s6 + $0x468] sm:$0xff]  ;;  %v1542_v52 = vpack.c.bf16 %v1426_v50, %v1424_v49 }
  0x85   : > { %v438_v16 = vpack.c.bf16 %v4246_v13, %v4244_v2  ;;  %v1434_v2 = vld [vmem:[%s5047_s6 + $0xf8] sm:$0xff] }
  0x86   : > { %2528 = vmatpush1.bf16.msra.mxu0 %v5078_v3 }
  0x87   : > { %3458 = vmatpush1.bf16.msra.mxu1 %v5078_v3  ;;  %2529 = vmatprep.subr.bf16.mxu0 %v5085_v4  ;;  %v435_v3 = vpack.c.bf16 %v4241_v63, %v4239_v62  ;;  %v1429_v62 = vld [vmem:[%s5047_s6 + $0xd0] sm:$0xff]  ;;  %v4260_v63 = vld [vmem:[%s5047_s6 + $0x4e8] sm:$0xff] }
  0x88   : > { %3459 = vmatprep.subr.bf16.mxu1 %v5085_v4  ;;  %v1535_v4 = vpack.c.bf16 %v1413_v1, %v1411_v0  ;;  %v4262_v0 = vld [vmem:[%s5047_s6 + $0x4f8] sm:$0xff]  ;;  %v1432_v1 = vld [vmem:[%s5047_s6 + $0xe8] sm:$0xff] }
  0x89   : > { %709 = vmatmul.mubr.bf16.gmra.mxu0 %v433_v58  ;;  %1638 = vmatmul.mubr.bf16.gmra.mxu1 %v1533_v59  ;;  %v1430_v58 = vld [vmem:[%s5047_s6 + $0xd8] sm:$0xff]  ;;  %v444_v59 = vpack.c.bf16 %v4258_v56, %v4256_v55  ;;  %v446_v13 = vpack.c.bf16 %v4262_v0, %v4260_v63  ;;  %v1546_v14 = vpack.c.bf16 %v1434_v2, %v1432_v1 }
  0x8a   : > { %718 = vmatprep.mubr.bf16.mxu0 %v436_v60  ;;  %1647 = vmatprep.mubr.bf16.mxu1 %v1536_v61  ;;  %v1544_v60 = vpack.c.bf16 %v1430_v58, %v1428_v57  ;;  %v1427_v61 = vld [vmem:[%s5047_s6 + $0xc0] sm:$0xff] }
  0x8b   : > { %2530 = vmatpush1.bf16.msra.mxu0 %v5092_v5  ;;  %3460 = vmatpush1.bf16.msra.mxu1 %v5092_v5  ;;  %v4243_v5 = vld [vmem:[%s5047_s6 + $0x460] sm:$0xff] }
  0x8c   : > { %2531 = vmatprep.subr.bf16.mxu0 %v5099_v6  ;;  %3461 = vmatprep.subr.bf16.mxu1 %v5099_v6  ;;  %v4245_v6 = vld [vmem:[%s5047_s6 + $0x470] sm:$0xff] }
  0x8f   : > { %2532 = vmatpush1.bf16.msra.mxu0 %v5106_v7  ;;  %3462 = vmatpush1.bf16.msra.mxu1 %v5106_v7  ;;  %v437_v7 = vpack.c.bf16 %v4245_v6, %v4243_v5  ;;  %v1438_v5 = vld [vmem:[%s5047_s6 + $0x118] sm:$0xff] }
  0x90   : > { %2533 = vmatprep.subr.bf16.mxu0 %v5113_v8  ;;  %3463 = vmatprep.subr.bf16.mxu1 %v5113_v8  ;;  %v1537_v8 = vpack.c.bf16 %v1417_v38, %v1415_v20  ;;  %v1435_v38 = vld [vmem:[%s5047_s6 + $0x100] sm:$0xff] }
  0x91   : > { %719 = vmatmul.mubr.bf16.gmra.mxu0 %v435_v3  ;;  %1648 = vmatmul.mubr.bf16.gmra.mxu1 %v1535_v4  ;;  %v1433_v3 = vld [vmem:[%s5047_s6 + $0xf0] sm:$0xff]  ;;  %v4264_v4 = vld [vmem:[%s5047_s6 + $0x508] sm:$0xff] }
  0x92   : > { %728 = vmatprep.mubr.bf16.mxu0 %v438_v16  ;;  %1657 = vmatprep.mubr.bf16.mxu1 %v1538_v18  ;;  %v4266_v16 = vld [vmem:[%s5047_s6 + $0x518] sm:$0xff]  ;;  %v1436_v18 = vld [vmem:[%s5047_s6 + $0x108] sm:$0xff] }
  0x93   : > { %2534 = vmatpush1.bf16.msra.mxu0 %v5120_v9  ;;  %3464 = vmatpush1.bf16.msra.mxu1 %v5120_v9  ;;  %v4247_v9 = vld [vmem:[%s5047_s6 + $0x480] sm:$0xff]  ;;  %v448_v6 = vpack.c.bf16 %v4266_v16, %v4264_v4  ;;  %v1548_v20 = vpack.c.bf16 %v1438_v5, %v1436_v18 }
  0x94   : > { %2535 = vmatprep.subr.bf16.mxu0 %v5127_v10  ;;  %3465 = vmatprep.subr.bf16.mxu1 %v5127_v10  ;;  %v4249_v10 = vld [vmem:[%s5047_s6 + $0x490] sm:$0xff] }
  0x97   : > { %2536 = vmatpush1.bf16.msra.mxu0 %v5134_v11  ;;  %3466 = vmatpush1.bf16.msra.mxu1 %v5134_v11  ;;  %v439_v11 = vpack.c.bf16 %v4249_v10, %v4247_v9  ;;  %v1441_v9 = vld [vmem:[%s5047_s6 + $0x130] sm:$0xff]  ;;  %v4272_v10 = vld [vmem:[%s5047_s6 + $0x548] sm:$0xff] }
  0x98   : > { %2537 = vmatprep.subr.bf16.mxu0 %v5141_v12  ;;  %3467 = vmatprep.subr.bf16.mxu1 %v5141_v12  ;;  %v1539_v12 = vpack.c.bf16 %v1421_v46, %v1419_v45  ;;  %v4274_v45 = vld [vmem:[%s5047_s6 + $0x558] sm:$0xff]  ;;  %v1444_v46 = vld [vmem:[%s5047_s6 + $0x148] sm:$0xff] }
  0x99   : > { %729 = vmatmul.mubr.bf16.gmra.mxu0 %v437_v7  ;;  %1658 = vmatmul.mubr.bf16.gmra.mxu1 %v1537_v8  ;;  %v1442_v7 = vld [vmem:[%s5047_s6 + $0x138] sm:$0xff]  ;;  %v450_v8 = vpack.c.bf16 %v4270_v41, %v4268_v40  ;;  %v452_v49 = vpack.c.bf16 %v4274_v45, %v4272_v10  ;;  %v1552_v50 = vpack.c.bf16 %v1446_v47, %v1444_v46 }
  0x9a   : > { %738 = vmatprep.mubr.bf16.mxu0 %v440_v43  ;;  %1667 = vmatprep.mubr.bf16.mxu1 %v1540_v44  ;;  %v1550_v43 = vpack.c.bf16 %v1442_v7, %v1440_v42  ;;  %v4269_v44 = vld [vmem:[%s5047_s6 + $0x530] sm:$0xff] }
  0x9b   : > { %2538 = vmatpush1.bf16.msra.mxu0 %v5151_v17  ;;  %3468 = vmatpush1.bf16.msra.mxu1 %v5151_v17  ;;  %v4251_v17 = vld [vmem:[%s5047_s6 + $0x4a0] sm:$0xff] }
  0x9c   : > { %2539 = vmatprep.subr.bf16.mxu0 %v5159_v19  ;;  %3469 = vmatprep.subr.bf16.mxu1 %v5159_v19  ;;  %v4253_v19 = vld [vmem:[%s5047_s6 + $0x4b0] sm:$0xff] }
  0x9f   : > { %2540 = vmatpush1.bf16.msra.mxu0 %v5166_v21  ;;  %3470 = vmatpush1.bf16.msra.mxu1 %v5166_v21  ;;  %v441_v21 = vpack.c.bf16 %v4253_v19, %v4251_v17  ;;  %v4276_v17 = vld [vmem:[%s5047_s6 + $0x568] sm:$0xff]  ;;  %v4278_v19 = vld [vmem:[%s5047_s6 + $0x578] sm:$0xff] }
  0xa0   : > { %2541 = vmatprep.subr.bf16.mxu0 %v5173_v22  ;;  %3471 = vmatprep.subr.bf16.mxu1 %v5173_v22  ;;  %v1541_v22 = vpack.c.bf16 %v1425_v54, %v1423_v53  ;;  %v1448_v53 = vld [vmem:[%s5047_s6 + $0x168] sm:$0xff]  ;;  %v1450_v54 = vld [vmem:[%s5047_s6 + $0x178] sm:$0xff]  ;;  %v454_v57 = vpack.c.bf16 %v4278_v19, %v4276_v17 }
  0xa1   : > { %739 = vmatmul.mubr.bf16.gmra.mxu0 %v439_v11  ;;  %1668 = vmatmul.mubr.bf16.gmra.mxu1 %v1539_v12  ;;  %v4271_v11 = vld [vmem:[%s5047_s6 + $0x540] sm:$0xff]  ;;  %v4273_v12 = vld [vmem:[%s5047_s6 + $0x550] sm:$0xff]  ;;  %v1554_v58 = vpack.c.bf16 %v1450_v54, %v1448_v53 }
  0xa2   : > { %748 = vmatprep.mubr.bf16.mxu0 %v442_v51  ;;  %1677 = vmatprep.mubr.bf16.mxu1 %v1542_v52  ;;  %v1443_v51 = vld [vmem:[%s5047_s6 + $0x140] sm:$0xff]  ;;  %v1445_v52 = vld [vmem:[%s5047_s6 + $0x150] sm:$0xff]  ;;  %v451_v55 = vpack.c.bf16 %v4273_v12, %v4271_v11  ;;  %v4296_v11 = vld [vmem:[%s5047_s6 + $0x608] sm:$0xff] }
  0xa3   : > { %2542 = vmatpush2.bf16.msra.mxu0 %v5180_v23  ;;  %3472 = vmatpush2.bf16.msra.mxu1 %v5180_v23  ;;  %v4255_v23 = vld [vmem:[%s5047_s6 + $0x4c0] sm:$0xff]  ;;  %v1551_v56 = vpack.c.bf16 %v1445_v52, %v1443_v51  ;;  %v4298_v12 = vld [vmem:[%s5047_s6 + $0x618] sm:$0xff]  ;;  %v1468_v51 = vld [vmem:[%s5047_s6 + $0x208] sm:$0xff] }
  0xa4   : > { %2543 = vmatprep.subr.bf16.mxu0 %v5187_v24  ;;  %3473 = vmatprep.subr.bf16.mxu1 %v5187_v24  ;;  %v4257_v24 = vld [vmem:[%s5047_s6 + $0x4d0] sm:$0xff]  ;;  %v1470_v52 = vld [vmem:[%s5047_s6 + $0x218] sm:$0xff]  ;;  %v464_v53 = vpack.c.bf16 %v4298_v12, %v4296_v11 }
  0xa5   : > { %v1564_v54 = vpack.c.bf16 %v1470_v52, %v1468_v51 }
  0xa7   : > { %2544 = vmatpush2.bf16.msra.mxu0 %v5194_v25  ;;  %3474 = vmatpush2.bf16.msra.mxu1 %v5194_v25  ;;  %v443_v25 = vpack.c.bf16 %v4257_v24, %v4255_v23  ;;  %v4280_v23 = vld [vmem:[%s5047_s6 + $0x588] sm:$0xff]  ;;  %v4282_v24 = vld [vmem:[%s5047_s6 + $0x598] sm:$0xff] }
  0xa8   : > { %2545 = vmatprep.subr.bf16.mxu0 %v5201_v26  ;;  %3475 = vmatprep.subr.bf16.mxu1 %v5201_v26  ;;  %v1543_v26 = vpack.c.bf16 %v1429_v62, %v1427_v61  ;;  %v1452_v61 = vld [vmem:[%s5047_s6 + $0x188] sm:$0xff]  ;;  %v1454_v62 = vld [vmem:[%s5047_s6 + $0x198] sm:$0xff]  ;;  %v456_v1 = vpack.c.bf16 %v4282_v24, %v4280_v23 }
  0xa9   : > { %749 = vmatmul.mubr.bf16.gmra.mxu0 %v441_v21  ;;  %1678 = vmatmul.mubr.bf16.gmra.mxu1 %v1541_v22  ;;  %v4275_v21 = vld [vmem:[%s5047_s6 + $0x560] sm:$0xff]  ;;  %v4277_v22 = vld [vmem:[%s5047_s6 + $0x570] sm:$0xff]  ;;  %v1556_v2 = vpack.c.bf16 %v1454_v62, %v1452_v61 }
  0xaa   : > { %758 = vmatprep.mubr.bf16.mxu0 %v444_v59  ;;  %1687 = vmatprep.mubr.bf16.mxu1 %v1544_v60  ;;  %v1447_v59 = vld [vmem:[%s5047_s6 + $0x160] sm:$0xff]  ;;  %v1449_v60 = vld [vmem:[%s5047_s6 + $0x170] sm:$0xff]  ;;  %v453_v63 = vpack.c.bf16 %v4277_v22, %v4275_v21  ;;  %v4300_v21 = vld [vmem:[%s5047_s6 + $0x628] sm:$0xff] }
  0xab   : > { %2546 = vmatpush2.bf16.msra.mxu0 %v5208_v27  ;;  %3476 = vmatpush2.bf16.msra.mxu1 %v5208_v27  ;;  %v4259_v27 = vld [vmem:[%s5047_s6 + $0x4e0] sm:$0xff]  ;;  %v1553_v0 = vpack.c.bf16 %v1449_v60, %v1447_v59  ;;  %v4302_v22 = vld [vmem:[%s5047_s6 + $0x638] sm:$0xff]  ;;  %v1472_v59 = vld [vmem:[%s5047_s6 + $0x228] sm:$0xff] }
  0xac   : > { %2547 = vmatprep.subr.bf16.mxu0 %v5215_v28  ;;  %3477 = vmatprep.subr.bf16.mxu1 %v5215_v28  ;;  %v4261_v28 = vld [vmem:[%s5047_s6 + $0x4f0] sm:$0xff]  ;;  %v1474_v60 = vld [vmem:[%s5047_s6 + $0x238] sm:$0xff]  ;;  %v466_v61 = vpack.c.bf16 %v4302_v22, %v4300_v21 }
  0xad   : > { %v1566_v62 = vpack.c.bf16 %v1474_v60, %v1472_v59 }
  0xaf   : > { %2548 = vmatpush2.bf16.msra.mxu0 %v5222_v29  ;;  %3478 = vmatpush2.bf16.msra.mxu1 %v5222_v29  ;;  %v445_v29 = vpack.c.bf16 %v4261_v28, %v4259_v27  ;;  %v4284_v27 = vld [vmem:[%s5047_s6 + $0x5a8] sm:$0xff]  ;;  %v4286_v28 = vld [vmem:[%s5047_s6 + $0x5b8] sm:$0xff] }
  0xb0   : > { %2549 = vmatprep.subr.bf16.mxu0 %v5229_v30  ;;  %3479 = vmatprep.subr.bf16.mxu1 %v5229_v30  ;;  %v1545_v30 = vpack.c.bf16 %v1433_v3, %v1431_v15  ;;  %v1456_v15 = vld [vmem:[%s5047_s6 + $0x1a8] sm:$0xff]  ;;  %v1458_v3 = vld [vmem:[%s5047_s6 + $0x1b8] sm:$0xff]  ;;  %v458_v18 = vpack.c.bf16 %v4286_v28, %v4284_v27 }
  0xb1   : > { %759 = vmatmul.mubr.bf16.gmra.mxu0 %v443_v25  ;;  %1688 = vmatmul.mubr.bf16.gmra.mxu1 %v1543_v26  ;;  %v4279_v25 = vld [vmem:[%s5047_s6 + $0x580] sm:$0xff]  ;;  %v4281_v26 = vld [vmem:[%s5047_s6 + $0x590] sm:$0xff]  ;;  %v1558_v5 = vpack.c.bf16 %v1458_v3, %v1456_v15 }
  0xb2   : > { %768 = vmatprep.mubr.bf16.mxu0 %v446_v13  ;;  %1697 = vmatprep.mubr.bf16.mxu1 %v1546_v14  ;;  %v1451_v13 = vld [vmem:[%s5047_s6 + $0x180] sm:$0xff]  ;;  %v1453_v14 = vld [vmem:[%s5047_s6 + $0x190] sm:$0xff]  ;;  %v455_v4 = vpack.c.bf16 %v4281_v26, %v4279_v25  ;;  %v4304_v25 = vld [vmem:[%s5047_s6 + $0x648] sm:$0xff] }
  0xb3   : > { %2550 = vmatpush2.bf16.msra.mxu0 %v5236_v31  ;;  %3480 = vmatpush2.bf16.msra.mxu1 %v5236_v31  ;;  %v4263_v31 = vld [vmem:[%s5047_s6 + $0x500] sm:$0xff]  ;;  %v1555_v16 = vpack.c.bf16 %v1453_v14, %v1451_v13  ;;  %v4306_v26 = vld [vmem:[%s5047_s6 + $0x658] sm:$0xff]  ;;  %v1476_v13 = vld [vmem:[%s5047_s6 + $0x248] sm:$0xff] }
  0xb4   : > { %2551 = vmatprep.subr.bf16.mxu0 %v5243_v32  ;;  %3481 = vmatprep.subr.bf16.mxu1 %v5243_v32  ;;  %v4265_v32 = vld [vmem:[%s5047_s6 + $0x510] sm:$0xff]  ;;  %v1478_v14 = vld [vmem:[%s5047_s6 + $0x258] sm:$0xff]  ;;  %v468_v15 = vpack.c.bf16 %v4306_v26, %v4304_v25 }
  0xb5   : > { %v1568_v3 = vpack.c.bf16 %v1478_v14, %v1476_v13 }
  0xb7   : > { %2552 = vmatpush2.bf16.msra.mxu0 %v5250_v33  ;;  %3482 = vmatpush2.bf16.msra.mxu1 %v5250_v33  ;;  %v447_v33 = vpack.c.bf16 %v4265_v32, %v4263_v31  ;;  %v4288_v31 = vld [vmem:[%s5047_s6 + $0x5c8] sm:$0xff]  ;;  %v4290_v32 = vld [vmem:[%s5047_s6 + $0x5d8] sm:$0xff] }
  0xb8   : > { %2553 = vmatprep.subr.bf16.mxu0 %v5257_v34  ;;  %3483 = vmatprep.subr.bf16.mxu1 %v5257_v34  ;;  %v1547_v34 = vpack.c.bf16 %v1437_v39, %v1435_v38  ;;  %v1460_v38 = vld [vmem:[%s5047_s6 + $0x1c8] sm:$0xff]  ;;  %v1462_v39 = vld [vmem:[%s5047_s6 + $0x1d8] sm:$0xff]  ;;  %v460_v42 = vpack.c.bf16 %v4290_v32, %v4288_v31 }
  0xb9   : > { %769 = vmatmul.mubr.bf16.gmra.mxu0 %v445_v29  ;;  %1698 = vmatmul.mubr.bf16.gmra.mxu1 %v1545_v30  ;;  %v4283_v29 = vld [vmem:[%s5047_s6 + $0x5a0] sm:$0xff]  ;;  %v4285_v30 = vld [vmem:[%s5047_s6 + $0x5b0] sm:$0xff]  ;;  %v1560_v7 = vpack.c.bf16 %v1462_v39, %v1460_v38 }
  0xba   : > { %778 = vmatprep.mubr.bf16.mxu0 %v448_v6  ;;  %1707 = vmatprep.mubr.bf16.mxu1 %v1548_v20  ;;  %v1455_v6 = vld [vmem:[%s5047_s6 + $0x1a0] sm:$0xff]  ;;  %v1457_v20 = vld [vmem:[%s5047_s6 + $0x1b0] sm:$0xff]  ;;  %v457_v40 = vpack.c.bf16 %v4285_v30, %v4283_v29  ;;  %v4308_v29 = vld [vmem:[%s5047_s6 + $0x668] sm:$0xff] }
  0xbb   : > { %2554 = vmatpush2.bf16.msra.mxu0 %v5264_v35  ;;  %3484 = vmatpush2.bf16.msra.mxu1 %v5264_v35  ;;  %v4267_v35 = vld [vmem:[%s5047_s6 + $0x520] sm:$0xff]  ;;  %v1557_v41 = vpack.c.bf16 %v1457_v20, %v1455_v6  ;;  %v4310_v30 = vld [vmem:[%s5047_s6 + $0x678] sm:$0xff]  ;;  %v1480_v6 = vld [vmem:[%s5047_s6 + $0x268] sm:$0xff] }
  0xbc   : > { %2555 = vmatprep.subr.bf16.mxu0 %v5271_v36  ;;  %3485 = vmatprep.subr.bf16.mxu1 %v5271_v36  ;;  %v1439_v36 = vld [vmem:[%s5047_s6 + $0x120] sm:$0xff]  ;;  %v1482_v20 = vld [vmem:[%s5047_s6 + $0x278] sm:$0xff]  ;;  %v470_v38 = vpack.c.bf16 %v4310_v30, %v4308_v29 }
  0xbd   : > { %v1549_v48 = vpack.c.bf16 %v1441_v9, %v1439_v36  ;;  %v1464_v36 = vld [vmem:[%s5047_s6 + $0x1e8] sm:$0xff]  ;;  %v1466_v9 = vld [vmem:[%s5047_s6 + $0x1f8] sm:$0xff]  ;;  %v1570_v39 = vpack.c.bf16 %v1482_v20, %v1480_v6 }
  0xbe   : > { %v1562_v47 = vpack.c.bf16 %v1466_v9, %v1464_v36  ;;  %v1502_v29 = vld [vmem:[%s5047_s6 + $0x318] sm:$0xff] }
  0xbf   : > { %2556 = vmatpush2.bf16.msra.mxu0 %v5277_v37  ;;  %3486 = vmatpush2.bf16.msra.mxu1 %v5277_v37  ;;  %v449_v37 = vpack.c.bf16 %v4269_v44, %v4267_v35  ;;  %v4292_v35 = vld [vmem:[%s5047_s6 + $0x5e8] sm:$0xff]  ;;  %v4294_v44 = vld [vmem:[%s5047_s6 + $0x5f8] sm:$0xff] }
  0xc0   : > { %v462_v46 = vpack.c.bf16 %v4294_v44, %v4292_v35 }
  0xc1   : > { %779 = vmatmul.mubr.bf16.gmra.mxu0 %v447_v33  ;;  %1708 = vmatmul.mubr.bf16.gmra.mxu1 %v1547_v34  ;;  %v4287_v33 = vld [vmem:[%s5047_s6 + $0x5c0] sm:$0xff]  ;;  %v4289_v34 = vld [vmem:[%s5047_s6 + $0x5d0] sm:$0xff] }
  0xc2   : > { %788 = vmatprep.mubr.bf16.mxu0 %v450_v8  ;;  %1717 = vmatprep.mubr.bf16.mxu1 %v1550_v43  ;;  %v1459_v8 = vld [vmem:[%s5047_s6 + $0x1c0] sm:$0xff]  ;;  %v1461_v43 = vld [vmem:[%s5047_s6 + $0x1d0] sm:$0xff]  ;;  %v459_v10 = vpack.c.bf16 %v4289_v34, %v4287_v33  ;;  %v4312_v33 = vld [vmem:[%s5047_s6 + $0x688] sm:$0xff] }
  0xc3   : > { %v1559_v45 = vpack.c.bf16 %v1461_v43, %v1459_v8  ;;  %v4314_v34 = vld [vmem:[%s5047_s6 + $0x698] sm:$0xff]  ;;  %v1484_v8 = vld [vmem:[%s5047_s6 + $0x288] sm:$0xff] }
  0xc4   : > { %v1486_v43 = vld [vmem:[%s5047_s6 + $0x298] sm:$0xff]  ;;  %v472_v36 = vpack.c.bf16 %v4314_v34, %v4312_v33  ;;  %v4332_v33 = vld [vmem:[%s5047_s6 + $0x728] sm:$0xff] }
  0xc5   : > { %v1572_v9 = vpack.c.bf16 %v1486_v43, %v1484_v8  ;;  %v4334_v34 = vld [vmem:[%s5047_s6 + $0x738] sm:$0xff]  ;;  %v1504_v8 = vld [vmem:[%s5047_s6 + $0x328] sm:$0xff] }
  0xc6   : > { %v1506_v43 = vld [vmem:[%s5047_s6 + $0x338] sm:$0xff] }
  0xc9   : > { %789 = vmatmul.mubr.bf16.gmra.mxu0 %v449_v37  ;;  %1718 = vmatmul.mubr.bf16.gmra.mxu1 %v1549_v48  ;;  %v4291_v37 = vld [vmem:[%s5047_s6 + $0x5e0] sm:$0xff]  ;;  %v4293_v48 = vld [vmem:[%s5047_s6 + $0x5f0] sm:$0xff] }
  0xca   : > { %798 = vmatprep.mubr.bf16.mxu0 %v452_v49  ;;  %1727 = vmatprep.mubr.bf16.mxu1 %v1552_v50  ;;  %v1463_v49 = vld [vmem:[%s5047_s6 + $0x1e0] sm:$0xff]  ;;  %v1465_v50 = vld [vmem:[%s5047_s6 + $0x1f0] sm:$0xff]  ;;  %v461_v17 = vpack.c.bf16 %v4293_v48, %v4291_v37  ;;  %v4316_v37 = vld [vmem:[%s5047_s6 + $0x6a8] sm:$0xff] }
  0xcb   : > { %v1561_v19 = vpack.c.bf16 %v1465_v50, %v1463_v49  ;;  %v4318_v48 = vld [vmem:[%s5047_s6 + $0x6b8] sm:$0xff]  ;;  %v1488_v49 = vld [vmem:[%s5047_s6 + $0x2a8] sm:$0xff] }
  0xcc   : > { %v1490_v50 = vld [vmem:[%s5047_s6 + $0x2b8] sm:$0xff]  ;;  %v474_v51 = vpack.c.bf16 %v4318_v48, %v4316_v37  ;;  %v4331_v48 = vld [vmem:[%s5047_s6 + $0x720] sm:$0xff] }
  0xcd   : > { %v1574_v52 = vpack.c.bf16 %v1490_v50, %v1488_v49  ;;  %v4333_v49 = vld [vmem:[%s5047_s6 + $0x730] sm:$0xff]  ;;  %v1503_v50 = vld [vmem:[%s5047_s6 + $0x320] sm:$0xff] }
  0xd1   : > { %799 = vmatmul.mubr.bf16.gmra.mxu0 %v451_v55  ;;  %1728 = vmatmul.mubr.bf16.gmra.mxu1 %v1551_v56  ;;  %v4295_v55 = vld [vmem:[%s5047_s6 + $0x600] sm:$0xff]  ;;  %v4297_v56 = vld [vmem:[%s5047_s6 + $0x610] sm:$0xff] }
  0xd2   : > { %808 = vmatprep.mubr.bf16.mxu0 %v454_v57  ;;  %1737 = vmatprep.mubr.bf16.mxu1 %v1554_v58  ;;  %v1467_v57 = vld [vmem:[%s5047_s6 + $0x200] sm:$0xff]  ;;  %v1469_v58 = vld [vmem:[%s5047_s6 + $0x210] sm:$0xff]  ;;  %v463_v23 = vpack.c.bf16 %v4297_v56, %v4295_v55  ;;  %v4320_v55 = vld [vmem:[%s5047_s6 + $0x6c8] sm:$0xff] }
  0xd3   : > { %v1563_v24 = vpack.c.bf16 %v1469_v58, %v1467_v57  ;;  %v4322_v56 = vld [vmem:[%s5047_s6 + $0x6d8] sm:$0xff]  ;;  %v1492_v57 = vld [vmem:[%s5047_s6 + $0x2c8] sm:$0xff] }
  0xd4   : > { %v1494_v58 = vld [vmem:[%s5047_s6 + $0x2d8] sm:$0xff]  ;;  %v476_v59 = vpack.c.bf16 %v4322_v56, %v4320_v55 }
  0xd5   : > { %v1576_v60 = vpack.c.bf16 %v1494_v58, %v1492_v57  ;;  %v1510_v55 = vld [vmem:[%s5047_s6 + $0x358] sm:$0xff] }
  0xd9   : > { %809 = vmatmul.mubr.bf16.gmra.mxu0 %v453_v63  ;;  %1738 = vmatmul.mubr.bf16.gmra.mxu1 %v1553_v0  ;;  %v4299_v63 = vld [vmem:[%s5047_s6 + $0x620] sm:$0xff]  ;;  %v4301_v0 = vld [vmem:[%s5047_s6 + $0x630] sm:$0xff] }
  0xda   : > { %818 = vmatprep.mubr.bf16.mxu0 %v456_v1  ;;  %1747 = vmatprep.mubr.bf16.mxu1 %v1556_v2  ;;  %v1471_v1 = vld [vmem:[%s5047_s6 + $0x220] sm:$0xff]  ;;  %v1473_v2 = vld [vmem:[%s5047_s6 + $0x230] sm:$0xff]  ;;  %v465_v27 = vpack.c.bf16 %v4301_v0, %v4299_v63  ;;  %v4324_v63 = vld [vmem:[%s5047_s6 + $0x6e8] sm:$0xff] }
  0xdb   : > { %v1565_v28 = vpack.c.bf16 %v1473_v2, %v1471_v1  ;;  %v4326_v0 = vld [vmem:[%s5047_s6 + $0x6f8] sm:$0xff]  ;;  %v1496_v1 = vld [vmem:[%s5047_s6 + $0x2e8] sm:$0xff] }
  0xdc   : > { %v1498_v2 = vld [vmem:[%s5047_s6 + $0x2f8] sm:$0xff]  ;;  %v478_v13 = vpack.c.bf16 %v4326_v0, %v4324_v63 }
  0xdd   : > { %v1578_v14 = vpack.c.bf16 %v1498_v2, %v1496_v1 }
  0xe1   : > { %819 = vmatmul.mubr.bf16.gmra.mxu0 %v455_v4  ;;  %1748 = vmatmul.mubr.bf16.gmra.mxu1 %v1555_v16  ;;  %v4303_v4 = vld [vmem:[%s5047_s6 + $0x640] sm:$0xff]  ;;  %v4305_v16 = vld [vmem:[%s5047_s6 + $0x650] sm:$0xff] }
  0xe2   : > { %828 = vmatprep.mubr.bf16.mxu0 %v458_v18  ;;  %1757 = vmatprep.mubr.bf16.mxu1 %v1558_v5  ;;  %v1475_v18 = vld [vmem:[%s5047_s6 + $0x240] sm:$0xff]  ;;  %v1477_v5 = vld [vmem:[%s5047_s6 + $0x250] sm:$0xff]  ;;  %v467_v31 = vpack.c.bf16 %v4305_v16, %v4303_v4  ;;  %v4328_v4 = vld [vmem:[%s5047_s6 + $0x708] sm:$0xff]  ;;  %v496_v16 = vlaneseq }
  0xe3   : > { %v1567_v32 = vpack.c.bf16 %v1477_v5, %v1475_v18  ;;  %v4330_v18 = vld [vmem:[%s5047_s6 + $0x718] sm:$0xff]  ;;  %v1500_v5 = vld [vmem:[%s5047_s6 + $0x308] sm:$0xff] }
  0xe4   : > { %v480_v20 = vpack.c.bf16 %v4330_v18, %v4328_v4  ;;  %v1509_v18 = vld [vmem:[%s5047_s6 + $0x350] sm:$0xff] }
  0xe9   : > { %829 = vmatmul.mubr.bf16.gmra.mxu0 %v457_v40  ;;  %1758 = vmatmul.mubr.bf16.gmra.mxu1 %v1557_v41  ;;  %v4307_v40 = vld [vmem:[%s5047_s6 + $0x660] sm:$0xff]  ;;  %v4309_v41 = vld [vmem:[%s5047_s6 + $0x670] sm:$0xff] }
  0xea   : > { %838 = vmatprep.mubr.bf16.mxu0 %v460_v42  ;;  %1767 = vmatprep.mubr.bf16.mxu1 %v1560_v7  ;;  %v1479_v42 = vld [vmem:[%s5047_s6 + $0x260] sm:$0xff]  ;;  %v1481_v7 = vld [vmem:[%s5047_s6 + $0x270] sm:$0xff]  ;;  %v469_v35 = vpack.c.bf16 %v4309_v41, %v4307_v40 }
  0xeb   : > { %v1569_v44 = vpack.c.bf16 %v1481_v7, %v1479_v42  ;;  %v4329_v40 = vld [vmem:[%s5047_s6 + $0x710] sm:$0xff]  ;;  %v1499_v42 = vld [vmem:[%s5047_s6 + $0x300] sm:$0xff] }
  0xec   : > { %v1501_v7 = vld [vmem:[%s5047_s6 + $0x310] sm:$0xff] }
  0xf1   : > { %839 = vmatmul.mubr.bf16.gmra.mxu0 %v459_v10  ;;  %1768 = vmatmul.mubr.bf16.gmra.mxu1 %v1559_v45  ;;  %v4311_v10 = vld [vmem:[%s5047_s6 + $0x680] sm:$0xff]  ;;  %v4313_v45 = vld [vmem:[%s5047_s6 + $0x690] sm:$0xff] }
  0xf2   : > { %848 = vmatprep.mubr.bf16.mxu0 %v462_v46  ;;  %1777 = vmatprep.mubr.bf16.mxu1 %v1562_v47  ;;  %v1483_v46 = vld [vmem:[%s5047_s6 + $0x280] sm:$0xff]  ;;  %v1485_v47 = vld [vmem:[%s5047_s6 + $0x290] sm:$0xff]  ;;  %v471_v11 = vpack.c.bf16 %v4313_v45, %v4311_v10  ;;  %v482_v10 = vpack.c.bf16 %v4334_v34, %v4332_v33  ;;  %v1582_v45 = vpack.c.bf16 %v1506_v43, %v1504_v8 }
  0xf3   : > { %v1571_v12 = vpack.c.bf16 %v1485_v47, %v1483_v46 }
  0xf9   : > { %849 = vmatmul.mubr.bf16.gmra.mxu0 %v461_v17  ;;  %1778 = vmatmul.mubr.bf16.gmra.mxu1 %v1561_v19  ;;  %v4315_v17 = vld [vmem:[%s5047_s6 + $0x6a0] sm:$0xff]  ;;  %v4317_v19 = vld [vmem:[%s5047_s6 + $0x6b0] sm:$0xff] }
  0xfa   : > { %858 = vmatprep.mubr.bf16.mxu0 %v464_v53  ;;  %1787 = vmatprep.mubr.bf16.mxu1 %v1564_v54  ;;  %v1487_v53 = vld [vmem:[%s5047_s6 + $0x2a0] sm:$0xff]  ;;  %v1489_v54 = vld [vmem:[%s5047_s6 + $0x2b0] sm:$0xff]  ;;  %v473_v21 = vpack.c.bf16 %v4317_v19, %v4315_v17  ;;  %v4338_v17 = vld [vmem:[%s5047_s6 + $0x758] sm:$0xff] }
  0xfb   : > { %v1573_v22 = vpack.c.bf16 %v1489_v54, %v1487_v53  ;;  %v1508_v54 = vld [vmem:[%s5047_s6 + $0x348] sm:$0xff] }
  0xfc   : > { %v1584_v63 = vpack.c.bf16 %v1510_v55, %v1508_v54 }
 0x101   : > { %859 = vmatmul.mubr.bf16.gmra.mxu0 %v463_v23  ;;  %1788 = vmatmul.mubr.bf16.gmra.mxu1 %v1563_v24  ;;  %v4319_v23 = vld [vmem:[%s5047_s6 + $0x6c0] sm:$0xff]  ;;  %v4321_v24 = vld [vmem:[%s5047_s6 + $0x6d0] sm:$0xff] }
 0x102   : > { %868 = vmatprep.mubr.bf16.mxu0 %v466_v61  ;;  %1797 = vmatprep.mubr.bf16.mxu1 %v1566_v62  ;;  %v1491_v61 = vld [vmem:[%s5047_s6 + $0x2c0] sm:$0xff]  ;;  %v1493_v62 = vld [vmem:[%s5047_s6 + $0x2d0] sm:$0xff]  ;;  %v475_v25 = vpack.c.bf16 %v4321_v24, %v4319_v23 }
 0x103   : > { %v1575_v26 = vpack.c.bf16 %v1493_v62, %v1491_v61 }
 0x109   : > { %869 = vmatmul.mubr.bf16.gmra.mxu0 %v465_v27  ;;  %1798 = vmatmul.mubr.bf16.gmra.mxu1 %v1565_v28  ;;  %v4323_v27 = vld [vmem:[%s5047_s6 + $0x6e0] sm:$0xff]  ;;  %v4325_v28 = vld [vmem:[%s5047_s6 + $0x6f0] sm:$0xff] }
 0x10a   : > { %878 = vmatprep.mubr.bf16.mxu0 %v468_v15  ;;  %1807 = vmatprep.mubr.bf16.mxu1 %v1568_v3  ;;  %v1495_v15 = vld [vmem:[%s5047_s6 + $0x2e0] sm:$0xff]  ;;  %v1497_v3 = vld [vmem:[%s5047_s6 + $0x2f0] sm:$0xff]  ;;  %v477_v30 = vpack.c.bf16 %v4325_v28, %v4323_v27 }
 0x10b   : > { %v1577_v6 = vpack.c.bf16 %v1497_v3, %v1495_v15  ;;  %v4335_v27 = vld [vmem:[%s5047_s6 + $0x740] sm:$0xff]  ;;  %v4337_v28 = vld [vmem:[%s5047_s6 + $0x750] sm:$0xff] }
 0x10c   : > { %v1507_v15 = vld [vmem:[%s5047_s6 + $0x340] sm:$0xff] }
 0x111   : > { %879 = vmatmul.mubr.bf16.gmra.mxu0 %v467_v31  ;;  %1808 = vmatmul.mubr.bf16.gmra.mxu1 %v1567_v32  ;;  %v497_v31 = vshrl.u32 %v496_v16, 7  ;;  %v1580_v32 = vpack.c.bf16 %v1502_v29, %v1500_v5  ;;  %v4340_v5 = vld [vmem:[%s5047_s6 + $0x768] sm:$0xff]  ;;  %v4342_v29 = vld [vmem:[%s5047_s6 + $0x778] sm:$0xff] }
 0x112   : > { %888 = vmatprep.mubr.bf16.mxu0 %v470_v38  ;;  %1817 = vmatprep.mubr.bf16.mxu1 %v1570_v39  ;;  %v301_v38 = vld [vmem:[#allocation5] sm:$0x3]  ;;  %v486_v33 = vpack.c.bf16 %v4342_v29, %v4340_v5  ;;  %v1517_v29 = vld [vmem:[%s5047_s6 + $0x390] sm:$0xff] }
 0x113   : > { %v4327_v39 = vld [vmem:[%s5047_s6 + $0x700] sm:$0xff]  ;;  %v498_v41 = vsub.s32 0, %v497_v31 }
 0x119   : > { %889 = vmatmul.mubr.bf16.gmra.mxu0 %v469_v35  ;;  %1818 = vmatmul.mubr.bf16.gmra.mxu1 %v1569_v44  ;;  %v502_v35 = vsub.s32 1, %v497_v31  ;;  %v479_v44 = vpack.c.bf16 %v4329_v40, %v4327_v39  ;;  %v1514_v31 = vld [vmem:[%s5047_s6 + $0x378] sm:$0xff] }
 0x11a   : > { %898 = vmatprep.mubr.bf16.mxu0 %v472_v36  ;;  %1827 = vmatprep.mubr.bf16.mxu1 %v1572_v9  ;;  %v1579_v36 = vpack.c.bf16 %v1501_v7, %v1499_v42  ;;  %v5550_v9 = vrot.slane %v301_v38, %v498_v41  ;;  %v483_v41 = vpack.c.bf16 %v4337_v28, %v4335_v27 }
 0x11b   : > { %v5552_v46 = vrot.slane %v301_v38, %v502_v35  ;;  %v1583_v7 = vpack.c.bf16 %v1509_v18, %v1507_v15  ;;  %v4343_v15 = vld [vmem:[%s5047_s6 + $0x780] sm:$0xff] }
 0x121   : > { %899 = vmatmul.mubr.bf16.gmra.mxu0 %v471_v11  ;;  %1828 = vmatmul.mubr.bf16.gmra.mxu1 %v1571_v12 }
 0x122   : > { %908 = vmatprep.mubr.bf16.mxu0 %v474_v51  ;;  %1837 = vmatprep.mubr.bf16.mxu1 %v1574_v52  ;;  %v1505_v51 = vld [vmem:[%s5047_s6 + $0x330] sm:$0xff]  ;;  %v4336_v52 = vld [vmem:[%s5047_s6 + $0x748] sm:$0xff] }
 0x123   : > { %v484_v23 = vpack.c.bf16 %v4338_v17, %v4336_v52  ;;  %v1513_v17 = vld [vmem:[%s5047_s6 + $0x370] sm:$0xff] }
 0x129   : > { %909 = vmatmul.mubr.bf16.gmra.mxu0 %v473_v21  ;;  %1838 = vmatmul.mubr.bf16.gmra.mxu1 %v1573_v22  ;;  %v481_v22 = vpack.c.bf16 %v4333_v49, %v4331_v48  ;;  %v4339_v49 = vld [vmem:[%s5047_s6 + $0x760] sm:$0xff] }
 0x12a   : > { %918 = vmatprep.mubr.bf16.mxu0 %v476_v59  ;;  %1847 = vmatprep.mubr.bf16.mxu1 %v1576_v60  ;;  %v1581_v60 = vpack.c.bf16 %v1505_v51, %v1503_v50  ;;  %v4341_v50 = vld [vmem:[%s5047_s6 + $0x770] sm:$0xff] }
 0x131   : > { %919 = vmatmul.mubr.bf16.gmra.mxu0 %v475_v25  ;;  %1848 = vmatmul.mubr.bf16.gmra.mxu1 %v1575_v26 }
 0x132   : > { %928 = vmatprep.mubr.bf16.mxu0 %v478_v13  ;;  %1857 = vmatprep.mubr.bf16.mxu1 %v1578_v14 }
 0x139   : > { %929 = vmatmul.mubr.bf16.gmra.mxu0 %v477_v30  ;;  %1858 = vmatmul.mubr.bf16.gmra.mxu1 %v1577_v6 }
 0x13a   : > { %938 = vmatprep.mubr.bf16.mxu0 %v480_v20  ;;  %1867 = vmatprep.mubr.bf16.mxu1 %v1580_v32  ;;  %v1512_v20 = vld [vmem:[%s5047_s6 + $0x368] sm:$0xff] }
 0x13b   : > { %v1586_v35 = vpack.c.bf16 %v1514_v31, %v1512_v20 }
 0x141   : > { %v700_v47 = vpop.f32.mrf.mxu0  ;;  %939 = vmatmul.mubr.bf16.gmra.mxu0 %v479_v44  ;;  %v1629_v37 = vpop.f32.mrf.mxu1  ;;  %1868 = vmatmul.mubr.bf16.gmra.mxu1 %v1579_v36 }
 0x142   : > { %v701_v11 = vadd.f32 %v700_v47, %v5550_v9  ;;  %v1630_v12 = vadd.f32 %v1629_v37, %v5550_v9  ;;  %948 = vmatprep.mubr.bf16.mxu0 %v482_v10  ;;  %1877 = vmatprep.mubr.bf16.mxu1 %v1582_v45 }
 0x143   : > { %v702_v19 = vpop.f32.mrf.mxu0  ;;  %v1631_v53 = vpop.f32.mrf.mxu1 }
 0x144   : > { %1019 = vst [vmem:[%s5566_s23] sm:$0xff] %v701_v11  ;;  %v703_v56 = vadd.f32 %v702_v19, %v5552_v46  ;;  %v1948_v57 = vadd.f32 %v1630_v12, %v701_v11  ;;  %v1632_v58 = vadd.f32 %v1631_v53, %v5552_v46  ;;  %v1511_v11 = vld [vmem:[%s5047_s6 + $0x360] sm:$0xff]  ;;  %v4344_v19 = vld [vmem:[%s5047_s6 + $0x788] sm:$0xff]  ;;  %v4346_v53 = vld [vmem:[%s5047_s6 + $0x798] sm:$0xff] }
 0x145   : > { %v704_v21 = vpop.f32.mrf.mxu0  ;;  %v1633_v59 = vpop.f32.mrf.mxu1 }
 0x146   : > { %1020 = vst [vmem:[%s5566_s23 + $0x8] sm:$0xff] %v703_v56  ;;  %v705_v24 = vadd.f32 %v704_v21, %v5550_v9  ;;  %2076 = vst [vmem:[%s5575_s7] sm:$0xff] %v1948_v57  ;;  %v1949_v61 = vadd.f32 %v1632_v58, %v703_v56  ;;  %v1634_v62 = vadd.f32 %v1633_v59, %v5550_v9  ;;  %v1516_v56 = vld [vmem:[%s5047_s6 + $0x388] sm:$0xff]  ;;  %v1518_v57 = vld [vmem:[%s5047_s6 + $0x398] sm:$0xff] }
 0x147   : > { %v706_v0 = vpop.f32.mrf.mxu0  ;;  %v1635_v1 = vpop.f32.mrf.mxu1 }
 0x148   : > { %1021 = vst [vmem:[%s5566_s23 + $0x10] sm:$0xff] %v705_v24  ;;  %v707_v2 = vadd.f32 %v706_v0, %v5552_v46  ;;  %2077 = vst [vmem:[%s5575_s7 + $0x8] sm:$0xff] %v1949_v61  ;;  %v1950_v25 = vadd.f32 %v1634_v62, %v705_v24  ;;  %v1636_v26 = vadd.f32 %v1635_v1, %v5552_v46 }
 0x149   : > { %v710_v13 = vpop.f32.mrf.mxu0  ;;  %949 = vmatmul.mubr.bf16.gmra.mxu0 %v481_v22  ;;  %v1639_v14 = vpop.f32.mrf.mxu1  ;;  %1878 = vmatmul.mubr.bf16.gmra.mxu1 %v1581_v60  ;;  %v485_v60 = vpack.c.bf16 %v4341_v50, %v4339_v49  ;;  %v1585_v24 = vpack.c.bf16 %v1513_v17, %v1511_v11  ;;  %v488_v61 = vpack.c.bf16 %v4346_v53, %v4344_v19  ;;  %v4347_v11 = vld [vmem:[%s5047_s6 + $0x7a0] sm:$0xff]  ;;  %v1521_v53 = vld [vmem:[%s5047_s6 + $0x3b0] sm:$0xff] }
 0x14a   : > { %1022 = vst [vmem:[%s5566_s23 + $0x18] sm:$0xff] %v707_v2  ;;  %v711_v3 = vadd.f32 %v710_v13, %v5550_v9  ;;  %2078 = vst [vmem:[%s5575_s7 + $0x10] sm:$0xff] %v1950_v25  ;;  %v1951_v4 = vadd.f32 %v1636_v26, %v707_v2  ;;  %v1640_v16 = vadd.f32 %v1639_v14, %v5550_v9  ;;  %958 = vmatprep.mubr.bf16.mxu0 %v484_v23 }
 0x14b   : > { %1887 = vmatprep.mubr.bf16.mxu1 %v1584_v63  ;;  %v712_v30 = vpop.f32.mrf.mxu0  ;;  %v1641_v6 = vpop.f32.mrf.mxu1  ;;  %v1588_v1 = vpack.c.bf16 %v1518_v57, %v1516_v56 }
 0x14c   : > { %1023 = vst [vmem:[%s5566_s23 + $0x20] sm:$0xff] %v711_v3  ;;  %v713_v32 = vadd.f32 %v712_v30, %v5552_v46  ;;  %2079 = vst [vmem:[%s5575_s7 + $0x18] sm:$0xff] %v1951_v4  ;;  %v1952_v38 = vadd.f32 %v1640_v16, %v711_v3  ;;  %v1642_v39 = vadd.f32 %v1641_v6, %v5552_v46  ;;  %v4345_v3 = vld [vmem:[%s5047_s6 + $0x790] sm:$0xff]  ;;  %v1515_v4 = vld [vmem:[%s5047_s6 + $0x380] sm:$0xff] }
 0x14d   : > { %v714_v40 = vpop.f32.mrf.mxu0  ;;  %v1643_v42 = vpop.f32.mrf.mxu1  ;;  %v4348_v30 = vld [vmem:[%s5047_s6 + $0x7a8] sm:$0xff]  ;;  %v4350_v6 = vld [vmem:[%s5047_s6 + $0x7b8] sm:$0xff] }
 0x14e   : > { %1024 = vst [vmem:[%s5566_s23 + $0x28] sm:$0xff] %v713_v32  ;;  %v715_v34 = vadd.f32 %v714_v40, %v5550_v9  ;;  %2080 = vst [vmem:[%s5575_s7 + $0x20] sm:$0xff] %v1952_v38  ;;  %v1953_v8 = vadd.f32 %v1642_v39, %v713_v32  ;;  %v1644_v43 = vadd.f32 %v1643_v42, %v5550_v9  ;;  %v1520_v32 = vld [vmem:[%s5047_s6 + $0x3a8] sm:$0xff]  ;;  %v1522_v38 = vld [vmem:[%s5047_s6 + $0x3b8] sm:$0xff] }
 0x14f   : > { %v716_v44 = vpop.f32.mrf.mxu0  ;;  %v1645_v36 = vpop.f32.mrf.mxu1 }
 0x150   : > { %1025 = vst [vmem:[%s5566_s23 + $0x30] sm:$0xff] %v715_v34  ;;  %v717_v10 = vadd.f32 %v716_v44, %v5552_v46  ;;  %2081 = vst [vmem:[%s5575_s7 + $0x28] sm:$0xff] %v1953_v8  ;;  %v1954_v45 = vadd.f32 %v1644_v43, %v715_v34  ;;  %v1646_v47 = vadd.f32 %v1645_v36, %v5552_v46 }
 0x151   : > { %v720_v37 = vpop.f32.mrf.mxu0  ;;  %959 = vmatmul.mubr.bf16.gmra.mxu0 %v483_v41  ;;  %v1649_v48 = vpop.f32.mrf.mxu1  ;;  %1888 = vmatmul.mubr.bf16.gmra.mxu1 %v1583_v7  ;;  %v487_v7 = vpack.c.bf16 %v4345_v3, %v4343_v15  ;;  %v1587_v34 = vpack.c.bf16 %v1517_v29, %v1515_v4  ;;  %v490_v8 = vpack.c.bf16 %v4350_v6, %v4348_v30  ;;  %v4351_v4 = vld [vmem:[%s5047_s6 + $0x7c0] sm:$0xff]  ;;  %v1525_v6 = vld [vmem:[%s5047_s6 + $0x3d0] sm:$0xff] }
 0x152   : > { %1026 = vst [vmem:[%s5566_s23 + $0x38] sm:$0xff] %v717_v10  ;;  %v721_v12 = vadd.f32 %v720_v37, %v5550_v9  ;;  %2082 = vst [vmem:[%s5575_s7 + $0x30] sm:$0xff] %v1954_v45  ;;  %v1955_v51 = vadd.f32 %v1646_v47, %v717_v10  ;;  %v1650_v52 = vadd.f32 %v1649_v48, %v5550_v9  ;;  %968 = vmatprep.mubr.bf16.mxu0 %v486_v33 }
 0x153   : > { %1897 = vmatprep.mubr.bf16.mxu1 %v1586_v35  ;;  %v722_v54 = vpop.f32.mrf.mxu0  ;;  %v1651_v55 = vpop.f32.mrf.mxu1  ;;  %v1590_v36 = vpack.c.bf16 %v1522_v38, %v1520_v32 }
 0x154   : > { %1027 = vst [vmem:[%s5566_s23 + $0x40] sm:$0xff] %v721_v12  ;;  %v723_v58 = vadd.f32 %v722_v54, %v5552_v46  ;;  %2083 = vst [vmem:[%s5575_s7 + $0x38] sm:$0xff] %v1955_v51  ;;  %v1956_v21 = vadd.f32 %v1650_v52, %v721_v12  ;;  %v1652_v22 = vadd.f32 %v1651_v55, %v5552_v46  ;;  %v4349_v12 = vld [vmem:[%s5047_s6 + $0x7b0] sm:$0xff]  ;;  %v1519_v51 = vld [vmem:[%s5047_s6 + $0x3a0] sm:$0xff] }
 0x155   : > { %v724_v59 = vpop.f32.mrf.mxu0  ;;  %v1653_v23 = vpop.f32.mrf.mxu1  ;;  %v4352_v54 = vld [vmem:[%s5047_s6 + $0x7c8] sm:$0xff]  ;;  %v4354_v55 = vld [vmem:[%s5047_s6 + $0x7d8] sm:$0xff] }
 0x156   : > { %1028 = vst [vmem:[%s5566_s23 + $0x48] sm:$0xff] %v723_v58  ;;  %v725_v62 = vadd.f32 %v724_v59, %v5550_v9  ;;  %2084 = vst [vmem:[%s5575_s7 + $0x40] sm:$0xff] %v1956_v21  ;;  %v1957_v63 = vadd.f32 %v1652_v22, %v723_v58  ;;  %v1654_v0 = vadd.f32 %v1653_v23, %v5550_v9  ;;  %v1524_v58 = vld [vmem:[%s5047_s6 + $0x3c8] sm:$0xff]  ;;  %v1526_v21 = vld [vmem:[%s5047_s6 + $0x3d8] sm:$0xff] }
 0x157   : > { %v726_v2 = vpop.f32.mrf.mxu0  ;;  %v1655_v25 = vpop.f32.mrf.mxu1 }
 0x158   : > { %1029 = vst [vmem:[%s5566_s23 + $0x50] sm:$0xff] %v725_v62  ;;  %v727_v26 = vadd.f32 %v726_v2, %v5552_v46  ;;  %2085 = vst [vmem:[%s5575_s7 + $0x48] sm:$0xff] %v1957_v63  ;;  %v1958_v13 = vadd.f32 %v1654_v0, %v725_v62  ;;  %v1656_v14 = vadd.f32 %v1655_v25, %v5552_v46 }
 0x159   : > { %v730_v27 = vpop.f32.mrf.mxu0  ;;  %969 = vmatmul.mubr.bf16.gmra.mxu0 %v485_v60  ;;  %v1659_v28 = vpop.f32.mrf.mxu1  ;;  %1898 = vmatmul.mubr.bf16.gmra.mxu1 %v1585_v24  ;;  %v489_v24 = vpack.c.bf16 %v4349_v12, %v4347_v11  ;;  %v1589_v62 = vpack.c.bf16 %v1521_v53, %v1519_v51  ;;  %v492_v63 = vpack.c.bf16 %v4354_v55, %v4352_v54  ;;  %v4355_v51 = vld [vmem:[%s5047_s6 + $0x7e0] sm:$0xff]  ;;  %v1529_v55 = vld [vmem:[%s5047_s6 + $0x3f0] sm:$0xff] }
 0x15a   : > { %1030 = vst [vmem:[%s5566_s23 + $0x58] sm:$0xff] %v727_v26  ;;  %v731_v16 = vadd.f32 %v730_v27, %v5550_v9  ;;  %2086 = vst [vmem:[%s5575_s7 + $0x50] sm:$0xff] %v1958_v13  ;;  %v1959_v18 = vadd.f32 %v1656_v14, %v727_v26  ;;  %v1660_v5 = vadd.f32 %v1659_v28, %v5550_v9  ;;  %978 = vmatprep.mubr.bf16.mxu0 %v488_v61 }
 0x15b   : > { %1907 = vmatprep.mubr.bf16.mxu1 %v1588_v1  ;;  %v732_v20 = vpop.f32.mrf.mxu0  ;;  %v1661_v31 = vpop.f32.mrf.mxu1  ;;  %v1592_v25 = vpack.c.bf16 %v1526_v21, %v1524_v58 }
 0x15c   : > { %1031 = vst [vmem:[%s5566_s23 + $0x60] sm:$0xff] %v731_v16  ;;  %v733_v39 = vadd.f32 %v732_v20, %v5552_v46  ;;  %2087 = vst [vmem:[%s5575_s7 + $0x58] sm:$0xff] %v1959_v18  ;;  %v1960_v40 = vadd.f32 %v1660_v5, %v731_v16  ;;  %v1662_v41 = vadd.f32 %v1661_v31, %v5552_v46  ;;  %v4353_v16 = vld [vmem:[%s5047_s6 + $0x7d0] sm:$0xff]  ;;  %v1523_v18 = vld [vmem:[%s5047_s6 + $0x3c0] sm:$0xff] }
 0x15d   : > { %v734_v42 = vpop.f32.mrf.mxu0  ;;  %v1663_v33 = vpop.f32.mrf.mxu1  ;;  %v4356_v20 = vld [vmem:[%s5047_s6 + $0x7e8] sm:$0xff]  ;;  %v4358_v31 = vld [vmem:[%s5047_s6 + $0x7f8] sm:$0xff] }
 0x15e   : > { %1032 = vst [vmem:[%s5566_s23 + $0x68] sm:$0xff] %v733_v39  ;;  %v735_v43 = vadd.f32 %v734_v42, %v5550_v9  ;;  %2088 = vst [vmem:[%s5575_s7 + $0x60] sm:$0xff] %v1960_v40  ;;  %v1961_v35 = vadd.f32 %v1662_v41, %v733_v39  ;;  %v1664_v44 = vadd.f32 %v1663_v33, %v5550_v9  ;;  %v1528_v39 = vld [vmem:[%s5047_s6 + $0x3e8] sm:$0xff]  ;;  %v1530_v40 = vld [vmem:[%s5047_s6 + $0x3f8] sm:$0xff] }
 0x15f   : > { %v736_v10 = vpop.f32.mrf.mxu0  ;;  %v1665_v45 = vpop.f32.mrf.mxu1 }
 0x160   : > { %1033 = vst [vmem:[%s5566_s23 + $0x70] sm:$0xff] %v735_v43  ;;  %v737_v47 = vadd.f32 %v736_v10, %v5552_v46  ;;  %2089 = vst [vmem:[%s5575_s7 + $0x68] sm:$0xff] %v1961_v35  ;;  %v1962_v37 = vadd.f32 %v1664_v44, %v735_v43  ;;  %v1666_v48 = vadd.f32 %v1665_v45, %v5552_v46 }
 0x161   : > { %v740_v49 = vpop.f32.mrf.mxu0  ;;  %979 = vmatmul.mubr.bf16.gmra.mxu0 %v487_v7  ;;  %v1669_v50 = vpop.f32.mrf.mxu1  ;;  %1908 = vmatmul.mubr.bf16.gmra.mxu1 %v1587_v34  ;;  %v491_v34 = vpack.c.bf16 %v4353_v16, %v4351_v4  ;;  %v1591_v43 = vpack.c.bf16 %v1525_v6, %v1523_v18  ;;  %v494_v35 = vpack.c.bf16 %v4358_v31, %v4356_v20  ;;  %v4391_v18 = vld [vmem:[%s5047_s6 + $0x800] sm:$0xff]  ;;  %v4521_v31 = vld [vmem:[%s5047_s6 + $0xc10] sm:$0xff] }
 0x162   : > { %1034 = vst [vmem:[%s5566_s23 + $0x78] sm:$0xff] %v737_v47  ;;  %v741_v52 = vadd.f32 %v740_v49, %v5550_v9  ;;  %2090 = vst [vmem:[%s5575_s7 + $0x70] sm:$0xff] %v1962_v37  ;;  %v1963_v17 = vadd.f32 %v1666_v48, %v737_v47  ;;  %v1670_v19 = vadd.f32 %v1669_v50, %v5550_v9  ;;  %988 = vmatprep.mubr.bf16.mxu0 %v490_v8 }
 0x163   : > { %1917 = vmatprep.mubr.bf16.mxu1 %v1590_v36  ;;  %v742_v56 = vpop.f32.mrf.mxu0  ;;  %v1671_v57 = vpop.f32.mrf.mxu1  ;;  %v1594_v45 = vpack.c.bf16 %v1530_v40, %v1528_v39 }
 0x164   : > { %1035 = vst [vmem:[%s5566_s23 + $0x80] sm:$0xff] %v741_v52  ;;  %v743_v22 = vadd.f32 %v742_v56, %v5552_v46  ;;  %2091 = vst [vmem:[%s5575_s7 + $0x78] sm:$0xff] %v1963_v17  ;;  %v1964_v59 = vadd.f32 %v1670_v19, %v741_v52  ;;  %v1672_v60 = vadd.f32 %v1671_v57, %v5552_v46  ;;  %v4357_v52 = vld [vmem:[%s5047_s6 + $0x7f0] sm:$0xff]  ;;  %v1527_v17 = vld [vmem:[%s5047_s6 + $0x3e0] sm:$0xff] }
 0x165   : > { %v744_v23 = vpop.f32.mrf.mxu0  ;;  %v1673_v61 = vpop.f32.mrf.mxu1  ;;  %v4392_v56 = vld [vmem:[%s5047_s6 + $0x808] sm:$0xff]  ;;  %v4394_v57 = vld [vmem:[%s5047_s6 + $0x818] sm:$0xff] }
 0x166   : > { %1036 = vst [vmem:[%s5566_s23 + $0x88] sm:$0xff] %v743_v22  ;;  %v745_v0 = vadd.f32 %v744_v23, %v5550_v9  ;;  %2092 = vst [vmem:[%s5575_s7 + $0x80] sm:$0xff] %v1964_v59  ;;  %v1965_v1 = vadd.f32 %v1672_v60, %v743_v22  ;;  %v1674_v2 = vadd.f32 %v1673_v61, %v5550_v9  ;;  %v4520_v22 = vld [vmem:[%s5047_s6 + $0xc08] sm:$0xff]  ;;  %v4522_v59 = vld [vmem:[%s5047_s6 + $0xc18] sm:$0xff] }
 0x167   : > { %v746_v26 = vpop.f32.mrf.mxu0  ;;  %v1675_v13 = vpop.f32.mrf.mxu1 }
 0x168   : > { %1037 = vst [vmem:[%s5566_s23 + $0x90] sm:$0xff] %v745_v0  ;;  %v747_v14 = vadd.f32 %v746_v26, %v5552_v46  ;;  %2093 = vst [vmem:[%s5575_s7 + $0x88] sm:$0xff] %v1965_v1  ;;  %v1966_v27 = vadd.f32 %v1674_v2, %v745_v0  ;;  %v1676_v28 = vadd.f32 %v1675_v13, %v5552_v46 }
 0x169   : > { %v750_v15 = vpop.f32.mrf.mxu0  ;;  %989 = vmatmul.mubr.bf16.gmra.mxu0 %v489_v24  ;;  %v1679_v3 = vpop.f32.mrf.mxu1  ;;  %1918 = vmatmul.mubr.bf16.gmra.mxu1 %v1589_v62  ;;  %v493_v62 = vpack.c.bf16 %v4357_v52, %v4355_v51  ;;  %v1593_v0 = vpack.c.bf16 %v1529_v55, %v1527_v17  ;;  %v2462_v1 = vpack.c.bf16 %v4394_v57, %v4392_v56  ;;  %v4395_v17 = vld [vmem:[%s5047_s6 + $0x820] sm:$0xff]  ;;  %v4525_v57 = vld [vmem:[%s5047_s6 + $0xc30] sm:$0xff] }
 0x16a   : > { %1038 = vst [vmem:[%s5566_s23 + $0x98] sm:$0xff] %v747_v14  ;;  %v751_v5 = vadd.f32 %v750_v15, %v5550_v9  ;;  %2094 = vst [vmem:[%s5575_s7 + $0x90] sm:$0xff] %v1966_v27  ;;  %v1967_v29 = vadd.f32 %v1676_v28, %v747_v14  ;;  %v1680_v30 = vadd.f32 %v1679_v3, %v5550_v9  ;;  %998 = vmatprep.mubr.bf16.mxu0 %v492_v63 }
 0x16b   : > { %1927 = vmatprep.mubr.bf16.mxu1 %v1592_v25  ;;  %v752_v32 = vpop.f32.mrf.mxu0  ;;  %v1681_v38 = vpop.f32.mrf.mxu1  ;;  %v3392_v13 = vpack.c.bf16 %v4522_v59, %v4520_v22 }
 0x16c   : > { %1039 = vst [vmem:[%s5566_s23 + $0xa0] sm:$0xff] %v751_v5  ;;  %v753_v41 = vadd.f32 %v752_v32, %v5552_v46  ;;  %2095 = vst [vmem:[%s5575_s7 + $0x98] sm:$0xff] %v1967_v29  ;;  %v1968_v42 = vadd.f32 %v1680_v30, %v751_v5  ;;  %v1682_v7 = vadd.f32 %v1681_v38, %v5552_v46  ;;  %v4393_v5 = vld [vmem:[%s5047_s6 + $0x810] sm:$0xff]  ;;  %v4519_v29 = vld [vmem:[%s5047_s6 + $0xc00] sm:$0xff] }
 0x16d   : > { %v754_v33 = vpop.f32.mrf.mxu0  ;;  %v1683_v8 = vpop.f32.mrf.mxu1  ;;  %v4396_v32 = vld [vmem:[%s5047_s6 + $0x828] sm:$0xff]  ;;  %v4398_v38 = vld [vmem:[%s5047_s6 + $0x838] sm:$0xff] }
 0x16e   : > { %1040 = vst [vmem:[%s5566_s23 + $0xa8] sm:$0xff] %v753_v41  ;;  %v755_v44 = vadd.f32 %v754_v33, %v5550_v9  ;;  %2096 = vst [vmem:[%s5575_s7 + $0xa0] sm:$0xff] %v1968_v42  ;;  %v1969_v36 = vadd.f32 %v1682_v7, %v753_v41  ;;  %v1684_v10 = vadd.f32 %v1683_v8, %v5550_v9  ;;  %v4524_v41 = vld [vmem:[%s5047_s6 + $0xc28] sm:$0xff]  ;;  %v4526_v42 = vld [vmem:[%s5047_s6 + $0xc38] sm:$0xff] }
 0x16f   : > { %v756_v47 = vpop.f32.mrf.mxu0  ;;  %v1685_v37 = vpop.f32.mrf.mxu1 }
 0x170   : > { %1041 = vst [vmem:[%s5566_s23 + $0xb0] sm:$0xff] %v755_v44  ;;  %v757_v48 = vadd.f32 %v756_v47, %v5552_v46  ;;  %2097 = vst [vmem:[%s5575_s7 + $0xa8] sm:$0xff] %v1969_v36  ;;  %v1970_v49 = vadd.f32 %v1684_v10, %v755_v44  ;;  %v1686_v50 = vadd.f32 %v1685_v37, %v5552_v46 }
 0x171   : > { %v760_v11 = vpop.f32.mrf.mxu0  ;;  %999 = vmatmul.mubr.bf16.gmra.mxu0 %v491_v34  ;;  %v1689_v12 = vpop.f32.mrf.mxu1  ;;  %1928 = vmatmul.mubr.bf16.gmra.mxu1 %v1591_v43  ;;  %v2461_v43 = vpack.c.bf16 %v4393_v5, %v4391_v18  ;;  %v3391_v44 = vpack.c.bf16 %v4521_v31, %v4519_v29  ;;  %v2464_v36 = vpack.c.bf16 %v4398_v38, %v4396_v32  ;;  %v4399_v29 = vld [vmem:[%s5047_s6 + $0x840] sm:$0xff]  ;;  %v4529_v38 = vld [vmem:[%s5047_s6 + $0xc50] sm:$0xff] }
 0x172   : > { %1042 = vst [vmem:[%s5566_s23 + $0xb8] sm:$0xff] %v757_v48  ;;  %v761_v19 = vadd.f32 %v760_v11, %v5550_v9  ;;  %2098 = vst [vmem:[%s5575_s7 + $0xb0] sm:$0xff] %v1970_v49  ;;  %v1971_v53 = vadd.f32 %v1686_v50, %v757_v48  ;;  %v1690_v54 = vadd.f32 %v1689_v12, %v5550_v9  ;;  %1008 = vmatprep.mubr.bf16.mxu0 %v494_v35 }
 0x173   : > { %1937 = vmatprep.mubr.bf16.mxu1 %v1594_v45  ;;  %v762_v58 = vpop.f32.mrf.mxu0  ;;  %v1691_v21 = vpop.f32.mrf.mxu1  ;;  %v3394_v37 = vpack.c.bf16 %v4526_v42, %v4524_v41 }
 0x174   : > { %1043 = vst [vmem:[%s5566_s23 + $0xc0] sm:$0xff] %v761_v19  ;;  %v763_v60 = vadd.f32 %v762_v58, %v5552_v46  ;;  %2099 = vst [vmem:[%s5575_s7 + $0xb8] sm:$0xff] %v1971_v53  ;;  %v1972_v23 = vadd.f32 %v1690_v54, %v761_v19  ;;  %v1692_v24 = vadd.f32 %v1691_v21, %v5552_v46  ;;  %v4397_v19 = vld [vmem:[%s5047_s6 + $0x830] sm:$0xff]  ;;  %v4523_v53 = vld [vmem:[%s5047_s6 + $0xc20] sm:$0xff] }
 0x175   : > { %v764_v61 = vpop.f32.mrf.mxu0  ;;  %v1693_v63 = vpop.f32.mrf.mxu1  ;;  %v4400_v58 = vld [vmem:[%s5047_s6 + $0x848] sm:$0xff]  ;;  %v4402_v21 = vld [vmem:[%s5047_s6 + $0x858] sm:$0xff] }
 0x176   : > { %1044 = vst [vmem:[%s5566_s23 + $0xc8] sm:$0xff] %v763_v60  ;;  %v765_v2 = vadd.f32 %v764_v61, %v5550_v9  ;;  %2100 = vst [vmem:[%s5575_s7 + $0xc0] sm:$0xff] %v1972_v23  ;;  %v1973_v25 = vadd.f32 %v1692_v24, %v763_v60  ;;  %v1694_v26 = vadd.f32 %v1693_v63, %v5550_v9  ;;  %v4528_v60 = vld [vmem:[%s5047_s6 + $0xc48] sm:$0xff]  ;;  %v4530_v23 = vld [vmem:[%s5047_s6 + $0xc58] sm:$0xff] }
 0x177   : > { %v766_v14 = vpop.f32.mrf.mxu0  ;;  %v1695_v27 = vpop.f32.mrf.mxu1 }
 0x178   : > { %1045 = vst [vmem:[%s5566_s23 + $0xd0] sm:$0xff] %v765_v2  ;;  %v767_v28 = vadd.f32 %v766_v14, %v5552_v46  ;;  %2101 = vst [vmem:[%s5575_s7 + $0xc8] sm:$0xff] %v1973_v25  ;;  %v1974_v15 = vadd.f32 %v1694_v26, %v765_v2  ;;  %v1696_v3 = vadd.f32 %v1695_v27, %v5552_v46 }
 0x179   : > { %v770_v4 = vpop.f32.mrf.mxu0  ;;  %1009 = vmatmul.mubr.bf16.gmra.mxu0 %v493_v62  ;;  %v1699_v16 = vpop.f32.mrf.mxu1  ;;  %1938 = vmatmul.mubr.bf16.gmra.mxu1 %v1593_v0  ;;  %v2463_v0 = vpack.c.bf16 %v4397_v19, %v4395_v17  ;;  %v3393_v2 = vpack.c.bf16 %v4525_v57, %v4523_v53  ;;  %v2466_v25 = vpack.c.bf16 %v4402_v21, %v4400_v58  ;;  %v4403_v53 = vld [vmem:[%s5047_s6 + $0x860] sm:$0xff]  ;;  %v4533_v21 = vld [vmem:[%s5047_s6 + $0xc70] sm:$0xff] }
 0x17a   : > { %1046 = vst [vmem:[%s5566_s23 + $0xd8] sm:$0xff] %v767_v28  ;;  %v771_v30 = vadd.f32 %v770_v4, %v5550_v9  ;;  %2102 = vst [vmem:[%s5575_s7 + $0xd0] sm:$0xff] %v1974_v15  ;;  %v1975_v6 = vadd.f32 %v1696_v3, %v767_v28  ;;  %v1700_v20 = vadd.f32 %v1699_v16, %v5550_v9  ;;  %2557 = vmatprep.mubr.bf16.mxu0 %v2462_v1 }
 0x17b   : > { %3487 = vmatprep.mubr.bf16.mxu1 %v3392_v13  ;;  %v772_v39 = vpop.f32.mrf.mxu0  ;;  %v1701_v40 = vpop.f32.mrf.mxu1  ;;  %v3396_v27 = vpack.c.bf16 %v4530_v23, %v4528_v60 }
 0x17c   : > { %1047 = vst [vmem:[%s5566_s23 + $0xe0] sm:$0xff] %v771_v30  ;;  %v773_v7 = vadd.f32 %v772_v39, %v5552_v46  ;;  %2103 = vst [vmem:[%s5575_s7 + $0xd8] sm:$0xff] %v1975_v6  ;;  %v1976_v33 = vadd.f32 %v1700_v20, %v771_v30  ;;  %v1702_v34 = vadd.f32 %v1701_v40, %v5552_v46  ;;  %v4401_v30 = vld [vmem:[%s5047_s6 + $0x850] sm:$0xff]  ;;  %v4527_v6 = vld [vmem:[%s5047_s6 + $0xc40] sm:$0xff] }
 0x17d   : > { %v774_v8 = vpop.f32.mrf.mxu0  ;;  %v1703_v35 = vpop.f32.mrf.mxu1  ;;  %v4404_v39 = vld [vmem:[%s5047_s6 + $0x868] sm:$0xff]  ;;  %v4406_v40 = vld [vmem:[%s5047_s6 + $0x878] sm:$0xff] }
 0x17e   : > { %1048 = vst [vmem:[%s5566_s23 + $0xe8] sm:$0xff] %v773_v7  ;;  %v775_v10 = vadd.f32 %v774_v8, %v5550_v9  ;;  %2104 = vst [vmem:[%s5575_s7 + $0xe0] sm:$0xff] %v1976_v33  ;;  %v1977_v45 = vadd.f32 %v1702_v34, %v773_v7  ;;  %v1704_v47 = vadd.f32 %v1703_v35, %v5550_v9  ;;  %v4532_v7 = vld [vmem:[%s5047_s6 + $0xc68] sm:$0xff]  ;;  %v4534_v33 = vld [vmem:[%s5047_s6 + $0xc78] sm:$0xff] }
 0x17f   : > { %v776_v48 = vpop.f32.mrf.mxu0  ;;  %v1705_v49 = vpop.f32.mrf.mxu1 }
 0x180   : > { %1049 = vst [vmem:[%s5566_s23 + $0xf0] sm:$0xff] %v775_v10  ;;  %v777_v50 = vadd.f32 %v776_v48, %v5552_v46  ;;  %2105 = vst [vmem:[%s5575_s7 + $0xe8] sm:$0xff] %v1977_v45  ;;  %v1978_v11 = vadd.f32 %v1704_v47, %v775_v10  ;;  %v1706_v12 = vadd.f32 %v1705_v49, %v5552_v46 }
 0x181   : > { %v780_v51 = vpop.f32.mrf.mxu0  ;;  %2558 = vmatmul.mubr.bf16.vlgmr.msra.gmra.mxu0 %v2461_v43  ;;  %v1709_v52 = vpop.f32.mrf.mxu1  ;;  %3488 = vmatmul.mubr.bf16.vlgmr.msra.gmra.mxu1 %v3391_v44  ;;  %v2465_v44 = vpack.c.bf16 %v4401_v30, %v4399_v29  ;;  %v3395_v10 = vpack.c.bf16 %v4529_v38, %v4527_v6  ;;  %v2468_v45 = vpack.c.bf16 %v4406_v40, %v4404_v39  ;;  %v4407_v6 = vld [vmem:[%s5047_s6 + $0x880] sm:$0xff]  ;;  %v4537_v40 = vld [vmem:[%s5047_s6 + $0xc90] sm:$0xff] }
 0x182   : > { %1050 = vst [vmem:[%s5566_s23 + $0xf8] sm:$0xff] %v777_v50  ;;  %v781_v54 = vadd.f32 %v780_v51, %v5550_v9  ;;  %2106 = vst [vmem:[%s5575_s7 + $0xf0] sm:$0xff] %v1978_v11  ;;  %v1979_v55 = vadd.f32 %v1706_v12, %v777_v50  ;;  %v1710_v56 = vadd.f32 %v1709_v52, %v5550_v9  ;;  %2567 = vmatprep.mubr.bf16.mxu0 %v2464_v36 }
 0x183   : > { %3497 = vmatprep.mubr.bf16.mxu1 %v3394_v37  ;;  %v782_v22 = vpop.f32.mrf.mxu0  ;;  %v1711_v59 = vpop.f32.mrf.mxu1  ;;  %v3398_v49 = vpack.c.bf16 %v4534_v33, %v4532_v7 }
 0x184   : > { %1051 = vst [vmem:[%s5566_s23 + $0x100] sm:$0xff] %v781_v54  ;;  %v783_v24 = vadd.f32 %v782_v22, %v5552_v46  ;;  %2107 = vst [vmem:[%s5575_s7 + $0xf8] sm:$0xff] %v1979_v55  ;;  %v1980_v61 = vadd.f32 %v1710_v56, %v781_v54  ;;  %v1712_v62 = vadd.f32 %v1711_v59, %v5552_v46  ;;  %v4405_v54 = vld [vmem:[%s5047_s6 + $0x870] sm:$0xff]  ;;  %v4531_v55 = vld [vmem:[%s5047_s6 + $0xc60] sm:$0xff] }
 0x185   : > { %v784_v63 = vpop.f32.mrf.mxu0  ;;  %v1713_v1 = vpop.f32.mrf.mxu1  ;;  %v4408_v22 = vld [vmem:[%s5047_s6 + $0x888] sm:$0xff]  ;;  %v4410_v59 = vld [vmem:[%s5047_s6 + $0x898] sm:$0xff] }
 0x186   : > { %1052 = vst [vmem:[%s5566_s23 + $0x108] sm:$0xff] %v783_v24  ;;  %v785_v26 = vadd.f32 %v784_v63, %v5550_v9  ;;  %2108 = vst [vmem:[%s5575_s7 + $0x100] sm:$0xff] %v1980_v61  ;;  %v1981_v13 = vadd.f32 %v1712_v62, %v783_v24  ;;  %v1714_v14 = vadd.f32 %v1713_v1, %v5550_v9  ;;  %v4536_v24 = vld [vmem:[%s5047_s6 + $0xc88] sm:$0xff]  ;;  %v4538_v61 = vld [vmem:[%s5047_s6 + $0xc98] sm:$0xff] }
 0x187   : > { %v786_v28 = vpop.f32.mrf.mxu0  ;;  %v1715_v15 = vpop.f32.mrf.mxu1 }
 0x188   : > { %1053 = vst [vmem:[%s5566_s23 + $0x110] sm:$0xff] %v785_v26  ;;  %v787_v3 = vadd.f32 %v786_v28, %v5552_v46  ;;  %2109 = vst [vmem:[%s5575_s7 + $0x108] sm:$0xff] %v1981_v13  ;;  %v1982_v4 = vadd.f32 %v1714_v14, %v785_v26  ;;  %v1716_v16 = vadd.f32 %v1715_v15, %v5552_v46 }
 0x189   : > { %v790_v18 = vpop.f32.mrf.mxu0  ;;  %2568 = vmatmul.mubr.bf16.gmra.mxu0 %v2463_v0  ;;  %v1719_v5 = vpop.f32.mrf.mxu1  ;;  %3498 = vmatmul.mubr.bf16.gmra.mxu1 %v3393_v2  ;;  %v2467_v2 = vpack.c.bf16 %v4405_v54, %v4403_v53  ;;  %v3397_v26 = vpack.c.bf16 %v4533_v21, %v4531_v55  ;;  %v2470_v13 = vpack.c.bf16 %v4410_v59, %v4408_v22  ;;  %v4411_v55 = vld [vmem:[%s5047_s6 + $0x8a0] sm:$0xff]  ;;  %v4541_v59 = vld [vmem:[%s5047_s6 + $0xcb0] sm:$0xff] }
 0x18a   : > { %1054 = vst [vmem:[%s5566_s23 + $0x118] sm:$0xff] %v787_v3  ;;  %v791_v20 = vadd.f32 %v790_v18, %v5550_v9  ;;  %2110 = vst [vmem:[%s5575_s7 + $0x110] sm:$0xff] %v1982_v4  ;;  %v1983_v31 = vadd.f32 %v1716_v16, %v787_v3  ;;  %v1720_v32 = vadd.f32 %v1719_v5, %v5550_v9  ;;  %2577 = vmatprep.mubr.bf16.mxu0 %v2466_v25 }
 0x18b   : > { %3507 = vmatprep.mubr.bf16.mxu1 %v3396_v27  ;;  %v792_v41 = vpop.f32.mrf.mxu0  ;;  %v1721_v42 = vpop.f32.mrf.mxu1  ;;  %v3400_v15 = vpack.c.bf16 %v4538_v61, %v4536_v24 }
 0x18c   : > { %1055 = vst [vmem:[%s5566_s23 + $0x120] sm:$0xff] %v791_v20  ;;  %v793_v34 = vadd.f32 %v792_v41, %v5552_v46  ;;  %2111 = vst [vmem:[%s5575_s7 + $0x118] sm:$0xff] %v1983_v31  ;;  %v1984_v8 = vadd.f32 %v1720_v32, %v791_v20  ;;  %v1722_v43 = vadd.f32 %v1721_v42, %v5552_v46  ;;  %v4409_v20 = vld [vmem:[%s5047_s6 + $0x890] sm:$0xff]  ;;  %v4535_v31 = vld [vmem:[%s5047_s6 + $0xc80] sm:$0xff] }
 0x18d   : > { %v794_v35 = vpop.f32.mrf.mxu0  ;;  %v1723_v36 = vpop.f32.mrf.mxu1  ;;  %v4412_v41 = vld [vmem:[%s5047_s6 + $0x8a8] sm:$0xff]  ;;  %v4414_v42 = vld [vmem:[%s5047_s6 + $0x8b8] sm:$0xff] }
 0x18e   : > { %1056 = vst [vmem:[%s5566_s23 + $0x128] sm:$0xff] %v793_v34  ;;  %v795_v47 = vadd.f32 %v794_v35, %v5550_v9  ;;  %2112 = vst [vmem:[%s5575_s7 + $0x120] sm:$0xff] %v1984_v8  ;;  %v1985_v37 = vadd.f32 %v1722_v43, %v793_v34  ;;  %v1724_v48 = vadd.f32 %v1723_v36, %v5550_v9  ;;  %v4540_v34 = vld [vmem:[%s5047_s6 + $0xca8] sm:$0xff]  ;;  %v4542_v8 = vld [vmem:[%s5047_s6 + $0xcb8] sm:$0xff] }
 0x18f   : > { %v796_v50 = vpop.f32.mrf.mxu0  ;;  %v1725_v11 = vpop.f32.mrf.mxu1 }
 0x190   : > { %1057 = vst [vmem:[%s5566_s23 + $0x130] sm:$0xff] %v795_v47  ;;  %v797_v12 = vadd.f32 %v796_v50, %v5552_v46  ;;  %2113 = vst [vmem:[%s5575_s7 + $0x128] sm:$0xff] %v1985_v37  ;;  %v1986_v51 = vadd.f32 %v1724_v48, %v795_v47  ;;  %v1726_v52 = vadd.f32 %v1725_v11, %v5552_v46 }
 0x191   : > { %v800_v17 = vpop.f32.mrf.mxu0  ;;  %2578 = vmatmul.mubr.bf16.gmra.mxu0 %v2465_v44  ;;  %v1729_v19 = vpop.f32.mrf.mxu1  ;;  %3508 = vmatmul.mubr.bf16.gmra.mxu1 %v3395_v10  ;;  %v2469_v10 = vpack.c.bf16 %v4409_v20, %v4407_v6  ;;  %v3399_v47 = vpack.c.bf16 %v4537_v40, %v4535_v31  ;;  %v2472_v37 = vpack.c.bf16 %v4414_v42, %v4412_v41  ;;  %v4415_v31 = vld [vmem:[%s5047_s6 + $0x8c0] sm:$0xff]  ;;  %v4545_v42 = vld [vmem:[%s5047_s6 + $0xcd0] sm:$0xff] }
 0x192   : > { %1058 = vst [vmem:[%s5566_s23 + $0x138] sm:$0xff] %v797_v12  ;;  %v801_v56 = vadd.f32 %v800_v17, %v5550_v9  ;;  %2114 = vst [vmem:[%s5575_s7 + $0x130] sm:$0xff] %v1986_v51  ;;  %v1987_v57 = vadd.f32 %v1726_v52, %v797_v12  ;;  %v1730_v58 = vadd.f32 %v1729_v19, %v5550_v9  ;;  %2587 = vmatprep.mubr.bf16.mxu0 %v2468_v45 }
 0x193   : > { %3517 = vmatprep.mubr.bf16.mxu1 %v3398_v49  ;;  %v802_v60 = vpop.f32.mrf.mxu0  ;;  %v1731_v23 = vpop.f32.mrf.mxu1  ;;  %v3402_v11 = vpack.c.bf16 %v4542_v8, %v4540_v34 }
 0x194   : > { %1059 = vst [vmem:[%s5566_s23 + $0x140] sm:$0xff] %v801_v56  ;;  %v803_v62 = vadd.f32 %v802_v60, %v5552_v46  ;;  %2115 = vst [vmem:[%s5575_s7 + $0x138] sm:$0xff] %v1987_v57  ;;  %v1988_v63 = vadd.f32 %v1730_v58, %v801_v56  ;;  %v1732_v0 = vadd.f32 %v1731_v23, %v5552_v46  ;;  %v4413_v56 = vld [vmem:[%s5047_s6 + $0x8b0] sm:$0xff]  ;;  %v4539_v57 = vld [vmem:[%s5047_s6 + $0xca0] sm:$0xff] }
 0x195   : > { %v804_v1 = vpop.f32.mrf.mxu0  ;;  %v1733_v25 = vpop.f32.mrf.mxu1  ;;  %v4416_v60 = vld [vmem:[%s5047_s6 + $0x8c8] sm:$0xff]  ;;  %v4418_v23 = vld [vmem:[%s5047_s6 + $0x8d8] sm:$0xff] }
 0x196   : > { %1060 = vst [vmem:[%s5566_s23 + $0x148] sm:$0xff] %v803_v62  ;;  %v805_v14 = vadd.f32 %v804_v1, %v5550_v9  ;;  %2116 = vst [vmem:[%s5575_s7 + $0x140] sm:$0xff] %v1988_v63  ;;  %v1989_v27 = vadd.f32 %v1732_v0, %v803_v62  ;;  %v1734_v28 = vadd.f32 %v1733_v25, %v5550_v9  ;;  %v4544_v62 = vld [vmem:[%s5047_s6 + $0xcc8] sm:$0xff]  ;;  %v4546_v63 = vld [vmem:[%s5047_s6 + $0xcd8] sm:$0xff] }
 0x197   : > { %v806_v3 = vpop.f32.mrf.mxu0  ;;  %v1735_v4 = vpop.f32.mrf.mxu1 }
 0x198   : > { %1061 = vst [vmem:[%s5566_s23 + $0x150] sm:$0xff] %v805_v14  ;;  %v807_v16 = vadd.f32 %v806_v3, %v5552_v46  ;;  %2117 = vst [vmem:[%s5575_s7 + $0x148] sm:$0xff] %v1989_v27  ;;  %v1990_v18 = vadd.f32 %v1734_v28, %v805_v14  ;;  %v1736_v5 = vadd.f32 %v1735_v4, %v5552_v46 }
 0x199   : > { %v810_v29 = vpop.f32.mrf.mxu0  ;;  %2588 = vmatmul.mubr.bf16.gmra.mxu0 %v2467_v2  ;;  %v1739_v30 = vpop.f32.mrf.mxu1  ;;  %3518 = vmatmul.mubr.bf16.gmra.mxu1 %v3397_v26  ;;  %v2471_v26 = vpack.c.bf16 %v4413_v56, %v4411_v55  ;;  %v3401_v14 = vpack.c.bf16 %v4541_v59, %v4539_v57  ;;  %v2474_v27 = vpack.c.bf16 %v4418_v23, %v4416_v60  ;;  %v4419_v57 = vld [vmem:[%s5047_s6 + $0x8e0] sm:$0xff]  ;;  %v4549_v23 = vld [vmem:[%s5047_s6 + $0xcf0] sm:$0xff] }
 0x19a   : > { %1062 = vst [vmem:[%s5566_s23 + $0x158] sm:$0xff] %v807_v16  ;;  %v811_v32 = vadd.f32 %v810_v29, %v5550_v9  ;;  %2118 = vst [vmem:[%s5575_s7 + $0x150] sm:$0xff] %v1990_v18  ;;  %v1991_v38 = vadd.f32 %v1736_v5, %v807_v16  ;;  %v1740_v39 = vadd.f32 %v1739_v30, %v5550_v9  ;;  %2597 = vmatprep.mubr.bf16.mxu0 %v2470_v13 }
 0x19b   : > { %3527 = vmatprep.mubr.bf16.mxu1 %v3400_v15  ;;  %v812_v7 = vpop.f32.mrf.mxu0  ;;  %v1741_v33 = vpop.f32.mrf.mxu1  ;;  %v3404_v4 = vpack.c.bf16 %v4546_v63, %v4544_v62 }
 0x19c   : > { %1063 = vst [vmem:[%s5566_s23 + $0x160] sm:$0xff] %v811_v32  ;;  %v813_v43 = vadd.f32 %v812_v7, %v5552_v46  ;;  %2119 = vst [vmem:[%s5575_s7 + $0x158] sm:$0xff] %v1991_v38  ;;  %v1992_v35 = vadd.f32 %v1740_v39, %v811_v32  ;;  %v1742_v44 = vadd.f32 %v1741_v33, %v5552_v46  ;;  %v4417_v32 = vld [vmem:[%s5047_s6 + $0x8d0] sm:$0xff]  ;;  %v4543_v38 = vld [vmem:[%s5047_s6 + $0xcc0] sm:$0xff] }
 0x19d   : > { %v814_v36 = vpop.f32.mrf.mxu0  ;;  %v1743_v45 = vpop.f32.mrf.mxu1  ;;  %v4420_v7 = vld [vmem:[%s5047_s6 + $0x8e8] sm:$0xff]  ;;  %v4422_v33 = vld [vmem:[%s5047_s6 + $0x8f8] sm:$0xff] }
 0x19e   : > { %1064 = vst [vmem:[%s5566_s23 + $0x168] sm:$0xff] %v813_v43  ;;  %v815_v48 = vadd.f32 %v814_v36, %v5550_v9  ;;  %2120 = vst [vmem:[%s5575_s7 + $0x160] sm:$0xff] %v1992_v35  ;;  %v1993_v49 = vadd.f32 %v1742_v44, %v813_v43  ;;  %v1744_v50 = vadd.f32 %v1743_v45, %v5550_v9  ;;  %v4548_v43 = vld [vmem:[%s5047_s6 + $0xce8] sm:$0xff]  ;;  %v4550_v35 = vld [vmem:[%s5047_s6 + $0xcf8] sm:$0xff] }
 0x19f   : > { %v816_v12 = vpop.f32.mrf.mxu0  ;;  %v1745_v51 = vpop.f32.mrf.mxu1 }
 0x1a0   : > { %1065 = vst [vmem:[%s5566_s23 + $0x170] sm:$0xff] %v815_v48  ;;  %v817_v52 = vadd.f32 %v816_v12, %v5552_v46  ;;  %2121 = vst [vmem:[%s5575_s7 + $0x168] sm:$0xff] %v1993_v49  ;;  %v1994_v17 = vadd.f32 %v1744_v50, %v815_v48  ;;  %v1746_v19 = vadd.f32 %v1745_v51, %v5552_v46 }
 0x1a1   : > { %v820_v53 = vpop.f32.mrf.mxu0  ;;  %2598 = vmatmul.mubr.bf16.gmra.mxu0 %v2469_v10  ;;  %v1749_v54 = vpop.f32.mrf.mxu1  ;;  %3528 = vmatmul.mubr.bf16.gmra.mxu1 %v3399_v47  ;;  %v2473_v47 = vpack.c.bf16 %v4417_v32, %v4415_v31  ;;  %v3403_v48 = vpack.c.bf16 %v4545_v42, %v4543_v38  ;;  %v2476_v49 = vpack.c.bf16 %v4422_v33, %v4420_v7  ;;  %v4423_v38 = vld [vmem:[%s5047_s6 + $0x900] sm:$0xff]  ;;  %v4553_v33 = vld [vmem:[%s5047_s6 + $0xd10] sm:$0xff] }
 0x1a2   : > { %1066 = vst [vmem:[%s5566_s23 + $0x178] sm:$0xff] %v817_v52  ;;  %v821_v58 = vadd.f32 %v820_v53, %v5550_v9  ;;  %2122 = vst [vmem:[%s5575_s7 + $0x170] sm:$0xff] %v1994_v17  ;;  %v1995_v21 = vadd.f32 %v1746_v19, %v817_v52  ;;  %v1750_v22 = vadd.f32 %v1749_v54, %v5550_v9  ;;  %2607 = vmatprep.mubr.bf16.mxu0 %v2472_v37 }
 0x1a3   : > { %3537 = vmatprep.mubr.bf16.mxu1 %v3402_v11  ;;  %v822_v24 = vpop.f32.mrf.mxu0  ;;  %v1751_v61 = vpop.f32.mrf.mxu1  ;;  %v3406_v51 = vpack.c.bf16 %v4550_v35, %v4548_v43 }
 0x1a4   : > { %1067 = vst [vmem:[%s5566_s23 + $0x180] sm:$0xff] %v821_v58  ;;  %v823_v0 = vadd.f32 %v822_v24, %v5552_v46  ;;  %2123 = vst [vmem:[%s5575_s7 + $0x178] sm:$0xff] %v1995_v21  ;;  %v1996_v1 = vadd.f32 %v1750_v22, %v821_v58  ;;  %v1752_v2 = vadd.f32 %v1751_v61, %v5552_v46  ;;  %v4421_v58 = vld [vmem:[%s5047_s6 + $0x8f0] sm:$0xff]  ;;  %v4547_v21 = vld [vmem:[%s5047_s6 + $0xce0] sm:$0xff] }
 0x1a5   : > { %v824_v25 = vpop.f32.mrf.mxu0  ;;  %v1753_v13 = vpop.f32.mrf.mxu1  ;;  %v4424_v24 = vld [vmem:[%s5047_s6 + $0x908] sm:$0xff]  ;;  %v4426_v61 = vld [vmem:[%s5047_s6 + $0x918] sm:$0xff] }
 0x1a6   : > { %1068 = vst [vmem:[%s5566_s23 + $0x188] sm:$0xff] %v823_v0  ;;  %v825_v28 = vadd.f32 %v824_v25, %v5550_v9  ;;  %2124 = vst [vmem:[%s5575_s7 + $0x180] sm:$0xff] %v1996_v1  ;;  %v1997_v15 = vadd.f32 %v1752_v2, %v823_v0  ;;  %v1754_v3 = vadd.f32 %v1753_v13, %v5550_v9  ;;  %v4552_v0 = vld [vmem:[%s5047_s6 + $0xd08] sm:$0xff]  ;;  %v4554_v1 = vld [vmem:[%s5047_s6 + $0xd18] sm:$0xff] }
 0x1a7   : > { %v826_v16 = vpop.f32.mrf.mxu0  ;;  %v1755_v18 = vpop.f32.mrf.mxu1 }
 0x1a8   : > { %1069 = vst [vmem:[%s5566_s23 + $0x190] sm:$0xff] %v825_v28  ;;  %v827_v5 = vadd.f32 %v826_v16, %v5552_v46  ;;  %2125 = vst [vmem:[%s5575_s7 + $0x188] sm:$0xff] %v1997_v15  ;;  %v1998_v29 = vadd.f32 %v1754_v3, %v825_v28  ;;  %v1756_v30 = vadd.f32 %v1755_v18, %v5552_v46 }
 0x1a9   : > { %v830_v6 = vpop.f32.mrf.mxu0  ;;  %2608 = vmatmul.mubr.bf16.gmra.mxu0 %v2471_v26  ;;  %v1759_v20 = vpop.f32.mrf.mxu1  ;;  %3538 = vmatmul.mubr.bf16.gmra.mxu1 %v3401_v14  ;;  %v2475_v14 = vpack.c.bf16 %v4421_v58, %v4419_v57  ;;  %v3405_v28 = vpack.c.bf16 %v4549_v23, %v4547_v21  ;;  %v2478_v15 = vpack.c.bf16 %v4426_v61, %v4424_v24  ;;  %v4427_v21 = vld [vmem:[%s5047_s6 + $0x920] sm:$0xff]  ;;  %v4557_v61 = vld [vmem:[%s5047_s6 + $0xd30] sm:$0xff] }
 0x1aa   : > { %1070 = vst [vmem:[%s5566_s23 + $0x198] sm:$0xff] %v827_v5  ;;  %v831_v39 = vadd.f32 %v830_v6, %v5550_v9  ;;  %2126 = vst [vmem:[%s5575_s7 + $0x190] sm:$0xff] %v1998_v29  ;;  %v1999_v40 = vadd.f32 %v1756_v30, %v827_v5  ;;  %v1760_v41 = vadd.f32 %v1759_v20, %v5550_v9  ;;  %2617 = vmatprep.mubr.bf16.mxu0 %v2474_v27 }
 0x1ab   : > { %3547 = vmatprep.mubr.bf16.mxu1 %v3404_v4  ;;  %v832_v34 = vpop.f32.mrf.mxu0  ;;  %v1761_v8 = vpop.f32.mrf.mxu1  ;;  %v3408_v18 = vpack.c.bf16 %v4554_v1, %v4552_v0 }
 0x1ac   : > { %1071 = vst [vmem:[%s5566_s23 + $0x1a0] sm:$0xff] %v831_v39  ;;  %v833_v44 = vadd.f32 %v832_v34, %v5552_v46  ;;  %2127 = vst [vmem:[%s5575_s7 + $0x198] sm:$0xff] %v1999_v40  ;;  %v2000_v36 = vadd.f32 %v1760_v41, %v831_v39  ;;  %v1762_v10 = vadd.f32 %v1761_v8, %v5552_v46  ;;  %v4425_v39 = vld [vmem:[%s5047_s6 + $0x910] sm:$0xff]  ;;  %v4551_v40 = vld [vmem:[%s5047_s6 + $0xd00] sm:$0xff] }
 0x1ad   : > { %v834_v45 = vpop.f32.mrf.mxu0  ;;  %v1763_v37 = vpop.f32.mrf.mxu1  ;;  %v4428_v34 = vld [vmem:[%s5047_s6 + $0x928] sm:$0xff]  ;;  %v4430_v8 = vld [vmem:[%s5047_s6 + $0x938] sm:$0xff] }
 0x1ae   : > { %1072 = vst [vmem:[%s5566_s23 + $0x1a8] sm:$0xff] %v833_v44  ;;  %v835_v50 = vadd.f32 %v834_v45, %v5550_v9  ;;  %2128 = vst [vmem:[%s5575_s7 + $0x1a0] sm:$0xff] %v2000_v36  ;;  %v2001_v11 = vadd.f32 %v1762_v10, %v833_v44  ;;  %v1764_v12 = vadd.f32 %v1763_v37, %v5550_v9  ;;  %v4556_v44 = vld [vmem:[%s5047_s6 + $0xd28] sm:$0xff]  ;;  %v4558_v36 = vld [vmem:[%s5047_s6 + $0xd38] sm:$0xff] }
 0x1af   : > { %v836_v52 = vpop.f32.mrf.mxu0  ;;  %v1765_v17 = vpop.f32.mrf.mxu1 }
 0x1b0   : > { %1073 = vst [vmem:[%s5566_s23 + $0x1b0] sm:$0xff] %v835_v50  ;;  %v837_v19 = vadd.f32 %v836_v52, %v5552_v46  ;;  %2129 = vst [vmem:[%s5575_s7 + $0x1a8] sm:$0xff] %v2001_v11  ;;  %v2002_v53 = vadd.f32 %v1764_v12, %v835_v50  ;;  %v1766_v54 = vadd.f32 %v1765_v17, %v5552_v46 }
 0x1b1   : > { %v840_v55 = vpop.f32.mrf.mxu0  ;;  %2618 = vmatmul.mubr.bf16.gmra.mxu0 %v2473_v47  ;;  %v1769_v56 = vpop.f32.mrf.mxu1  ;;  %3548 = vmatmul.mubr.bf16.gmra.mxu1 %v3403_v48  ;;  %v2477_v48 = vpack.c.bf16 %v4425_v39, %v4423_v38  ;;  %v3407_v50 = vpack.c.bf16 %v4553_v33, %v4551_v40  ;;  %v2480_v11 = vpack.c.bf16 %v4430_v8, %v4428_v34  ;;  %v4431_v40 = vld [vmem:[%s5047_s6 + $0x940] sm:$0xff]  ;;  %v4561_v8 = vld [vmem:[%s5047_s6 + $0xd50] sm:$0xff] }
 0x1b2   : > { %1074 = vst [vmem:[%s5566_s23 + $0x1b8] sm:$0xff] %v837_v19  ;;  %v841_v22 = vadd.f32 %v840_v55, %v5550_v9  ;;  %2130 = vst [vmem:[%s5575_s7 + $0x1b0] sm:$0xff] %v2002_v53  ;;  %v2003_v59 = vadd.f32 %v1766_v54, %v837_v19  ;;  %v1770_v60 = vadd.f32 %v1769_v56, %v5550_v9  ;;  %2627 = vmatprep.mubr.bf16.mxu0 %v2476_v49 }
 0x1b3   : > { %3557 = vmatprep.mubr.bf16.mxu1 %v3406_v51  ;;  %v842_v62 = vpop.f32.mrf.mxu0  ;;  %v1771_v63 = vpop.f32.mrf.mxu1  ;;  %v3410_v17 = vpack.c.bf16 %v4558_v36, %v4556_v44 }
 0x1b4   : > { %1075 = vst [vmem:[%s5566_s23 + $0x1c0] sm:$0xff] %v841_v22  ;;  %v843_v2 = vadd.f32 %v842_v62, %v5552_v46  ;;  %2131 = vst [vmem:[%s5575_s7 + $0x1b8] sm:$0xff] %v2003_v59  ;;  %v2004_v25 = vadd.f32 %v1770_v60, %v841_v22  ;;  %v1772_v26 = vadd.f32 %v1771_v63, %v5552_v46  ;;  %v4429_v22 = vld [vmem:[%s5047_s6 + $0x930] sm:$0xff]  ;;  %v4555_v59 = vld [vmem:[%s5047_s6 + $0xd20] sm:$0xff] }
 0x1b5   : > { %v844_v13 = vpop.f32.mrf.mxu0  ;;  %v1773_v27 = vpop.f32.mrf.mxu1  ;;  %v4432_v62 = vld [vmem:[%s5047_s6 + $0x948] sm:$0xff]  ;;  %v4434_v63 = vld [vmem:[%s5047_s6 + $0x958] sm:$0xff] }
 0x1b6   : > { %1076 = vst [vmem:[%s5566_s23 + $0x1c8] sm:$0xff] %v843_v2  ;;  %v845_v3 = vadd.f32 %v844_v13, %v5550_v9  ;;  %2132 = vst [vmem:[%s5575_s7 + $0x1c0] sm:$0xff] %v2004_v25  ;;  %v2005_v4 = vadd.f32 %v1772_v26, %v843_v2  ;;  %v1774_v16 = vadd.f32 %v1773_v27, %v5550_v9  ;;  %v4560_v2 = vld [vmem:[%s5047_s6 + $0xd48] sm:$0xff]  ;;  %v4562_v25 = vld [vmem:[%s5047_s6 + $0xd58] sm:$0xff] }
 0x1b7   : > { %v846_v5 = vpop.f32.mrf.mxu0  ;;  %v1775_v29 = vpop.f32.mrf.mxu1 }
 0x1b8   : > { %1077 = vst [vmem:[%s5566_s23 + $0x1d0] sm:$0xff] %v845_v3  ;;  %v847_v30 = vadd.f32 %v846_v5, %v5552_v46  ;;  %2133 = vst [vmem:[%s5575_s7 + $0x1c8] sm:$0xff] %v2005_v4  ;;  %v2006_v6 = vadd.f32 %v1774_v16, %v845_v3  ;;  %v1776_v20 = vadd.f32 %v1775_v29, %v5552_v46 }
 0x1b9   : > { %v850_v31 = vpop.f32.mrf.mxu0  ;;  %2628 = vmatmul.mubr.bf16.gmra.mxu0 %v2475_v14  ;;  %v1779_v32 = vpop.f32.mrf.mxu1  ;;  %3558 = vmatmul.mubr.bf16.gmra.mxu1 %v3405_v28  ;;  %v2479_v28 = vpack.c.bf16 %v4429_v22, %v4427_v21  ;;  %v3409_v3 = vpack.c.bf16 %v4557_v61, %v4555_v59  ;;  %v2482_v4 = vpack.c.bf16 %v4434_v63, %v4432_v62  ;;  %v4435_v59 = vld [vmem:[%s5047_s6 + $0x960] sm:$0xff]  ;;  %v4565_v63 = vld [vmem:[%s5047_s6 + $0xd70] sm:$0xff] }
 0x1ba   : > { %1078 = vst [vmem:[%s5566_s23 + $0x1d8] sm:$0xff] %v847_v30  ;;  %v851_v41 = vadd.f32 %v850_v31, %v5550_v9  ;;  %2134 = vst [vmem:[%s5575_s7 + $0x1d0] sm:$0xff] %v2006_v6  ;;  %v2007_v42 = vadd.f32 %v1776_v20, %v847_v30  ;;  %v1780_v7 = vadd.f32 %v1779_v32, %v5550_v9  ;;  %2637 = vmatprep.mubr.bf16.mxu0 %v2478_v15 }
 0x1bb   : > { %3567 = vmatprep.mubr.bf16.mxu1 %v3408_v18  ;;  %v852_v43 = vpop.f32.mrf.mxu0  ;;  %v1781_v35 = vpop.f32.mrf.mxu1  ;;  %v3412_v29 = vpack.c.bf16 %v4562_v25, %v4560_v2 }
 0x1bc   : > { %1079 = vst [vmem:[%s5566_s23 + $0x1e0] sm:$0xff] %v851_v41  ;;  %v853_v10 = vadd.f32 %v852_v43, %v5552_v46  ;;  %2135 = vst [vmem:[%s5575_s7 + $0x1d8] sm:$0xff] %v2007_v42  ;;  %v2008_v45 = vadd.f32 %v1780_v7, %v851_v41  ;;  %v1782_v47 = vadd.f32 %v1781_v35, %v5552_v46  ;;  %v4433_v41 = vld [vmem:[%s5047_s6 + $0x950] sm:$0xff]  ;;  %v4559_v42 = vld [vmem:[%s5047_s6 + $0xd40] sm:$0xff] }
 0x1bd   : > { %v854_v37 = vpop.f32.mrf.mxu0  ;;  %v1783_v49 = vpop.f32.mrf.mxu1  ;;  %v4436_v43 = vld [vmem:[%s5047_s6 + $0x968] sm:$0xff]  ;;  %v4438_v35 = vld [vmem:[%s5047_s6 + $0x978] sm:$0xff] }
 0x1be   : > { %1080 = vst [vmem:[%s5566_s23 + $0x1e8] sm:$0xff] %v853_v10  ;;  %v855_v12 = vadd.f32 %v854_v37, %v5550_v9  ;;  %2136 = vst [vmem:[%s5575_s7 + $0x1e0] sm:$0xff] %v2008_v45  ;;  %v2009_v51 = vadd.f32 %v1782_v47, %v853_v10  ;;  %v1784_v52 = vadd.f32 %v1783_v49, %v5550_v9  ;;  %v4564_v10 = vld [vmem:[%s5047_s6 + $0xd68] sm:$0xff]  ;;  %v4566_v45 = vld [vmem:[%s5047_s6 + $0xd78] sm:$0xff] }
 0x1bf   : > { %v856_v19 = vpop.f32.mrf.mxu0  ;;  %v1785_v53 = vpop.f32.mrf.mxu1 }
 0x1c0   : > { %1081 = vst [vmem:[%s5566_s23 + $0x1f0] sm:$0xff] %v855_v12  ;;  %v857_v54 = vadd.f32 %v856_v19, %v5552_v46  ;;  %2137 = vst [vmem:[%s5575_s7 + $0x1e8] sm:$0xff] %v2009_v51  ;;  %v2010_v55 = vadd.f32 %v1784_v52, %v855_v12  ;;  %v1786_v56 = vadd.f32 %v1785_v53, %v5552_v46 }
 0x1c1   : > { %v860_v57 = vpop.f32.mrf.mxu0  ;;  %2638 = vmatmul.mubr.bf16.gmra.mxu0 %v2477_v48  ;;  %v1789_v58 = vpop.f32.mrf.mxu1  ;;  %3568 = vmatmul.mubr.bf16.gmra.mxu1 %v3407_v50  ;;  %v2481_v50 = vpack.c.bf16 %v4433_v41, %v4431_v40  ;;  %v3411_v12 = vpack.c.bf16 %v4561_v8, %v4559_v42  ;;  %v2484_v51 = vpack.c.bf16 %v4438_v35, %v4436_v43  ;;  %v4439_v42 = vld [vmem:[%s5047_s6 + $0x980] sm:$0xff]  ;;  %v4569_v35 = vld [vmem:[%s5047_s6 + $0xd90] sm:$0xff] }
 0x1c2   : > { %1082 = vst [vmem:[%s5566_s23 + $0x1f8] sm:$0xff] %v857_v54  ;;  %v861_v60 = vadd.f32 %v860_v57, %v5550_v9  ;;  %2138 = vst [vmem:[%s5575_s7 + $0x1f0] sm:$0xff] %v2010_v55  ;;  %v2011_v23 = vadd.f32 %v1786_v56, %v857_v54  ;;  %v1790_v24 = vadd.f32 %v1789_v58, %v5550_v9  ;;  %2647 = vmatprep.mubr.bf16.mxu0 %v2480_v11 }
 0x1c3   : > { %3577 = vmatprep.mubr.bf16.mxu1 %v3410_v17  ;;  %v862_v0 = vpop.f32.mrf.mxu0  ;;  %v1791_v1 = vpop.f32.mrf.mxu1  ;;  %v3414_v53 = vpack.c.bf16 %v4566_v45, %v4564_v10 }
 0x1c4   : > { %1083 = vst [vmem:[%s5566_s23 + $0x200] sm:$0xff] %v861_v60  ;;  %v863_v26 = vadd.f32 %v862_v0, %v5552_v46  ;;  %2139 = vst [vmem:[%s5575_s7 + $0x1f8] sm:$0xff] %v2011_v23  ;;  %v2012_v13 = vadd.f32 %v1790_v24, %v861_v60  ;;  %v1792_v14 = vadd.f32 %v1791_v1, %v5552_v46  ;;  %v4437_v60 = vld [vmem:[%s5047_s6 + $0x970] sm:$0xff]  ;;  %v4563_v23 = vld [vmem:[%s5047_s6 + $0xd60] sm:$0xff] }
 0x1c5   : > { %v864_v27 = vpop.f32.mrf.mxu0  ;;  %v1793_v15 = vpop.f32.mrf.mxu1  ;;  %v4440_v0 = vld [vmem:[%s5047_s6 + $0x988] sm:$0xff]  ;;  %v4442_v1 = vld [vmem:[%s5047_s6 + $0x998] sm:$0xff] }
 0x1c6   : > { %1084 = vst [vmem:[%s5566_s23 + $0x208] sm:$0xff] %v863_v26  ;;  %v865_v16 = vadd.f32 %v864_v27, %v5550_v9  ;;  %2140 = vst [vmem:[%s5575_s7 + $0x200] sm:$0xff] %v2012_v13  ;;  %v2013_v18 = vadd.f32 %v1792_v14, %v863_v26  ;;  %v1794_v5 = vadd.f32 %v1793_v15, %v5550_v9  ;;  %v4568_v26 = vld [vmem:[%s5047_s6 + $0xd88] sm:$0xff]  ;;  %v4570_v13 = vld [vmem:[%s5047_s6 + $0xd98] sm:$0xff] }
 0x1c7   : > { %v866_v30 = vpop.f32.mrf.mxu0  ;;  %v1795_v6 = vpop.f32.mrf.mxu1 }
 0x1c8   : > { %1085 = vst [vmem:[%s5566_s23 + $0x210] sm:$0xff] %v865_v16  ;;  %v867_v20 = vadd.f32 %v866_v30, %v5552_v46  ;;  %2141 = vst [vmem:[%s5575_s7 + $0x208] sm:$0xff] %v2013_v18  ;;  %v2014_v31 = vadd.f32 %v1794_v5, %v865_v16  ;;  %v1796_v32 = vadd.f32 %v1795_v6, %v5552_v46 }
 0x1c9   : > { %v870_v38 = vpop.f32.mrf.mxu0  ;;  %2648 = vmatmul.mubr.bf16.gmra.mxu0 %v2479_v28  ;;  %v1799_v39 = vpop.f32.mrf.mxu1  ;;  %3578 = vmatmul.mubr.bf16.gmra.mxu1 %v3409_v3  ;;  %v2483_v3 = vpack.c.bf16 %v4437_v60, %v4435_v59  ;;  %v3413_v16 = vpack.c.bf16 %v4565_v63, %v4563_v23  ;;  %v2486_v18 = vpack.c.bf16 %v4442_v1, %v4440_v0  ;;  %v4443_v23 = vld [vmem:[%s5047_s6 + $0x9a0] sm:$0xff]  ;;  %v4573_v1 = vld [vmem:[%s5047_s6 + $0xdb0] sm:$0xff] }
 0x1ca   : > { %1086 = vst [vmem:[%s5566_s23 + $0x218] sm:$0xff] %v867_v20  ;;  %v871_v7 = vadd.f32 %v870_v38, %v5550_v9  ;;  %2142 = vst [vmem:[%s5575_s7 + $0x210] sm:$0xff] %v2014_v31  ;;  %v2015_v33 = vadd.f32 %v1796_v32, %v867_v20  ;;  %v1800_v34 = vadd.f32 %v1799_v39, %v5550_v9  ;;  %2657 = vmatprep.mubr.bf16.mxu0 %v2482_v4 }
 0x1cb   : > { %3587 = vmatprep.mubr.bf16.mxu1 %v3412_v29  ;;  %v872_v44 = vpop.f32.mrf.mxu0  ;;  %v1801_v36 = vpop.f32.mrf.mxu1  ;;  %v3416_v6 = vpack.c.bf16 %v4570_v13, %v4568_v26 }
 0x1cc   : > { %1087 = vst [vmem:[%s5566_s23 + $0x220] sm:$0xff] %v871_v7  ;;  %v873_v47 = vadd.f32 %v872_v44, %v5552_v46  ;;  %2143 = vst [vmem:[%s5575_s7 + $0x218] sm:$0xff] %v2015_v33  ;;  %v2016_v37 = vadd.f32 %v1800_v34, %v871_v7  ;;  %v1802_v48 = vadd.f32 %v1801_v36, %v5552_v46  ;;  %v4441_v7 = vld [vmem:[%s5047_s6 + $0x990] sm:$0xff]  ;;  %v4567_v33 = vld [vmem:[%s5047_s6 + $0xd80] sm:$0xff] }
 0x1cd   : > { %v874_v49 = vpop.f32.mrf.mxu0  ;;  %v1803_v11 = vpop.f32.mrf.mxu1  ;;  %v4444_v44 = vld [vmem:[%s5047_s6 + $0x9a8] sm:$0xff]  ;;  %v4446_v36 = vld [vmem:[%s5047_s6 + $0x9b8] sm:$0xff] }
 0x1ce   : > { %1088 = vst [vmem:[%s5566_s23 + $0x228] sm:$0xff] %v873_v47  ;;  %v875_v52 = vadd.f32 %v874_v49, %v5550_v9  ;;  %2144 = vst [vmem:[%s5575_s7 + $0x220] sm:$0xff] %v2016_v37  ;;  %v2017_v17 = vadd.f32 %v1802_v48, %v873_v47  ;;  %v1804_v19 = vadd.f32 %v1803_v11, %v5550_v9  ;;  %v4572_v47 = vld [vmem:[%s5047_s6 + $0xda8] sm:$0xff]  ;;  %v4574_v37 = vld [vmem:[%s5047_s6 + $0xdb8] sm:$0xff] }
 0x1cf   : > { %v876_v54 = vpop.f32.mrf.mxu0  ;;  %v1805_v55 = vpop.f32.mrf.mxu1 }
 0x1d0   : > { %1089 = vst [vmem:[%s5566_s23 + $0x230] sm:$0xff] %v875_v52  ;;  %v877_v56 = vadd.f32 %v876_v54, %v5552_v46  ;;  %2145 = vst [vmem:[%s5575_s7 + $0x228] sm:$0xff] %v2017_v17  ;;  %v2018_v57 = vadd.f32 %v1804_v19, %v875_v52  ;;  %v1806_v58 = vadd.f32 %v1805_v55, %v5552_v46 }
 0x1d1   : > { %v880_v21 = vpop.f32.mrf.mxu0  ;;  %2658 = vmatmul.mubr.bf16.gmra.mxu0 %v2481_v50  ;;  %v1809_v22 = vpop.f32.mrf.mxu1  ;;  %3588 = vmatmul.mubr.bf16.gmra.mxu1 %v3411_v12  ;;  %v2485_v12 = vpack.c.bf16 %v4441_v7, %v4439_v42  ;;  %v3415_v52 = vpack.c.bf16 %v4569_v35, %v4567_v33  ;;  %v2488_v17 = vpack.c.bf16 %v4446_v36, %v4444_v44  ;;  %v4447_v33 = vld [vmem:[%s5047_s6 + $0x9c0] sm:$0xff]  ;;  %v4577_v36 = vld [vmem:[%s5047_s6 + $0xdd0] sm:$0xff] }
 0x1d2   : > { %1090 = vst [vmem:[%s5566_s23 + $0x238] sm:$0xff] %v877_v56  ;;  %v881_v24 = vadd.f32 %v880_v21, %v5550_v9  ;;  %2146 = vst [vmem:[%s5575_s7 + $0x230] sm:$0xff] %v2018_v57  ;;  %v2019_v61 = vadd.f32 %v1806_v58, %v877_v56  ;;  %v1810_v62 = vadd.f32 %v1809_v22, %v5550_v9  ;;  %2667 = vmatprep.mubr.bf16.mxu0 %v2484_v51 }
 0x1d3   : > { %3597 = vmatprep.mubr.bf16.mxu1 %v3414_v53  ;;  %v882_v2 = vpop.f32.mrf.mxu0  ;;  %v1811_v25 = vpop.f32.mrf.mxu1  ;;  %v3418_v55 = vpack.c.bf16 %v4574_v37, %v4572_v47 }
 0x1d4   : > { %1091 = vst [vmem:[%s5566_s23 + $0x240] sm:$0xff] %v881_v24  ;;  %v883_v14 = vadd.f32 %v882_v2, %v5552_v46  ;;  %2147 = vst [vmem:[%s5575_s7 + $0x238] sm:$0xff] %v2019_v61  ;;  %v2020_v27 = vadd.f32 %v1810_v62, %v881_v24  ;;  %v1812_v28 = vadd.f32 %v1811_v25, %v5552_v46  ;;  %v4445_v24 = vld [vmem:[%s5047_s6 + $0x9b0] sm:$0xff]  ;;  %v4571_v61 = vld [vmem:[%s5047_s6 + $0xda0] sm:$0xff] }
 0x1d5   : > { %v884_v15 = vpop.f32.mrf.mxu0  ;;  %v1813_v4 = vpop.f32.mrf.mxu1  ;;  %v4448_v2 = vld [vmem:[%s5047_s6 + $0x9c8] sm:$0xff]  ;;  %v4450_v25 = vld [vmem:[%s5047_s6 + $0x9d8] sm:$0xff] }
 0x1d6   : > { %1092 = vst [vmem:[%s5566_s23 + $0x248] sm:$0xff] %v883_v14  ;;  %v885_v5 = vadd.f32 %v884_v15, %v5550_v9  ;;  %2148 = vst [vmem:[%s5575_s7 + $0x240] sm:$0xff] %v2020_v27  ;;  %v2021_v29 = vadd.f32 %v1812_v28, %v883_v14  ;;  %v1814_v30 = vadd.f32 %v1813_v4, %v5550_v9  ;;  %v4576_v14 = vld [vmem:[%s5047_s6 + $0xdc8] sm:$0xff]  ;;  %v4578_v27 = vld [vmem:[%s5047_s6 + $0xdd8] sm:$0xff] }
 0x1d7   : > { %v886_v20 = vpop.f32.mrf.mxu0  ;;  %v1815_v31 = vpop.f32.mrf.mxu1 }
 0x1d8   : > { %1093 = vst [vmem:[%s5566_s23 + $0x250] sm:$0xff] %v885_v5  ;;  %v887_v32 = vadd.f32 %v886_v20, %v5552_v46  ;;  %2149 = vst [vmem:[%s5575_s7 + $0x248] sm:$0xff] %v2021_v29  ;;  %v2022_v38 = vadd.f32 %v1814_v30, %v885_v5  ;;  %v1816_v39 = vadd.f32 %v1815_v31, %v5552_v46 }
 0x1d9   : > { %v890_v40 = vpop.f32.mrf.mxu0  ;;  %2668 = vmatmul.mubr.bf16.gmra.mxu0 %v2483_v3  ;;  %v1819_v41 = vpop.f32.mrf.mxu1  ;;  %3598 = vmatmul.mubr.bf16.gmra.mxu1 %v3413_v16  ;;  %v2487_v16 = vpack.c.bf16 %v4445_v24, %v4443_v23  ;;  %v3417_v5 = vpack.c.bf16 %v4573_v1, %v4571_v61  ;;  %v2490_v29 = vpack.c.bf16 %v4450_v25, %v4448_v2  ;;  %v4451_v61 = vld [vmem:[%s5047_s6 + $0x9e0] sm:$0xff]  ;;  %v4581_v25 = vld [vmem:[%s5047_s6 + $0xdf0] sm:$0xff] }
 0x1da   : > { %1094 = vst [vmem:[%s5566_s23 + $0x258] sm:$0xff] %v887_v32  ;;  %v891_v34 = vadd.f32 %v890_v40, %v5550_v9  ;;  %2150 = vst [vmem:[%s5575_s7 + $0x250] sm:$0xff] %v2022_v38  ;;  %v2023_v8 = vadd.f32 %v1816_v39, %v887_v32  ;;  %v1820_v43 = vadd.f32 %v1819_v41, %v5550_v9  ;;  %2677 = vmatprep.mubr.bf16.mxu0 %v2486_v18 }
 0x1db   : > { %3607 = vmatprep.mubr.bf16.mxu1 %v3416_v6  ;;  %v892_v10 = vpop.f32.mrf.mxu0  ;;  %v1821_v45 = vpop.f32.mrf.mxu1  ;;  %v3420_v31 = vpack.c.bf16 %v4578_v27, %v4576_v14 }
 0x1dc   : > { %1095 = vst [vmem:[%s5566_s23 + $0x260] sm:$0xff] %v891_v34  ;;  %v893_v48 = vadd.f32 %v892_v10, %v5552_v46  ;;  %2151 = vst [vmem:[%s5575_s7 + $0x258] sm:$0xff] %v2023_v8  ;;  %v2024_v49 = vadd.f32 %v1820_v43, %v891_v34  ;;  %v1822_v50 = vadd.f32 %v1821_v45, %v5552_v46  ;;  %v4449_v34 = vld [vmem:[%s5047_s6 + $0x9d0] sm:$0xff]  ;;  %v4575_v8 = vld [vmem:[%s5047_s6 + $0xdc0] sm:$0xff] }
 0x1dd   : > { %v894_v11 = vpop.f32.mrf.mxu0  ;;  %v1823_v51 = vpop.f32.mrf.mxu1  ;;  %v4452_v10 = vld [vmem:[%s5047_s6 + $0x9e8] sm:$0xff]  ;;  %v4454_v45 = vld [vmem:[%s5047_s6 + $0x9f8] sm:$0xff] }
 0x1de   : > { %1096 = vst [vmem:[%s5566_s23 + $0x268] sm:$0xff] %v893_v48  ;;  %v895_v19 = vadd.f32 %v894_v11, %v5550_v9  ;;  %2152 = vst [vmem:[%s5575_s7 + $0x260] sm:$0xff] %v2024_v49  ;;  %v2025_v53 = vadd.f32 %v1822_v50, %v893_v48  ;;  %v1824_v54 = vadd.f32 %v1823_v51, %v5550_v9  ;;  %v4580_v48 = vld [vmem:[%s5047_s6 + $0xde8] sm:$0xff]  ;;  %v4582_v49 = vld [vmem:[%s5047_s6 + $0xdf8] sm:$0xff] }
 0x1df   : > { %v896_v56 = vpop.f32.mrf.mxu0  ;;  %v1825_v57 = vpop.f32.mrf.mxu1 }
 0x1e0   : > { %1097 = vst [vmem:[%s5566_s23 + $0x270] sm:$0xff] %v895_v19  ;;  %v897_v58 = vadd.f32 %v896_v56, %v5552_v46  ;;  %2153 = vst [vmem:[%s5575_s7 + $0x268] sm:$0xff] %v2025_v53  ;;  %v2026_v21 = vadd.f32 %v1824_v54, %v895_v19  ;;  %v1826_v22 = vadd.f32 %v1825_v57, %v5552_v46 }
 0x1e1   : > { %v900_v59 = vpop.f32.mrf.mxu0  ;;  %2678 = vmatmul.mubr.bf16.gmra.mxu0 %v2485_v12  ;;  %v1829_v60 = vpop.f32.mrf.mxu1  ;;  %3608 = vmatmul.mubr.bf16.gmra.mxu1 %v3415_v52  ;;  %v2489_v52 = vpack.c.bf16 %v4449_v34, %v4447_v33  ;;  %v3419_v19 = vpack.c.bf16 %v4577_v36, %v4575_v8  ;;  %v2492_v53 = vpack.c.bf16 %v4454_v45, %v4452_v10  ;;  %v4455_v8 = vld [vmem:[%s5047_s6 + $0xa00] sm:$0xff]  ;;  %v4585_v45 = vld [vmem:[%s5047_s6 + $0xe10] sm:$0xff] }
 0x1e2   : > { %1098 = vst [vmem:[%s5566_s23 + $0x278] sm:$0xff] %v897_v58  ;;  %v901_v62 = vadd.f32 %v900_v59, %v5550_v9  ;;  %2154 = vst [vmem:[%s5575_s7 + $0x270] sm:$0xff] %v2026_v21  ;;  %v2027_v63 = vadd.f32 %v1826_v22, %v897_v58  ;;  %v1830_v0 = vadd.f32 %v1829_v60, %v5550_v9  ;;  %2687 = vmatprep.mubr.bf16.mxu0 %v2488_v17 }
 0x1e3   : > { %3617 = vmatprep.mubr.bf16.mxu1 %v3418_v55  ;;  %v902_v26 = vpop.f32.mrf.mxu0  ;;  %v1831_v13 = vpop.f32.mrf.mxu1  ;;  %v3422_v57 = vpack.c.bf16 %v4582_v49, %v4580_v48 }
 0x1e4   : > { %1099 = vst [vmem:[%s5566_s23 + $0x280] sm:$0xff] %v901_v62  ;;  %v903_v28 = vadd.f32 %v902_v26, %v5552_v46  ;;  %2155 = vst [vmem:[%s5575_s7 + $0x278] sm:$0xff] %v2027_v63  ;;  %v2028_v15 = vadd.f32 %v1830_v0, %v901_v62  ;;  %v1832_v3 = vadd.f32 %v1831_v13, %v5552_v46  ;;  %v4453_v62 = vld [vmem:[%s5047_s6 + $0x9f0] sm:$0xff]  ;;  %v4579_v63 = vld [vmem:[%s5047_s6 + $0xde0] sm:$0xff] }
 0x1e5   : > { %v904_v4 = vpop.f32.mrf.mxu0  ;;  %v1833_v18 = vpop.f32.mrf.mxu1  ;;  %v4456_v26 = vld [vmem:[%s5047_s6 + $0xa08] sm:$0xff]  ;;  %v4458_v13 = vld [vmem:[%s5047_s6 + $0xa18] sm:$0xff] }
 0x1e6   : > { %1100 = vst [vmem:[%s5566_s23 + $0x288] sm:$0xff] %v903_v28  ;;  %v905_v30 = vadd.f32 %v904_v4, %v5550_v9  ;;  %2156 = vst [vmem:[%s5575_s7 + $0x280] sm:$0xff] %v2028_v15  ;;  %v2029_v6 = vadd.f32 %v1832_v3, %v903_v28  ;;  %v1834_v20 = vadd.f32 %v1833_v18, %v5550_v9  ;;  %v4584_v28 = vld [vmem:[%s5047_s6 + $0xe08] sm:$0xff]  ;;  %v4586_v15 = vld [vmem:[%s5047_s6 + $0xe18] sm:$0xff] }
 0x1e7   : > { %v906_v32 = vpop.f32.mrf.mxu0  ;;  %v1835_v38 = vpop.f32.mrf.mxu1 }
 0x1e8   : > { %1101 = vst [vmem:[%s5566_s23 + $0x290] sm:$0xff] %v905_v30  ;;  %v907_v39 = vadd.f32 %v906_v32, %v5552_v46  ;;  %2157 = vst [vmem:[%s5575_s7 + $0x288] sm:$0xff] %v2029_v6  ;;  %v2030_v40 = vadd.f32 %v1834_v20, %v905_v30  ;;  %v1836_v41 = vadd.f32 %v1835_v38, %v5552_v46 }
 0x1e9   : > { %v910_v42 = vpop.f32.mrf.mxu0  ;;  %2688 = vmatmul.mubr.bf16.gmra.mxu0 %v2487_v16  ;;  %v1839_v7 = vpop.f32.mrf.mxu1  ;;  %3618 = vmatmul.mubr.bf16.gmra.mxu1 %v3417_v5  ;;  %v2491_v5 = vpack.c.bf16 %v4453_v62, %v4451_v61  ;;  %v3421_v30 = vpack.c.bf16 %v4581_v25, %v4579_v63  ;;  %v2494_v6 = vpack.c.bf16 %v4458_v13, %v4456_v26  ;;  %v4459_v63 = vld [vmem:[%s5047_s6 + $0xa20] sm:$0xff]  ;;  %v4589_v13 = vld [vmem:[%s5047_s6 + $0xe30] sm:$0xff] }
 0x1ea   : > { %1102 = vst [vmem:[%s5566_s23 + $0x298] sm:$0xff] %v907_v39  ;;  %v911_v43 = vadd.f32 %v910_v42, %v5550_v9  ;;  %2158 = vst [vmem:[%s5575_s7 + $0x290] sm:$0xff] %v2030_v40  ;;  %v2031_v35 = vadd.f32 %v1836_v41, %v907_v39  ;;  %v1840_v44 = vadd.f32 %v1839_v7, %v5550_v9  ;;  %2697 = vmatprep.mubr.bf16.mxu0 %v2490_v29 }
 0x1eb   : > { %3627 = vmatprep.mubr.bf16.mxu1 %v3420_v31  ;;  %v912_v47 = vpop.f32.mrf.mxu0  ;;  %v1841_v37 = vpop.f32.mrf.mxu1  ;;  %v3424_v38 = vpack.c.bf16 %v4586_v15, %v4584_v28 }
 0x1ec   : > { %1103 = vst [vmem:[%s5566_s23 + $0x2a0] sm:$0xff] %v911_v43  ;;  %v913_v50 = vadd.f32 %v912_v47, %v5552_v46  ;;  %2159 = vst [vmem:[%s5575_s7 + $0x298] sm:$0xff] %v2031_v35  ;;  %v2032_v11 = vadd.f32 %v1840_v44, %v911_v43  ;;  %v1842_v12 = vadd.f32 %v1841_v37, %v5552_v46  ;;  %v4457_v43 = vld [vmem:[%s5047_s6 + $0xa10] sm:$0xff]  ;;  %v4583_v35 = vld [vmem:[%s5047_s6 + $0xe00] sm:$0xff] }
 0x1ed   : > { %v914_v51 = vpop.f32.mrf.mxu0  ;;  %v1843_v17 = vpop.f32.mrf.mxu1  ;;  %v4460_v47 = vld [vmem:[%s5047_s6 + $0xa28] sm:$0xff]  ;;  %v4462_v37 = vld [vmem:[%s5047_s6 + $0xa38] sm:$0xff] }
 0x1ee   : > { %1104 = vst [vmem:[%s5566_s23 + $0x2a8] sm:$0xff] %v913_v50  ;;  %v915_v54 = vadd.f32 %v914_v51, %v5550_v9  ;;  %2160 = vst [vmem:[%s5575_s7 + $0x2a0] sm:$0xff] %v2032_v11  ;;  %v2033_v55 = vadd.f32 %v1842_v12, %v913_v50  ;;  %v1844_v56 = vadd.f32 %v1843_v17, %v5550_v9  ;;  %v4588_v50 = vld [vmem:[%s5047_s6 + $0xe28] sm:$0xff]  ;;  %v4590_v11 = vld [vmem:[%s5047_s6 + $0xe38] sm:$0xff] }
 0x1ef   : > { %v916_v58 = vpop.f32.mrf.mxu0  ;;  %v1845_v21 = vpop.f32.mrf.mxu1 }
 0x1f0   : > { %1105 = vst [vmem:[%s5566_s23 + $0x2b0] sm:$0xff] %v915_v54  ;;  %v917_v22 = vadd.f32 %v916_v58, %v5552_v46  ;;  %2161 = vst [vmem:[%s5575_s7 + $0x2a8] sm:$0xff] %v2033_v55  ;;  %v2034_v59 = vadd.f32 %v1844_v56, %v915_v54  ;;  %v1846_v60 = vadd.f32 %v1845_v21, %v5552_v46 }
 0x1f1   : > { %v920_v23 = vpop.f32.mrf.mxu0  ;;  %2698 = vmatmul.mubr.bf16.gmra.mxu0 %v2489_v52  ;;  %v1849_v24 = vpop.f32.mrf.mxu1  ;;  %3628 = vmatmul.mubr.bf16.gmra.mxu1 %v3419_v19  ;;  %v2493_v19 = vpack.c.bf16 %v4457_v43, %v4455_v8  ;;  %v3423_v54 = vpack.c.bf16 %v4585_v45, %v4583_v35  ;;  %v2496_v55 = vpack.c.bf16 %v4462_v37, %v4460_v47  ;;  %v4463_v35 = vld [vmem:[%s5047_s6 + $0xa40] sm:$0xff]  ;;  %v4593_v37 = vld [vmem:[%s5047_s6 + $0xe50] sm:$0xff] }
 0x1f2   : > { %1106 = vst [vmem:[%s5566_s23 + $0x2b8] sm:$0xff] %v917_v22  ;;  %v921_v0 = vadd.f32 %v920_v23, %v5550_v9  ;;  %2162 = vst [vmem:[%s5575_s7 + $0x2b0] sm:$0xff] %v2034_v59  ;;  %v2035_v1 = vadd.f32 %v1846_v60, %v917_v22  ;;  %v1850_v2 = vadd.f32 %v1849_v24, %v5550_v9  ;;  %2707 = vmatprep.mubr.bf16.mxu0 %v2492_v53 }
 0x1f3   : > { %3637 = vmatprep.mubr.bf16.mxu1 %v3422_v57  ;;  %v922_v14 = vpop.f32.mrf.mxu0  ;;  %v1851_v27 = vpop.f32.mrf.mxu1  ;;  %v3426_v21 = vpack.c.bf16 %v4590_v11, %v4588_v50 }
 0x1f4   : > { %1107 = vst [vmem:[%s5566_s23 + $0x2c0] sm:$0xff] %v921_v0  ;;  %v923_v3 = vadd.f32 %v922_v14, %v5552_v46  ;;  %2163 = vst [vmem:[%s5575_s7 + $0x2b8] sm:$0xff] %v2035_v1  ;;  %v2036_v4 = vadd.f32 %v1850_v2, %v921_v0  ;;  %v1852_v16 = vadd.f32 %v1851_v27, %v5552_v46  ;;  %v4461_v0 = vld [vmem:[%s5047_s6 + $0xa30] sm:$0xff]  ;;  %v4587_v1 = vld [vmem:[%s5047_s6 + $0xe20] sm:$0xff] }
 0x1f5   : > { %v924_v18 = vpop.f32.mrf.mxu0  ;;  %v1853_v29 = vpop.f32.mrf.mxu1  ;;  %v4464_v14 = vld [vmem:[%s5047_s6 + $0xa48] sm:$0xff]  ;;  %v4466_v27 = vld [vmem:[%s5047_s6 + $0xa58] sm:$0xff] }
 0x1f6   : > { %1108 = vst [vmem:[%s5566_s23 + $0x2c8] sm:$0xff] %v923_v3  ;;  %v925_v20 = vadd.f32 %v924_v18, %v5550_v9  ;;  %2164 = vst [vmem:[%s5575_s7 + $0x2c0] sm:$0xff] %v2036_v4  ;;  %v2037_v31 = vadd.f32 %v1852_v16, %v923_v3  ;;  %v1854_v32 = vadd.f32 %v1853_v29, %v5550_v9  ;;  %v4592_v3 = vld [vmem:[%s5047_s6 + $0xe48] sm:$0xff]  ;;  %v4594_v4 = vld [vmem:[%s5047_s6 + $0xe58] sm:$0xff] }
 0x1f7   : > { %v926_v39 = vpop.f32.mrf.mxu0  ;;  %v1855_v40 = vpop.f32.mrf.mxu1 }
 0x1f8   : > { %1109 = vst [vmem:[%s5566_s23 + $0x2d0] sm:$0xff] %v925_v20  ;;  %v927_v41 = vadd.f32 %v926_v39, %v5552_v46  ;;  %2165 = vst [vmem:[%s5575_s7 + $0x2c8] sm:$0xff] %v2037_v31  ;;  %v2038_v42 = vadd.f32 %v1854_v32, %v925_v20  ;;  %v1856_v7 = vadd.f32 %v1855_v40, %v5552_v46 }
 0x1f9   : > { %v930_v33 = vpop.f32.mrf.mxu0  ;;  %2708 = vmatmul.mubr.bf16.gmra.mxu0 %v2491_v5  ;;  %v1859_v34 = vpop.f32.mrf.mxu1  ;;  %3638 = vmatmul.mubr.bf16.gmra.mxu1 %v3421_v30  ;;  %v2495_v30 = vpack.c.bf16 %v4461_v0, %v4459_v63  ;;  %v3425_v20 = vpack.c.bf16 %v4589_v13, %v4587_v1  ;;  %v2498_v31 = vpack.c.bf16 %v4466_v27, %v4464_v14  ;;  %v4467_v1 = vld [vmem:[%s5047_s6 + $0xa60] sm:$0xff]  ;;  %v4597_v27 = vld [vmem:[%s5047_s6 + $0xe70] sm:$0xff] }
 0x1fa   : > { %1110 = vst [vmem:[%s5566_s23 + $0x2d8] sm:$0xff] %v927_v41  ;;  %v931_v44 = vadd.f32 %v930_v33, %v5550_v9  ;;  %2166 = vst [vmem:[%s5575_s7 + $0x2d0] sm:$0xff] %v2038_v42  ;;  %v2039_v36 = vadd.f32 %v1856_v7, %v927_v41  ;;  %v1860_v10 = vadd.f32 %v1859_v34, %v5550_v9  ;;  %2717 = vmatprep.mubr.bf16.mxu0 %v2494_v6 }
 0x1fb   : > { %3647 = vmatprep.mubr.bf16.mxu1 %v3424_v38  ;;  %v932_v48 = vpop.f32.mrf.mxu0  ;;  %v1861_v49 = vpop.f32.mrf.mxu1  ;;  %v3428_v40 = vpack.c.bf16 %v4594_v4, %v4592_v3 }
 0x1fc   : > { %1111 = vst [vmem:[%s5566_s23 + $0x2e0] sm:$0xff] %v931_v44  ;;  %v933_v12 = vadd.f32 %v932_v48, %v5552_v46  ;;  %2167 = vst [vmem:[%s5575_s7 + $0x2d8] sm:$0xff] %v2039_v36  ;;  %v2040_v51 = vadd.f32 %v1860_v10, %v931_v44  ;;  %v1862_v52 = vadd.f32 %v1861_v49, %v5552_v46  ;;  %v4465_v44 = vld [vmem:[%s5047_s6 + $0xa50] sm:$0xff]  ;;  %v4591_v36 = vld [vmem:[%s5047_s6 + $0xe40] sm:$0xff] }
 0x1fd   : > { %v934_v17 = vpop.f32.mrf.mxu0  ;;  %v1863_v53 = vpop.f32.mrf.mxu1  ;;  %v4468_v48 = vld [vmem:[%s5047_s6 + $0xa68] sm:$0xff]  ;;  %v4470_v49 = vld [vmem:[%s5047_s6 + $0xa78] sm:$0xff] }
 0x1fe   : > { %1112 = vst [vmem:[%s5566_s23 + $0x2e8] sm:$0xff] %v933_v12  ;;  %v935_v56 = vadd.f32 %v934_v17, %v5550_v9  ;;  %2168 = vst [vmem:[%s5575_s7 + $0x2e0] sm:$0xff] %v2040_v51  ;;  %v2041_v57 = vadd.f32 %v1862_v52, %v933_v12  ;;  %v1864_v58 = vadd.f32 %v1863_v53, %v5550_v9  ;;  %v4596_v12 = vld [vmem:[%s5047_s6 + $0xe68] sm:$0xff]  ;;  %v4598_v51 = vld [vmem:[%s5047_s6 + $0xe78] sm:$0xff] }
 0x1ff   : > { %v936_v22 = vpop.f32.mrf.mxu0  ;;  %v1865_v59 = vpop.f32.mrf.mxu1 }
 0x200   : > { %1113 = vst [vmem:[%s5566_s23 + $0x2f0] sm:$0xff] %v935_v56  ;;  %v937_v60 = vadd.f32 %v936_v22, %v5552_v46  ;;  %2169 = vst [vmem:[%s5575_s7 + $0x2e8] sm:$0xff] %v2041_v57  ;;  %v2042_v23 = vadd.f32 %v1864_v58, %v935_v56  ;;  %v1866_v24 = vadd.f32 %v1865_v59, %v5552_v46 }
 0x201   : > { %v940_v61 = vpop.f32.mrf.mxu0  ;;  %2718 = vmatmul.mubr.bf16.gmra.mxu0 %v2493_v19  ;;  %v1869_v62 = vpop.f32.mrf.mxu1  ;;  %3648 = vmatmul.mubr.bf16.gmra.mxu1 %v3423_v54  ;;  %v2497_v54 = vpack.c.bf16 %v4465_v44, %v4463_v35  ;;  %v3427_v56 = vpack.c.bf16 %v4593_v37, %v4591_v36  ;;  %v2500_v57 = vpack.c.bf16 %v4470_v49, %v4468_v48  ;;  %v4471_v36 = vld [vmem:[%s5047_s6 + $0xa80] sm:$0xff]  ;;  %v4601_v49 = vld [vmem:[%s5047_s6 + $0xe90] sm:$0xff] }
 0x202   : > { %1114 = vst [vmem:[%s5566_s23 + $0x2f8] sm:$0xff] %v937_v60  ;;  %v941_v2 = vadd.f32 %v940_v61, %v5550_v9  ;;  %2170 = vst [vmem:[%s5575_s7 + $0x2f0] sm:$0xff] %v2042_v23  ;;  %v2043_v25 = vadd.f32 %v1866_v24, %v937_v60  ;;  %v1870_v26 = vadd.f32 %v1869_v62, %v5550_v9  ;;  %2727 = vmatprep.mubr.bf16.mxu0 %v2496_v55 }
 0x203   : > { %3657 = vmatprep.mubr.bf16.mxu1 %v3426_v21  ;;  %v942_v28 = vpop.f32.mrf.mxu0  ;;  %v1871_v15 = vpop.f32.mrf.mxu1  ;;  %v3430_v59 = vpack.c.bf16 %v4598_v51, %v4596_v12 }
 0x204   : > { %1115 = vst [vmem:[%s5566_s23 + $0x300] sm:$0xff] %v941_v2  ;;  %v943_v16 = vadd.f32 %v942_v28, %v5552_v46  ;;  %2171 = vst [vmem:[%s5575_s7 + $0x2f8] sm:$0xff] %v2043_v25  ;;  %v2044_v18 = vadd.f32 %v1870_v26, %v941_v2  ;;  %v1872_v5 = vadd.f32 %v1871_v15, %v5552_v46  ;;  %v4469_v2 = vld [vmem:[%s5047_s6 + $0xa70] sm:$0xff]  ;;  %v4595_v25 = vld [vmem:[%s5047_s6 + $0xe60] sm:$0xff] }
 0x205   : > { %v944_v29 = vpop.f32.mrf.mxu0  ;;  %v1873_v6 = vpop.f32.mrf.mxu1  ;;  %v4472_v28 = vld [vmem:[%s5047_s6 + $0xa88] sm:$0xff]  ;;  %v4474_v15 = vld [vmem:[%s5047_s6 + $0xa98] sm:$0xff] }
 0x206   : > { %1116 = vst [vmem:[%s5566_s23 + $0x308] sm:$0xff] %v943_v16  ;;  %v945_v32 = vadd.f32 %v944_v29, %v5550_v9  ;;  %2172 = vst [vmem:[%s5575_s7 + $0x300] sm:$0xff] %v2044_v18  ;;  %v2045_v38 = vadd.f32 %v1872_v5, %v943_v16  ;;  %v1874_v39 = vadd.f32 %v1873_v6, %v5550_v9  ;;  %v4600_v16 = vld [vmem:[%s5047_s6 + $0xe88] sm:$0xff]  ;;  %v4602_v18 = vld [vmem:[%s5047_s6 + $0xe98] sm:$0xff] }
 0x207   : > { %v946_v41 = vpop.f32.mrf.mxu0  ;;  %v1875_v42 = vpop.f32.mrf.mxu1 }
 0x208   : > { %1117 = vst [vmem:[%s5566_s23 + $0x310] sm:$0xff] %v945_v32  ;;  %v947_v7 = vadd.f32 %v946_v41, %v5552_v46  ;;  %2173 = vst [vmem:[%s5575_s7 + $0x308] sm:$0xff] %v2045_v38  ;;  %v2046_v33 = vadd.f32 %v1874_v39, %v945_v32  ;;  %v1876_v34 = vadd.f32 %v1875_v42, %v5552_v46 }
 0x209   : > { %v950_v8 = vpop.f32.mrf.mxu0  ;;  %2728 = vmatmul.mubr.bf16.gmra.mxu0 %v2495_v30  ;;  %v1879_v43 = vpop.f32.mrf.mxu1  ;;  %3658 = vmatmul.mubr.bf16.gmra.mxu1 %v3425_v20  ;;  %v2499_v20 = vpack.c.bf16 %v4469_v2, %v4467_v1  ;;  %v3429_v32 = vpack.c.bf16 %v4597_v27, %v4595_v25  ;;  %v2502_v38 = vpack.c.bf16 %v4474_v15, %v4472_v28  ;;  %v4475_v25 = vld [vmem:[%s5047_s6 + $0xaa0] sm:$0xff]  ;;  %v4605_v15 = vld [vmem:[%s5047_s6 + $0xeb0] sm:$0xff] }
 0x20a   : > { %1118 = vst [vmem:[%s5566_s23 + $0x318] sm:$0xff] %v947_v7  ;;  %v951_v10 = vadd.f32 %v950_v8, %v5550_v9  ;;  %2174 = vst [vmem:[%s5575_s7 + $0x310] sm:$0xff] %v2046_v33  ;;  %v2047_v45 = vadd.f32 %v1876_v34, %v947_v7  ;;  %v1880_v47 = vadd.f32 %v1879_v43, %v5550_v9  ;;  %2737 = vmatprep.mubr.bf16.mxu0 %v2498_v31 }
 0x20b   : > { %3667 = vmatprep.mubr.bf16.mxu1 %v3428_v40  ;;  %v952_v50 = vpop.f32.mrf.mxu0  ;;  %v1881_v11 = vpop.f32.mrf.mxu1  ;;  %v3432_v42 = vpack.c.bf16 %v4602_v18, %v4600_v16 }
 0x20c   : > { %1119 = vst [vmem:[%s5566_s23 + $0x320] sm:$0xff] %v951_v10  ;;  %v953_v52 = vadd.f32 %v952_v50, %v5552_v46  ;;  %2175 = vst [vmem:[%s5575_s7 + $0x318] sm:$0xff] %v2047_v45  ;;  %v2048_v17 = vadd.f32 %v1880_v47, %v951_v10  ;;  %v1882_v19 = vadd.f32 %v1881_v11, %v5552_v46  ;;  %v4473_v10 = vld [vmem:[%s5047_s6 + $0xa90] sm:$0xff]  ;;  %v4599_v45 = vld [vmem:[%s5047_s6 + $0xe80] sm:$0xff] }
 0x20d   : > { %v954_v53 = vpop.f32.mrf.mxu0  ;;  %v1883_v55 = vpop.f32.mrf.mxu1  ;;  %v4476_v50 = vld [vmem:[%s5047_s6 + $0xaa8] sm:$0xff]  ;;  %v4478_v11 = vld [vmem:[%s5047_s6 + $0xab8] sm:$0xff] }
 0x20e   : > { %1120 = vst [vmem:[%s5566_s23 + $0x328] sm:$0xff] %v953_v52  ;;  %v955_v58 = vadd.f32 %v954_v53, %v5550_v9  ;;  %2176 = vst [vmem:[%s5575_s7 + $0x320] sm:$0xff] %v2048_v17  ;;  %v2049_v21 = vadd.f32 %v1882_v19, %v953_v52  ;;  %v1884_v22 = vadd.f32 %v1883_v55, %v5550_v9  ;;  %v4604_v52 = vld [vmem:[%s5047_s6 + $0xea8] sm:$0xff]  ;;  %v4606_v17 = vld [vmem:[%s5047_s6 + $0xeb8] sm:$0xff] }
 0x20f   : > { %v956_v60 = vpop.f32.mrf.mxu0  ;;  %v1885_v23 = vpop.f32.mrf.mxu1 }
 0x210   : > { %1121 = vst [vmem:[%s5566_s23 + $0x330] sm:$0xff] %v955_v58  ;;  %v957_v24 = vadd.f32 %v956_v60, %v5552_v46  ;;  %2177 = vst [vmem:[%s5575_s7 + $0x328] sm:$0xff] %v2049_v21  ;;  %v2050_v61 = vadd.f32 %v1884_v22, %v955_v58  ;;  %v1886_v62 = vadd.f32 %v1885_v23, %v5552_v46 }
 0x211   : > { %v960_v63 = vpop.f32.mrf.mxu0  ;;  %2738 = vmatmul.mubr.bf16.gmra.mxu0 %v2497_v54  ;;  %v1889_v0 = vpop.f32.mrf.mxu1  ;;  %3668 = vmatmul.mubr.bf16.gmra.mxu1 %v3427_v56  ;;  %v2501_v56 = vpack.c.bf16 %v4473_v10, %v4471_v36  ;;  %v3431_v58 = vpack.c.bf16 %v4601_v49, %v4599_v45  ;;  %v2504_v21 = vpack.c.bf16 %v4478_v11, %v4476_v50  ;;  %v4479_v45 = vld [vmem:[%s5047_s6 + $0xac0] sm:$0xff]  ;;  %v4609_v11 = vld [vmem:[%s5047_s6 + $0xed0] sm:$0xff] }
 0x212   : > { %1122 = vst [vmem:[%s5566_s23 + $0x338] sm:$0xff] %v957_v24  ;;  %v961_v26 = vadd.f32 %v960_v63, %v5550_v9  ;;  %2178 = vst [vmem:[%s5575_s7 + $0x330] sm:$0xff] %v2050_v61  ;;  %v2051_v13 = vadd.f32 %v1886_v62, %v957_v24  ;;  %v1890_v14 = vadd.f32 %v1889_v0, %v5550_v9  ;;  %2747 = vmatprep.mubr.bf16.mxu0 %v2500_v57 }
 0x213   : > { %3677 = vmatprep.mubr.bf16.mxu1 %v3430_v59  ;;  %v962_v3 = vpop.f32.mrf.mxu0  ;;  %v1891_v4 = vpop.f32.mrf.mxu1  ;;  %v3434_v23 = vpack.c.bf16 %v4606_v17, %v4604_v52 }
 0x214   : > { %1123 = vst [vmem:[%s5566_s23 + $0x340] sm:$0xff] %v961_v26  ;;  %v963_v5 = vadd.f32 %v962_v3, %v5552_v46  ;;  %2179 = vst [vmem:[%s5575_s7 + $0x338] sm:$0xff] %v2051_v13  ;;  %v2052_v29 = vadd.f32 %v1890_v14, %v961_v26  ;;  %v1892_v30 = vadd.f32 %v1891_v4, %v5552_v46  ;;  %v4477_v26 = vld [vmem:[%s5047_s6 + $0xab0] sm:$0xff]  ;;  %v4603_v13 = vld [vmem:[%s5047_s6 + $0xea0] sm:$0xff] }
 0x215   : > { %v964_v6 = vpop.f32.mrf.mxu0  ;;  %v1893_v31 = vpop.f32.mrf.mxu1  ;;  %v4480_v3 = vld [vmem:[%s5047_s6 + $0xac8] sm:$0xff]  ;;  %v4482_v4 = vld [vmem:[%s5047_s6 + $0xad8] sm:$0xff] }
 0x216   : > { %1124 = vst [vmem:[%s5566_s23 + $0x348] sm:$0xff] %v963_v5  ;;  %v965_v39 = vadd.f32 %v964_v6, %v5550_v9  ;;  %2180 = vst [vmem:[%s5575_s7 + $0x340] sm:$0xff] %v2052_v29  ;;  %v2053_v40 = vadd.f32 %v1892_v30, %v963_v5  ;;  %v1894_v41 = vadd.f32 %v1893_v31, %v5550_v9  ;;  %v4608_v5 = vld [vmem:[%s5047_s6 + $0xec8] sm:$0xff]  ;;  %v4610_v29 = vld [vmem:[%s5047_s6 + $0xed8] sm:$0xff] }
 0x217   : > { %v966_v7 = vpop.f32.mrf.mxu0  ;;  %v1895_v33 = vpop.f32.mrf.mxu1 }
 0x218   : > { %1125 = vst [vmem:[%s5566_s23 + $0x350] sm:$0xff] %v965_v39  ;;  %v967_v34 = vadd.f32 %v966_v7, %v5552_v46  ;;  %2181 = vst [vmem:[%s5575_s7 + $0x348] sm:$0xff] %v2053_v40  ;;  %v2054_v8 = vadd.f32 %v1894_v41, %v965_v39  ;;  %v1896_v43 = vadd.f32 %v1895_v33, %v5552_v46 }
 0x219   : > { %v970_v35 = vpop.f32.mrf.mxu0  ;;  %2748 = vmatmul.mubr.bf16.gmra.mxu0 %v2499_v20  ;;  %v1899_v44 = vpop.f32.mrf.mxu1  ;;  %3678 = vmatmul.mubr.bf16.gmra.mxu1 %v3429_v32  ;;  %v2503_v32 = vpack.c.bf16 %v4477_v26, %v4475_v25  ;;  %v3433_v39 = vpack.c.bf16 %v4605_v15, %v4603_v13  ;;  %v2506_v40 = vpack.c.bf16 %v4482_v4, %v4480_v3  ;;  %v4483_v13 = vld [vmem:[%s5047_s6 + $0xae0] sm:$0xff]  ;;  %v4613_v4 = vld [vmem:[%s5047_s6 + $0xef0] sm:$0xff] }
 0x21a   : > { %1126 = vst [vmem:[%s5566_s23 + $0x358] sm:$0xff] %v967_v34  ;;  %v971_v47 = vadd.f32 %v970_v35, %v5550_v9  ;;  %2182 = vst [vmem:[%s5575_s7 + $0x350] sm:$0xff] %v2054_v8  ;;  %v2055_v37 = vadd.f32 %v1896_v43, %v967_v34  ;;  %v1900_v48 = vadd.f32 %v1899_v44, %v5550_v9  ;;  %2757 = vmatprep.mubr.bf16.mxu0 %v2502_v38 }
 0x21b   : > { %3687 = vmatprep.mubr.bf16.mxu1 %v3432_v42  ;;  %v972_v12 = vpop.f32.mrf.mxu0  ;;  %v1901_v51 = vpop.f32.mrf.mxu1  ;;  %v3436_v33 = vpack.c.bf16 %v4610_v29, %v4608_v5 }
 0x21c   : > { %1127 = vst [vmem:[%s5566_s23 + $0x360] sm:$0xff] %v971_v47  ;;  %v973_v19 = vadd.f32 %v972_v12, %v5552_v46  ;;  %2183 = vst [vmem:[%s5575_s7 + $0x358] sm:$0xff] %v2055_v37  ;;  %v2056_v53 = vadd.f32 %v1900_v48, %v971_v47  ;;  %v1902_v54 = vadd.f32 %v1901_v51, %v5552_v46  ;;  %v4481_v47 = vld [vmem:[%s5047_s6 + $0xad0] sm:$0xff]  ;;  %v4607_v37 = vld [vmem:[%s5047_s6 + $0xec0] sm:$0xff] }
 0x21d   : > { %v974_v55 = vpop.f32.mrf.mxu0  ;;  %v1903_v57 = vpop.f32.mrf.mxu1  ;;  %v4484_v12 = vld [vmem:[%s5047_s6 + $0xae8] sm:$0xff]  ;;  %v4486_v51 = vld [vmem:[%s5047_s6 + $0xaf8] sm:$0xff] }
 0x21e   : > { %1128 = vst [vmem:[%s5566_s23 + $0x368] sm:$0xff] %v973_v19  ;;  %v975_v22 = vadd.f32 %v974_v55, %v5550_v9  ;;  %2184 = vst [vmem:[%s5575_s7 + $0x360] sm:$0xff] %v2056_v53  ;;  %v2057_v59 = vadd.f32 %v1902_v54, %v973_v19  ;;  %v1904_v60 = vadd.f32 %v1903_v57, %v5550_v9  ;;  %v4612_v19 = vld [vmem:[%s5047_s6 + $0xee8] sm:$0xff]  ;;  %v4614_v53 = vld [vmem:[%s5047_s6 + $0xef8] sm:$0xff] }
 0x21f   : > { %v976_v24 = vpop.f32.mrf.mxu0  ;;  %v1905_v61 = vpop.f32.mrf.mxu1 }
 0x220   : > { %1129 = vst [vmem:[%s5566_s23 + $0x370] sm:$0xff] %v975_v22  ;;  %v977_v62 = vadd.f32 %v976_v24, %v5552_v46  ;;  %2185 = vst [vmem:[%s5575_s7 + $0x368] sm:$0xff] %v2057_v59  ;;  %v2058_v63 = vadd.f32 %v1904_v60, %v975_v22  ;;  %v1906_v0 = vadd.f32 %v1905_v61, %v5552_v46 }
 0x221   : > { %v980_v1 = vpop.f32.mrf.mxu0  ;;  %2758 = vmatmul.mubr.bf16.gmra.mxu0 %v2501_v56  ;;  %v1909_v2 = vpop.f32.mrf.mxu1  ;;  %3688 = vmatmul.mubr.bf16.gmra.mxu1 %v3431_v58  ;;  %v2505_v58 = vpack.c.bf16 %v4481_v47, %v4479_v45  ;;  %v3435_v22 = vpack.c.bf16 %v4609_v11, %v4607_v37  ;;  %v2508_v59 = vpack.c.bf16 %v4486_v51, %v4484_v12  ;;  %v4487_v37 = vld [vmem:[%s5047_s6 + $0xb00] sm:$0xff]  ;;  %v4617_v51 = vld [vmem:[%s5047_s6 + $0xf10] sm:$0xff] }
 0x222   : > { %1130 = vst [vmem:[%s5566_s23 + $0x378] sm:$0xff] %v977_v62  ;;  %v981_v14 = vadd.f32 %v980_v1, %v5550_v9  ;;  %2186 = vst [vmem:[%s5575_s7 + $0x370] sm:$0xff] %v2058_v63  ;;  %v2059_v27 = vadd.f32 %v1906_v0, %v977_v62  ;;  %v1910_v28 = vadd.f32 %v1909_v2, %v5550_v9  ;;  %2767 = vmatprep.mubr.bf16.mxu0 %v2504_v21 }
 0x223   : > { %3697 = vmatprep.mubr.bf16.mxu1 %v3434_v23  ;;  %v982_v16 = vpop.f32.mrf.mxu0  ;;  %v1911_v18 = vpop.f32.mrf.mxu1  ;;  %v3438_v61 = vpack.c.bf16 %v4614_v53, %v4612_v19 }
 0x224   : > { %1131 = vst [vmem:[%s5566_s23 + $0x380] sm:$0xff] %v981_v14  ;;  %v983_v30 = vadd.f32 %v982_v16, %v5552_v46  ;;  %2187 = vst [vmem:[%s5575_s7 + $0x378] sm:$0xff] %v2059_v27  ;;  %v2060_v6 = vadd.f32 %v1910_v28, %v981_v14  ;;  %v1912_v20 = vadd.f32 %v1911_v18, %v5552_v46  ;;  %v4485_v14 = vld [vmem:[%s5047_s6 + $0xaf0] sm:$0xff]  ;;  %v4611_v27 = vld [vmem:[%s5047_s6 + $0xee0] sm:$0xff] }
 0x225   : > { %v984_v31 = vpop.f32.mrf.mxu0  ;;  %v1913_v38 = vpop.f32.mrf.mxu1  ;;  %v4488_v16 = vld [vmem:[%s5047_s6 + $0xb08] sm:$0xff]  ;;  %v4490_v18 = vld [vmem:[%s5047_s6 + $0xb18] sm:$0xff] }
 0x226   : > { %1132 = vst [vmem:[%s5566_s23 + $0x388] sm:$0xff] %v983_v30  ;;  %v985_v41 = vadd.f32 %v984_v31, %v5550_v9  ;;  %2188 = vst [vmem:[%s5575_s7 + $0x380] sm:$0xff] %v2060_v6  ;;  %v2061_v42 = vadd.f32 %v1912_v20, %v983_v30  ;;  %v1914_v7 = vadd.f32 %v1913_v38, %v5550_v9  ;;  %v4616_v30 = vld [vmem:[%s5047_s6 + $0xf08] sm:$0xff]  ;;  %v4618_v6 = vld [vmem:[%s5047_s6 + $0xf18] sm:$0xff] }
 0x227   : > { %v986_v34 = vpop.f32.mrf.mxu0  ;;  %v1915_v8 = vpop.f32.mrf.mxu1 }
 0x228   : > { %1133 = vst [vmem:[%s5566_s23 + $0x390] sm:$0xff] %v985_v41  ;;  %v987_v43 = vadd.f32 %v986_v34, %v5552_v46  ;;  %2189 = vst [vmem:[%s5575_s7 + $0x388] sm:$0xff] %v2061_v42  ;;  %v2062_v35 = vadd.f32 %v1914_v7, %v985_v41  ;;  %v1916_v44 = vadd.f32 %v1915_v8, %v5552_v46 }
 0x229   : > { %v990_v36 = vpop.f32.mrf.mxu0  ;;  %2768 = vmatmul.mubr.bf16.gmra.mxu0 %v2503_v32  ;;  %v1919_v10 = vpop.f32.mrf.mxu1  ;;  %3698 = vmatmul.mubr.bf16.gmra.mxu1 %v3433_v39  ;;  %v2507_v39 = vpack.c.bf16 %v4485_v14, %v4483_v13  ;;  %v3437_v41 = vpack.c.bf16 %v4613_v4, %v4611_v27  ;;  %v2510_v42 = vpack.c.bf16 %v4490_v18, %v4488_v16  ;;  %v4491_v27 = vld [vmem:[%s5047_s6 + $0xb20] sm:$0xff]  ;;  %v4621_v18 = vld [vmem:[%s5047_s6 + $0xf30] sm:$0xff] }
 0x22a   : > { %1134 = vst [vmem:[%s5566_s23 + $0x398] sm:$0xff] %v987_v43  ;;  %v991_v48 = vadd.f32 %v990_v36, %v5550_v9  ;;  %2190 = vst [vmem:[%s5575_s7 + $0x390] sm:$0xff] %v2062_v35  ;;  %v2063_v49 = vadd.f32 %v1916_v44, %v987_v43  ;;  %v1920_v50 = vadd.f32 %v1919_v10, %v5550_v9  ;;  %2777 = vmatprep.mubr.bf16.mxu0 %v2506_v40 }
 0x22b   : > { %3707 = vmatprep.mubr.bf16.mxu1 %v3436_v33  ;;  %v992_v52 = vpop.f32.mrf.mxu0  ;;  %v1921_v17 = vpop.f32.mrf.mxu1  ;;  %v3440_v8 = vpack.c.bf16 %v4618_v6, %v4616_v30  ;;  %v2204_v30 = vld [vmem:[%s5575_s7] sm:$0xff] }
 0x22c   : > { %1135 = vst [vmem:[%s5566_s23 + $0x3a0] sm:$0xff] %v991_v48  ;;  %v993_v54 = vadd.f32 %v992_v52, %v5552_v46  ;;  %2191 = vst [vmem:[%s5575_s7 + $0x398] sm:$0xff] %v2063_v49  ;;  %v2064_v55 = vadd.f32 %v1920_v50, %v991_v48  ;;  %v1922_v56 = vadd.f32 %v1921_v17, %v5552_v46  ;;  %v4489_v48 = vld [vmem:[%s5047_s6 + $0xb10] sm:$0xff]  ;;  %v4615_v49 = vld [vmem:[%s5047_s6 + $0xf00] sm:$0xff] }
 0x22d   : > { %v994_v57 = vpop.f32.mrf.mxu0  ;;  %v1923_v21 = vpop.f32.mrf.mxu1  ;;  %v4492_v52 = vld [vmem:[%s5047_s6 + $0xb28] sm:$0xff]  ;;  %v4494_v17 = vld [vmem:[%s5047_s6 + $0xb38] sm:$0xff] }
 0x22e   : > { %1136 = vst [vmem:[%s5566_s23 + $0x3a8] sm:$0xff] %v993_v54  ;;  %v995_v60 = vadd.f32 %v994_v57, %v5550_v9  ;;  %2192 = vst [vmem:[%s5575_s7 + $0x3a0] sm:$0xff] %v2064_v55  ;;  %v2065_v23 = vadd.f32 %v1922_v56, %v993_v54  ;;  %v1924_v24 = vadd.f32 %v1923_v21, %v5550_v9  ;;  %v4620_v54 = vld [vmem:[%s5047_s6 + $0xf28] sm:$0xff]  ;;  %v4622_v55 = vld [vmem:[%s5047_s6 + $0xf38] sm:$0xff] }
 0x22f   : > { %v996_v62 = vpop.f32.mrf.mxu0  ;;  %v1925_v63 = vpop.f32.mrf.mxu1 }
 0x230   : > { %1137 = vst [vmem:[%s5566_s23 + $0x3b0] sm:$0xff] %v995_v60  ;;  %v997_v0 = vadd.f32 %v996_v62, %v5552_v46  ;;  %2193 = vst [vmem:[%s5575_s7 + $0x3a8] sm:$0xff] %v2065_v23  ;;  %v2066_v1 = vadd.f32 %v1924_v24, %v995_v60  ;;  %v1926_v2 = vadd.f32 %v1925_v63, %v5552_v46 }
 0x231   : > { %v1000_v25 = vpop.f32.mrf.mxu0  ;;  %2778 = vmatmul.mubr.bf16.gmra.mxu0 %v2505_v58  ;;  %v1929_v26 = vpop.f32.mrf.mxu1  ;;  %3708 = vmatmul.mubr.bf16.gmra.mxu1 %v3435_v22  ;;  %v2509_v22 = vpack.c.bf16 %v4489_v48, %v4487_v37  ;;  %v3439_v60 = vpack.c.bf16 %v4617_v51, %v4615_v49  ;;  %v2512_v23 = vpack.c.bf16 %v4494_v17, %v4492_v52  ;;  %v2207_v48 = vld [vmem:[%s5575_s7 + $0x18] sm:$0xff] }
 0x232   : > { %1138 = vst [vmem:[%s5566_s23 + $0x3b8] sm:$0xff] %v997_v0  ;;  %v1001_v28 = vadd.f32 %v1000_v25, %v5550_v9  ;;  %2194 = vst [vmem:[%s5575_s7 + $0x3b0] sm:$0xff] %v2066_v1  ;;  %v2067_v15 = vadd.f32 %v1926_v2, %v997_v0  ;;  %v1930_v3 = vadd.f32 %v1929_v26, %v5550_v9  ;;  %2787 = vmatprep.mubr.bf16.mxu0 %v2508_v59  ;;  %v4495_v17 = vld [vmem:[%s5047_s6 + $0xb40] sm:$0xff] }
 0x233   : > { %3717 = vmatprep.mubr.bf16.mxu1 %v3438_v61  ;;  %v1002_v5 = vpop.f32.mrf.mxu0  ;;  %v1931_v29 = vpop.f32.mrf.mxu1  ;;  %v3442_v63 = vpack.c.bf16 %v4622_v55, %v4620_v54 }
 0x234   : > { %1139 = vst [vmem:[%s5566_s23 + $0x3c0] sm:$0xff] %v1001_v28  ;;  %v1003_v20 = vadd.f32 %v1002_v5, %v5552_v46  ;;  %2195 = vst [vmem:[%s5575_s7 + $0x3b8] sm:$0xff] %v2067_v15  ;;  %v2068_v31 = vadd.f32 %v1930_v3, %v1001_v28  ;;  %v1932_v32 = vadd.f32 %v1931_v29, %v5552_v46  ;;  %v4493_v28 = vld [vmem:[%s5047_s6 + $0xb30] sm:$0xff]  ;;  %v4619_v15 = vld [vmem:[%s5047_s6 + $0xf20] sm:$0xff] }
 0x235   : > { %v1004_v38 = vpop.f32.mrf.mxu0  ;;  %v1933_v40 = vpop.f32.mrf.mxu1  ;;  %v4496_v5 = vld [vmem:[%s5047_s6 + $0xb48] sm:$0xff]  ;;  %v4498_v29 = vld [vmem:[%s5047_s6 + $0xb58] sm:$0xff] }
 0x236   : > { %1140 = vst [vmem:[%s5566_s23 + $0x3c8] sm:$0xff] %v1003_v20  ;;  %v1005_v7 = vadd.f32 %v1004_v38, %v5550_v9  ;;  %2196 = vst [vmem:[%s5575_s7 + $0x3c0] sm:$0xff] %v2068_v31  ;;  %v2069_v33 = vadd.f32 %v1932_v32, %v1003_v20  ;;  %v1934_v34 = vadd.f32 %v1933_v40, %v5550_v9  ;;  %v4624_v38 = vld [vmem:[%s5047_s6 + $0xf48] sm:$0xff] }
 0x237   : > { %v1006_v43 = vpop.f32.mrf.mxu0  ;;  %v1935_v35 = vpop.f32.mrf.mxu1  ;;  %v2205_v40 = vld [vmem:[%s5575_s7 + $0x8] sm:$0xff] }
 0x238   : > { %1141 = vst [vmem:[%s5566_s23 + $0x3d0] sm:$0xff] %v1005_v7  ;;  %v1007_v44 = vadd.f32 %v1006_v43, %v5552_v46  ;;  %2197 = vst [vmem:[%s5575_s7 + $0x3c8] sm:$0xff] %v2069_v33  ;;  %v2070_v36 = vadd.f32 %v1934_v34, %v1005_v7  ;;  %v1936_v10 = vadd.f32 %v1935_v35, %v5552_v46 }
 0x239   : > { %v1010_v45 = vpop.f32.mrf.mxu0  ;;  %2788 = vmatmul.mubr.bf16.gmra.mxu0 %v2507_v39  ;;  %v1939_v47 = vpop.f32.mrf.mxu1  ;;  %3718 = vmatmul.mubr.bf16.gmra.mxu1 %v3437_v41  ;;  %v4626_v39 = vld [vmem:[%s5047_s6 + $0xf58] sm:$0xff]  ;;  %v3441_v33 = vpack.c.bf16 %v4621_v18, %v4619_v15  ;;  %v2514_v34 = vpack.c.bf16 %v4498_v29, %v4496_v5 }
 0x23a   : > { %1142 = vst [vmem:[%s5566_s23 + $0x3d8] sm:$0xff] %v1007_v44  ;;  %v1011_v50 = vadd.f32 %v1010_v45, %v5550_v9  ;;  %2198 = vst [vmem:[%s5575_s7 + $0x3d0] sm:$0xff] %v2070_v36  ;;  %v2071_v11 = vadd.f32 %v1936_v10, %v1007_v44  ;;  %v1940_v12 = vadd.f32 %v1939_v47, %v5550_v9  ;;  %2797 = vmatprep.mubr.bf16.mxu0 %v2510_v42  ;;  %v2206_v36 = vld [vmem:[%s5575_s7 + $0x10] sm:$0xff] }
 0x23b   : > { %3727 = vmatprep.mubr.bf16.mxu1 %v3440_v8  ;;  %v1012_v19 = vpop.f32.mrf.mxu0  ;;  %v1941_v53 = vpop.f32.mrf.mxu1  ;;  %v2511_v42 = vpack.c.bf16 %v4493_v28, %v4491_v27  ;;  %v3444_v47 = vpack.c.bf16 %v4626_v39, %v4624_v38 }
 0x23c   : > { %1143 = vst [vmem:[%s5566_s23 + $0x3e0] sm:$0xff] %v1011_v50  ;;  %v1013_v56 = vadd.f32 %v1012_v19, %v5552_v46  ;;  %2199 = vst [vmem:[%s5575_s7 + $0x3d8] sm:$0xff] %v2071_v11  ;;  %v2072_v57 = vadd.f32 %v1940_v12, %v1011_v50  ;;  %v1942_v58 = vadd.f32 %v1941_v53, %v5552_v46  ;;  %v4497_v19 = vld [vmem:[%s5047_s6 + $0xb50] sm:$0xff]  ;;  %v4623_v53 = vld [vmem:[%s5047_s6 + $0xf40] sm:$0xff] }
 0x23d   : > { %v1014_v21 = vpop.f32.mrf.mxu0  ;;  %v1943_v59 = vpop.f32.mrf.mxu1 }
 0x23e   : > { %1144 = vst [vmem:[%s5566_s23 + $0x3e8] sm:$0xff] %v1013_v56  ;;  %v1015_v24 = vadd.f32 %v1014_v21, %v5550_v9  ;;  %2200 = vst [vmem:[%s5575_s7 + $0x3e0] sm:$0xff] %v2072_v57  ;;  %v2073_v61 = vadd.f32 %v1942_v58, %v1013_v56  ;;  %v1944_v62 = vadd.f32 %v1943_v59, %v5550_v9  ;;  %v4625_v58 = vld [vmem:[%s5047_s6 + $0xf50] sm:$0xff]  ;;  %v4500_v21 = vld [vmem:[%s5047_s6 + $0xb68] sm:$0xff] }
 0x23f   : > { %v1016_v0 = vpop.f32.mrf.mxu0  ;;  %v1945_v1 = vpop.f32.mrf.mxu1  ;;  %v2208_v59 = vld [vmem:[%s5575_s7 + $0x20] sm:$0xff] }
 0x240   : > { %1145 = vst [vmem:[%s5566_s23 + $0x3f0] sm:$0xff] %v1015_v24  ;;  %v1017_v2 = vadd.f32 %v1016_v0, %v5552_v46  ;;  %2201 = vst [vmem:[%s5575_s7 + $0x3e8] sm:$0xff] %v2073_v61  ;;  %v2074_v25 = vadd.f32 %v1944_v62, %v1015_v24  ;;  %v1946_v26 = vadd.f32 %v1945_v1, %v5552_v46  ;;  %v4630_v0 = vld [vmem:[%s5047_s6 + $0xf78] sm:$0xff]  ;;  %v2209_v1 = vld [vmem:[%s5575_s7 + $0x28] sm:$0xff] }
 0x241   : > { %v2559_v13 = vpop.f32.mrf.mxu0  ;;  %2798 = vmatmul.mubr.bf16.gmra.mxu0 %v2509_v22  ;;  %v3489_v14 = vpop.f32.mrf.mxu1  ;;  %3728 = vmatmul.mubr.bf16.gmra.mxu1 %v3439_v60  ;;  %v4502_v22 = vld [vmem:[%s5047_s6 + $0xb78] sm:$0xff] }
 0x242   : > { %1146 = vst [vmem:[%s5566_s23 + $0x3f8] sm:$0xff] %v1017_v2  ;;  %v2560_v3 = vadd.f32 %v2559_v13, %v5550_v9  ;;  %2202 = vst [vmem:[%s5575_s7 + $0x3f0] sm:$0xff] %v2074_v25  ;;  %v2075_v4 = vadd.f32 %v1946_v26, %v1017_v2  ;;  %v3490_v16 = vadd.f32 %v3489_v14, %v5550_v9  ;;  %2807 = vmatprep.mubr.bf16.mxu0 %v2512_v23 }
 0x243   : > { %3737 = vmatprep.mubr.bf16.mxu1 %v3442_v63  ;;  %v2561_v6 = vpop.f32.mrf.mxu0  ;;  %v3491_v20 = vpop.f32.mrf.mxu1  ;;  %v4628_v63 = vld [vmem:[%s5047_s6 + $0xf68] sm:$0xff]  ;;  %v2513_v25 = vpack.c.bf16 %v4497_v19, %v4495_v17  ;;  %v3443_v13 = vpack.c.bf16 %v4625_v58, %v4623_v53  ;;  %v2516_v14 = vpack.c.bf16 %v4502_v22, %v4500_v21 }
 0x244   : > { %v2878_v31 = vadd.f32 %v2560_v3, %v2204_v30  ;;  %v2562_v32 = vadd.f32 %v2561_v6, %v5552_v46  ;;  %2203 = vst [vmem:[%s5575_s7 + $0x3f8] sm:$0xff] %v2075_v4  ;;  %v3492_v44 = vadd.f32 %v3491_v20, %v5552_v46  ;;  %v2210_v4 = vld [vmem:[%s5575_s7 + $0x30] sm:$0xff]  ;;  %v3446_v5 = vpack.c.bf16 %v4630_v0, %v4628_v63  ;;  %v2211_v30 = vld [vmem:[%s5575_s7 + $0x38] sm:$0xff] }
 0x245   : > { %v2563_v41 = vpop.f32.mrf.mxu0  ;;  %v3493_v7 = vpop.f32.mrf.mxu1 }
 0x246   : > { %v2879_v8 = vadd.f32 %v2562_v32, %v2205_v40  ;;  %v2564_v43 = vadd.f32 %v2563_v41, %v5550_v9  ;;  %v3808_v35 = vadd.f32 %v3490_v16, %v2878_v31  ;;  %v3494_v11 = vadd.f32 %v3493_v7, %v5550_v9  ;;  %v4499_v40 = vld [vmem:[%s5047_s6 + $0xb60] sm:$0xff]  ;;  %v4501_v41 = vld [vmem:[%s5047_s6 + $0xb70] sm:$0xff] }
 0x247   : > { %v2565_v10 = vpop.f32.mrf.mxu0  ;;  %v3495_v45 = vpop.f32.mrf.mxu1 }
 0x248   : > { %v2880_v37 = vadd.f32 %v2564_v43, %v2206_v36  ;;  %3936 = vst [vmem:[%s5575_s7] sm:$0xff] %v3808_v35  ;;  %v2566_v49 = vadd.f32 %v2565_v10, %v5552_v46  ;;  %v3809_v50 = vadd.f32 %v3492_v44, %v2879_v8  ;;  %v3496_v51 = vadd.f32 %v3495_v45, %v5552_v46  ;;  %v4629_v43 = vld [vmem:[%s5047_s6 + $0xf70] sm:$0xff]  ;;  %v4504_v35 = vld [vmem:[%s5047_s6 + $0xb88] sm:$0xff]  ;;  %v4506_v44 = vld [vmem:[%s5047_s6 + $0xb98] sm:$0xff] }
 0x249   : > { %v2569_v12 = vpop.f32.mrf.mxu0  ;;  %2808 = vmatmul.mubr.bf16.gmra.mxu0 %v2511_v42  ;;  %v3499_v52 = vpop.f32.mrf.mxu1  ;;  %3738 = vmatmul.mubr.bf16.gmra.mxu1 %v3441_v33  ;;  %v4627_v42 = vld [vmem:[%s5047_s6 + $0xf60] sm:$0xff]  ;;  %v2518_v19 = vpack.c.bf16 %v4506_v44, %v4504_v35 }
 0x24a   : > { %v2881_v54 = vadd.f32 %v2566_v49, %v2207_v48  ;;  %3937 = vst [vmem:[%s5575_s7 + $0x8] sm:$0xff] %v3809_v50  ;;  %v2570_v55 = vadd.f32 %v2569_v12, %v5550_v9  ;;  %v3810_v56 = vadd.f32 %v3494_v11, %v2880_v37  ;;  %v3500_v57 = vadd.f32 %v3499_v52, %v5550_v9  ;;  %v2212_v36 = vld [vmem:[%s5575_s7 + $0x40] sm:$0xff]  ;;  %v4634_v50 = vld [vmem:[%s5047_s6 + $0xf98] sm:$0xff]  ;;  %v2213_v11 = vld [vmem:[%s5575_s7 + $0x48] sm:$0xff] }
 0x24b   : > { %2817 = vmatprep.mubr.bf16.mxu0 %v2514_v34  ;;  %v2571_v60 = vpop.f32.mrf.mxu0  ;;  %v3501_v23 = vpop.f32.mrf.mxu1  ;;  %3747 = vmatprep.mubr.bf16.mxu1 %v3444_v47  ;;  %v4632_v49 = vld [vmem:[%s5047_s6 + $0xf88] sm:$0xff]  ;;  %v3445_v17 = vpack.c.bf16 %v4629_v43, %v4627_v42 }
 0x24c   : > { %v2882_v24 = vadd.f32 %v2570_v55, %v2208_v59  ;;  %3938 = vst [vmem:[%s5575_s7 + $0x10] sm:$0xff] %v3810_v56  ;;  %v2572_v61 = vadd.f32 %v2571_v60, %v5552_v46  ;;  %v3811_v62 = vadd.f32 %v3496_v51, %v2881_v54  ;;  %v3502_v3 = vadd.f32 %v3501_v23, %v5552_v46  ;;  %v2215_v60 = vld [vmem:[%s5575_s7 + $0x58] sm:$0xff] }
 0x24d   : > { %v2573_v2 = vpop.f32.mrf.mxu0  ;;  %v3503_v26 = vpop.f32.mrf.mxu1  ;;  %v2515_v51 = vpack.c.bf16 %v4501_v41, %v4499_v40  ;;  %v3448_v22 = vpack.c.bf16 %v4634_v50, %v4632_v49 }
 0x24e   : > { %v2883_v27 = vadd.f32 %v2572_v61, %v2209_v1  ;;  %3939 = vst [vmem:[%s5575_s7 + $0x18] sm:$0xff] %v3811_v62  ;;  %v2574_v28 = vadd.f32 %v2573_v2, %v5550_v9  ;;  %v3812_v15 = vadd.f32 %v3500_v57, %v2882_v24  ;;  %v3504_v31 = vadd.f32 %v3503_v26, %v5550_v9  ;;  %v2214_v57 = vld [vmem:[%s5575_s7 + $0x50] sm:$0xff]  ;;  %v4503_v1 = vld [vmem:[%s5047_s6 + $0xb80] sm:$0xff] }
 0x24f   : > { %v2575_v16 = vpop.f32.mrf.mxu0  ;;  %v3505_v18 = vpop.f32.mrf.mxu1  ;;  %v4505_v2 = vld [vmem:[%s5047_s6 + $0xb90] sm:$0xff] }
 0x250   : > { %v2884_v29 = vadd.f32 %v2574_v28, %v2210_v4  ;;  %3940 = vst [vmem:[%s5575_s7 + $0x20] sm:$0xff] %v3812_v15  ;;  %v2576_v6 = vadd.f32 %v2575_v16, %v5552_v46  ;;  %v3813_v20 = vadd.f32 %v3502_v3, %v2883_v27  ;;  %v3506_v38 = vadd.f32 %v3505_v18, %v5552_v46  ;;  %v4633_v28 = vld [vmem:[%s5047_s6 + $0xf90] sm:$0xff]  ;;  %v4508_v15 = vld [vmem:[%s5047_s6 + $0xba8] sm:$0xff]  ;;  %v4510_v3 = vld [vmem:[%s5047_s6 + $0xbb8] sm:$0xff] }
 0x251   : > { %v2579_v32 = vpop.f32.mrf.mxu0  ;;  %2818 = vmatmul.mubr.bf16.gmra.mxu0 %v2513_v25  ;;  %v3509_v39 = vpop.f32.mrf.mxu1  ;;  %3748 = vmatmul.mubr.bf16.gmra.mxu1 %v3443_v13  ;;  %v4631_v25 = vld [vmem:[%s5047_s6 + $0xf80] sm:$0xff]  ;;  %v2520_v41 = vpack.c.bf16 %v4510_v3, %v4508_v15 }
 0x252   : > { %v2885_v7 = vadd.f32 %v2576_v6, %v2211_v30  ;;  %3941 = vst [vmem:[%s5575_s7 + $0x28] sm:$0xff] %v3813_v20  ;;  %v2580_v33 = vadd.f32 %v2579_v32, %v5550_v9  ;;  %v3814_v34 = vadd.f32 %v3504_v31, %v2884_v29  ;;  %v3510_v8 = vadd.f32 %v3509_v39, %v5550_v9  ;;  %v2216_v4 = vld [vmem:[%s5575_s7 + $0x60] sm:$0xff]  ;;  %v4638_v20 = vld [vmem:[%s5047_s6 + $0xfb8] sm:$0xff]  ;;  %v2217_v31 = vld [vmem:[%s5575_s7 + $0x68] sm:$0xff] }
 0x253   : > { %2827 = vmatprep.mubr.bf16.mxu0 %v2516_v14  ;;  %v2581_v10 = vpop.f32.mrf.mxu0  ;;  %v3511_v45 = vpop.f32.mrf.mxu1  ;;  %3757 = vmatprep.mubr.bf16.mxu1 %v3446_v5  ;;  %v4636_v6 = vld [vmem:[%s5047_s6 + $0xfa8] sm:$0xff]  ;;  %v3447_v40 = vpack.c.bf16 %v4633_v28, %v4631_v25 }
 0x254   : > { %v2886_v47 = vadd.f32 %v2580_v33, %v2212_v36  ;;  %3942 = vst [vmem:[%s5575_s7 + $0x30] sm:$0xff] %v3814_v34  ;;  %v2582_v37 = vadd.f32 %v2581_v10, %v5552_v46  ;;  %v3815_v48 = vadd.f32 %v3506_v38, %v2885_v7  ;;  %v3512_v56 = vadd.f32 %v3511_v45, %v5552_v46  ;;  %v2219_v10 = vld [vmem:[%s5575_s7 + $0x78] sm:$0xff] }
 0x255   : > { %v2583_v12 = vpop.f32.mrf.mxu0  ;;  %v3513_v52 = vpop.f32.mrf.mxu1  ;;  %v2517_v38 = vpack.c.bf16 %v4505_v2, %v4503_v1  ;;  %v3450_v44 = vpack.c.bf16 %v4638_v20, %v4636_v6 }
 0x256   : > { %v2887_v53 = vadd.f32 %v2582_v37, %v2213_v11  ;;  %3943 = vst [vmem:[%s5575_s7 + $0x38] sm:$0xff] %v3815_v48  ;;  %v2584_v54 = vadd.f32 %v2583_v12, %v5550_v9  ;;  %v3816_v55 = vadd.f32 %v3510_v8, %v2886_v47  ;;  %v3514_v61 = vadd.f32 %v3513_v52, %v5550_v9  ;;  %v2218_v8 = vld [vmem:[%s5575_s7 + $0x70] sm:$0xff]  ;;  %v4507_v11 = vld [vmem:[%s5047_s6 + $0xba0] sm:$0xff] }
 0x257   : > { %v2585_v58 = vpop.f32.mrf.mxu0  ;;  %v3515_v21 = vpop.f32.mrf.mxu1  ;;  %v4509_v12 = vld [vmem:[%s5047_s6 + $0xbb0] sm:$0xff] }
 0x258   : > { %v2888_v59 = vadd.f32 %v2584_v54, %v2214_v57  ;;  %3944 = vst [vmem:[%s5575_s7 + $0x40] sm:$0xff] %v3816_v55  ;;  %v2586_v23 = vadd.f32 %v2585_v58, %v5552_v46  ;;  %v3817_v24 = vadd.f32 %v3512_v56, %v2887_v53  ;;  %v3516_v63 = vadd.f32 %v3515_v21, %v5552_v46  ;;  %v4637_v54 = vld [vmem:[%s5047_s6 + $0xfb0] sm:$0xff]  ;;  %v4512_v55 = vld [vmem:[%s5047_s6 + $0xbc8] sm:$0xff]  ;;  %v4514_v56 = vld [vmem:[%s5047_s6 + $0xbd8] sm:$0xff] }
 0x259   : > { %v2589_v62 = vpop.f32.mrf.mxu0  ;;  %2828 = vmatmul.mubr.bf16.gmra.mxu0 %v2515_v51  ;;  %v3519_v0 = vpop.f32.mrf.mxu1  ;;  %3758 = vmatmul.mubr.bf16.gmra.mxu1 %v3445_v17  ;;  %v4635_v51 = vld [vmem:[%s5047_s6 + $0xfa0] sm:$0xff]  ;;  %v2522_v2 = vpack.c.bf16 %v4514_v56, %v4512_v55 }
 0x25a   : > { %v2889_v26 = vadd.f32 %v2586_v23, %v2215_v60  ;;  %3945 = vst [vmem:[%s5575_s7 + $0x48] sm:$0xff] %v3817_v24  ;;  %v2590_v13 = vadd.f32 %v2589_v62, %v5550_v9  ;;  %v3818_v14 = vadd.f32 %v3514_v61, %v2888_v59  ;;  %v3520_v27 = vadd.f32 %v3519_v0, %v5550_v9  ;;  %v2220_v57 = vld [vmem:[%s5575_s7 + $0x80] sm:$0xff]  ;;  %v4642_v24 = vld [vmem:[%s5047_s6 + $0xfd8] sm:$0xff]  ;;  %v2221_v61 = vld [vmem:[%s5575_s7 + $0x88] sm:$0xff] }
 0x25b   : > { %2837 = vmatprep.mubr.bf16.mxu0 %v2518_v19  ;;  %v2591_v16 = vpop.f32.mrf.mxu0  ;;  %v3521_v18 = vpop.f32.mrf.mxu1  ;;  %3767 = vmatprep.mubr.bf16.mxu1 %v3448_v22  ;;  %v4640_v23 = vld [vmem:[%s5047_s6 + $0xfc8] sm:$0xff]  ;;  %v3449_v1 = vpack.c.bf16 %v4637_v54, %v4635_v51 }
 0x25c   : > { %v2890_v5 = vadd.f32 %v2590_v13, %v2216_v4  ;;  %3946 = vst [vmem:[%s5575_s7 + $0x50] sm:$0xff] %v3818_v14  ;;  %v2592_v29 = vadd.f32 %v2591_v16, %v5552_v46  ;;  %v3819_v30 = vadd.f32 %v3516_v63, %v2889_v26  ;;  %v3522_v34 = vadd.f32 %v3521_v18, %v5552_v46  ;;  %v2223_v16 = vld [vmem:[%s5575_s7 + $0x98] sm:$0xff] }
 0x25d   : > { %v2593_v32 = vpop.f32.mrf.mxu0  ;;  %v3523_v39 = vpop.f32.mrf.mxu1  ;;  %v2519_v63 = vpack.c.bf16 %v4509_v12, %v4507_v11  ;;  %v3452_v3 = vpack.c.bf16 %v4642_v24, %v4640_v23 }
 0x25e   : > { %v2891_v42 = vadd.f32 %v2592_v29, %v2217_v31  ;;  %3947 = vst [vmem:[%s5575_s7 + $0x58] sm:$0xff] %v3819_v30  ;;  %v2594_v7 = vadd.f32 %v2593_v32, %v5550_v9  ;;  %v3820_v33 = vadd.f32 %v3520_v27, %v2890_v5  ;;  %v3524_v37 = vadd.f32 %v3523_v39, %v5550_v9  ;;  %v2222_v27 = vld [vmem:[%s5575_s7 + $0x90] sm:$0xff]  ;;  %v4511_v31 = vld [vmem:[%s5047_s6 + $0xbc0] sm:$0xff] }
 0x25f   : > { %v2595_v43 = vpop.f32.mrf.mxu0  ;;  %v3525_v35 = vpop.f32.mrf.mxu1  ;;  %v4513_v32 = vld [vmem:[%s5047_s6 + $0xbd0] sm:$0xff] }
 0x260   : > { %v2892_v36 = vadd.f32 %v2594_v7, %v2218_v8  ;;  %3948 = vst [vmem:[%s5575_s7 + $0x60] sm:$0xff] %v3820_v33  ;;  %v2596_v45 = vadd.f32 %v2595_v43, %v5552_v46  ;;  %v3821_v47 = vadd.f32 %v3522_v34, %v2891_v42  ;;  %v3526_v49 = vadd.f32 %v3525_v35, %v5552_v46  ;;  %v4641_v7 = vld [vmem:[%s5047_s6 + $0xfd0] sm:$0xff]  ;;  %v4516_v33 = vld [vmem:[%s5047_s6 + $0xbe8] sm:$0xff]  ;;  %v4518_v34 = vld [vmem:[%s5047_s6 + $0xbf8] sm:$0xff] }
 0x261   : > { %v2599_v48 = vpop.f32.mrf.mxu0  ;;  %2838 = vmatmul.mubr.bf16.gmra.mxu0 %v2517_v38  ;;  %v3529_v50 = vpop.f32.mrf.mxu1  ;;  %3768 = vmatmul.mubr.bf16.gmra.mxu1 %v3447_v40  ;;  %v4639_v38 = vld [vmem:[%s5047_s6 + $0xfc0] sm:$0xff]  ;;  %v2524_v12 = vpack.c.bf16 %v4518_v34, %v4516_v33 }
 0x262   : > { %v2893_v52 = vadd.f32 %v2596_v45, %v2219_v10  ;;  %3949 = vst [vmem:[%s5575_s7 + $0x68] sm:$0xff] %v3821_v47  ;;  %v2600_v17 = vadd.f32 %v2599_v48, %v5550_v9  ;;  %v3822_v19 = vadd.f32 %v3524_v37, %v2892_v36  ;;  %v3530_v53 = vadd.f32 %v3529_v50, %v5550_v9  ;;  %v2224_v8 = vld [vmem:[%s5575_s7 + $0xa0] sm:$0xff]  ;;  %v4646_v47 = vld [vmem:[%s5047_s6 + $0xff8] sm:$0xff]  ;;  %v2225_v37 = vld [vmem:[%s5575_s7 + $0xa8] sm:$0xff] }
 0x263   : > { %2847 = vmatprep.mubr.bf16.mxu0 %v2520_v41  ;;  %v2601_v58 = vpop.f32.mrf.mxu0  ;;  %v3531_v21 = vpop.f32.mrf.mxu1  ;;  %3777 = vmatprep.mubr.bf16.mxu1 %v3450_v44  ;;  %v4644_v45 = vld [vmem:[%s5047_s6 + $0xfe8] sm:$0xff]  ;;  %v3451_v11 = vpack.c.bf16 %v4641_v7, %v4639_v38  ;;  %v2231_v33 = vld [vmem:[%s5575_s7 + $0xd8] sm:$0xff] }
 0x264   : > { %v2894_v22 = vadd.f32 %v2600_v17, %v2220_v57  ;;  %3950 = vst [vmem:[%s5575_s7 + $0x70] sm:$0xff] %v3822_v19  ;;  %v2602_v59 = vadd.f32 %v2601_v58, %v5552_v46  ;;  %v3823_v60 = vadd.f32 %v3526_v49, %v2893_v52  ;;  %v3532_v14 = vadd.f32 %v3531_v21, %v5552_v46 }
 0x265   : > { %v2603_v62 = vpop.f32.mrf.mxu0  ;;  %v3533_v0 = vpop.f32.mrf.mxu1  ;;  %v2521_v49 = vpack.c.bf16 %v4513_v32, %v4511_v31  ;;  %v3454_v56 = vpack.c.bf16 %v4646_v47, %v4644_v45  ;;  %v2230_v32 = vld [vmem:[%s5575_s7 + $0xd0] sm:$0xff]  ;;  %v2232_v45 = vld [vmem:[%s5575_s7 + $0xe0] sm:$0xff] }
 0x266   : > { %v2895_v25 = vadd.f32 %v2602_v59, %v2221_v61  ;;  %3951 = vst [vmem:[%s5575_s7 + $0x78] sm:$0xff] %v3823_v60  ;;  %v2604_v26 = vadd.f32 %v2603_v62, %v5550_v9  ;;  %v3824_v13 = vadd.f32 %v3530_v53, %v2894_v22  ;;  %v3534_v29 = vadd.f32 %v3533_v0, %v5550_v9  ;;  %v2226_v53 = vld [vmem:[%s5575_s7 + $0xb0] sm:$0xff]  ;;  %v2227_v59 = vld [vmem:[%s5575_s7 + $0xb8] sm:$0xff] }
 0x267   : > { %v2605_v28 = vpop.f32.mrf.mxu0  ;;  %v3535_v15 = vpop.f32.mrf.mxu1  ;;  %v4515_v61 = vld [vmem:[%s5047_s6 + $0xbe0] sm:$0xff] }
 0x268   : > { %v2896_v4 = vadd.f32 %v2604_v26, %v2222_v27  ;;  %3952 = vst [vmem:[%s5575_s7 + $0x80] sm:$0xff] %v3824_v13  ;;  %v2606_v18 = vadd.f32 %v2605_v28, %v5552_v46  ;;  %v3825_v5 = vadd.f32 %v3532_v14, %v2895_v25  ;;  %v3536_v6 = vadd.f32 %v3535_v15, %v5552_v46  ;;  %v4643_v25 = vld [vmem:[%s5047_s6 + $0xfe0] sm:$0xff]  ;;  %v4645_v26 = vld [vmem:[%s5047_s6 + $0xff0] sm:$0xff] }
 0x269   : > { %v2609_v30 = vpop.f32.mrf.mxu0  ;;  %2848 = vmatmul.mubr.bf16.gmra.mxu0 %v2519_v63  ;;  %v3539_v20 = vpop.f32.mrf.mxu1  ;;  %3778 = vmatmul.mubr.bf16.gmra.mxu1 %v3449_v1  ;;  %v2228_v13 = vld [vmem:[%s5575_s7 + $0xc0] sm:$0xff] }
 0x26a   : > { %v2897_v39 = vadd.f32 %v2606_v18, %v2223_v16  ;;  %3953 = vst [vmem:[%s5575_s7 + $0x88] sm:$0xff] %v3825_v5  ;;  %v2610_v40 = vadd.f32 %v2609_v30, %v5550_v9  ;;  %v3826_v41 = vadd.f32 %v3534_v29, %v2896_v4  ;;  %v3540_v42 = vadd.f32 %v3539_v20, %v5550_v9  ;;  %v2229_v4 = vld [vmem:[%s5575_s7 + $0xc8] sm:$0xff] }
 0x26b   : > { %2857 = vmatprep.mubr.bf16.mxu0 %v2522_v2  ;;  %v2611_v43 = vpop.f32.mrf.mxu0  ;;  %v3541_v35 = vpop.f32.mrf.mxu1  ;;  %3787 = vmatprep.mubr.bf16.mxu1 %v3452_v3  ;;  %v4517_v2 = vld [vmem:[%s5047_s6 + $0xbf0] sm:$0xff]  ;;  %v3453_v29 = vpack.c.bf16 %v4645_v26, %v4643_v25  ;;  %s4660_s6 = sshll.u32 %s4966_s19, 14 }
 0x26c   : > { %v2898_v44 = vadd.f32 %v2610_v40, %v2224_v8  ;;  %3954 = vst [vmem:[%s5575_s7 + $0x90] sm:$0xff] %v3826_v41  ;;  %v2612_v36 = vadd.f32 %v2611_v43, %v5552_v46  ;;  %v3827_v10 = vadd.f32 %v3536_v6, %v2897_v39  ;;  %v3542_v19 = vadd.f32 %v3541_v35, %v5552_v46  ;;  %s6652_s11 = scalar_lea.hbm %s6986_s3, %s4660_s6 }
 0x26d   : > { %v2613_v48 = vpop.f32.mrf.mxu0  ;;  %v3543_v50 = vpop.f32.mrf.mxu1  ;;  %v2523_v18 = vpack.c.bf16 %v4517_v2, %v4515_v61 }
 0x26e   : > { %v2899_v51 = vadd.f32 %v2612_v36, %v2225_v37  ;;  %3955 = vst [vmem:[%s5575_s7 + $0x98] sm:$0xff] %v3827_v10  ;;  %v2614_v52 = vadd.f32 %v2613_v48, %v5550_v9  ;;  %v3828_v17 = vadd.f32 %v3540_v42, %v2898_v44  ;;  %v3544_v22 = vadd.f32 %v3543_v50, %v5550_v9 }
 0x26f   : > { %v2615_v54 = vpop.f32.mrf.mxu0  ;;  %v3545_v55 = vpop.f32.mrf.mxu1 }
 0x270   : > { %v2900_v57 = vadd.f32 %v2614_v52, %v2226_v53  ;;  %3956 = vst [vmem:[%s5575_s7 + $0xa0] sm:$0xff] %v3828_v17  ;;  %v2616_v58 = vadd.f32 %v2615_v54, %v5552_v46  ;;  %v3829_v21 = vadd.f32 %v3542_v19, %v2899_v51  ;;  %v3546_v23 = vadd.f32 %v3545_v55, %v5552_v46  ;;  %v2234_v54 = vld [vmem:[%s5575_s7 + $0xf0] sm:$0xff] }
 0x271   : > { %v2619_v60 = vpop.f32.mrf.mxu0  ;;  %2858 = vmatmul.mubr.bf16.gmra.mxu0 %v2521_v49  ;;  %v3549_v24 = vpop.f32.mrf.mxu1  ;;  %3788 = vmatmul.mubr.bf16.gmra.mxu1 %v3451_v11  ;;  %v2233_v11 = vld [vmem:[%s5575_s7 + $0xe8] sm:$0xff] }
 0x272   : > { %v2901_v62 = vadd.f32 %v2616_v58, %v2227_v59  ;;  %3957 = vst [vmem:[%s5575_s7 + $0xa8] sm:$0xff] %v3829_v21  ;;  %v2620_v63 = vadd.f32 %v2619_v60, %v5550_v9  ;;  %v3830_v0 = vadd.f32 %v3544_v22, %v2900_v57  ;;  %v3550_v1 = vadd.f32 %v3549_v24, %v5550_v9  ;;  %v2235_v59 = vld [vmem:[%s5575_s7 + $0xf8] sm:$0xff] }
 0x273   : > { %2867 = vmatprep.mubr.bf16.mxu0 %v2524_v12  ;;  %v2621_v14 = vpop.f32.mrf.mxu0  ;;  %v3551_v27 = vpop.f32.mrf.mxu1  ;;  %3797 = vmatprep.mubr.bf16.mxu1 %v3454_v56 }
 0x274   : > { %v2902_v28 = vadd.f32 %v2620_v63, %v2228_v13  ;;  %3958 = vst [vmem:[%s5575_s7 + $0xb0] sm:$0xff] %v3830_v0  ;;  %v2622_v15 = vadd.f32 %v2621_v14, %v5552_v46  ;;  %v3831_v3 = vadd.f32 %v3546_v23, %v2901_v62  ;;  %v3552_v31 = vadd.f32 %v3551_v27, %v5552_v46  ;;  %v2237_v27 = vld [vmem:[%s5575_s7 + $0x108] sm:$0xff] }
 0x275   : > { %v2623_v16 = vpop.f32.mrf.mxu0  ;;  %v3553_v5 = vpop.f32.mrf.mxu1 }
 0x276   : > { %v2903_v30 = vadd.f32 %v2622_v15, %v2229_v4  ;;  %3959 = vst [vmem:[%s5575_s7 + $0xb8] sm:$0xff] %v3831_v3  ;;  %v2624_v6 = vadd.f32 %v2623_v16, %v5550_v9  ;;  %v3832_v20 = vadd.f32 %v3550_v1, %v2902_v28  ;;  %v3554_v7 = vadd.f32 %v3553_v5, %v5550_v9  ;;  %v2236_v1 = vld [vmem:[%s5575_s7 + $0x100] sm:$0xff]  ;;  %v2238_v5 = vld [vmem:[%s5575_s7 + $0x110] sm:$0xff] }
 0x277   : > { %v2625_v38 = vpop.f32.mrf.mxu0  ;;  %v3555_v39 = vpop.f32.mrf.mxu1 }
 0x278   : > { %v2904_v40 = vadd.f32 %v2624_v6, %v2230_v32  ;;  %3960 = vst [vmem:[%s5575_s7 + $0xc0] sm:$0xff] %v3832_v20  ;;  %v2626_v41 = vadd.f32 %v2625_v38, %v5552_v46  ;;  %v3833_v42 = vadd.f32 %v3552_v31, %v2903_v30  ;;  %v3556_v8 = vadd.f32 %v3555_v39, %v5552_v46  ;;  %v2239_v38 = vld [vmem:[%s5575_s7 + $0x118] sm:$0xff] }
 0x279   : > { %v2629_v34 = vpop.f32.mrf.mxu0  ;;  %2868 = vmatmul.mubr.bf16.gmra.mxu0 %v2523_v18  ;;  %v3559_v43 = vpop.f32.mrf.mxu1  ;;  %3798 = vmatmul.mubr.bf16.gmra.mxu1 %v3453_v29 }
 0x27a   : > { %v2905_v35 = vadd.f32 %v2626_v41, %v2231_v33  ;;  %3961 = vst [vmem:[%s5575_s7 + $0xc8] sm:$0xff] %v3833_v42  ;;  %v2630_v44 = vadd.f32 %v2629_v34, %v5550_v9  ;;  %v3834_v36 = vadd.f32 %v3554_v7, %v2904_v40  ;;  %v3560_v10 = vadd.f32 %v3559_v43, %v5550_v9 }
 0x27b   : > { %v2631_v47 = vpop.f32.mrf.mxu0  ;;  %v3561_v37 = vpop.f32.mrf.mxu1 }
 0x27c   : > { %v2906_v48 = vadd.f32 %v2630_v44, %v2232_v45  ;;  %3962 = vst [vmem:[%s5575_s7 + $0xd0] sm:$0xff] %v3834_v36  ;;  %v2632_v49 = vadd.f32 %v2631_v47, %v5552_v46  ;;  %v3835_v50 = vadd.f32 %v3556_v8, %v2905_v35  ;;  %v3562_v53 = vadd.f32 %v3561_v37, %v5552_v46  ;;  %v2240_v8 = vld [vmem:[%s5575_s7 + $0x120] sm:$0xff]  ;;  %v2241_v45 = vld [vmem:[%s5575_s7 + $0x128] sm:$0xff] }
 0x27d   : > { %v2633_v12 = vpop.f32.mrf.mxu0  ;;  %v3563_v51 = vpop.f32.mrf.mxu1 }
 0x27e   : > { %v2907_v52 = vadd.f32 %v2632_v49, %v2233_v11  ;;  %3963 = vst [vmem:[%s5575_s7 + $0xd8] sm:$0xff] %v3835_v50  ;;  %v2634_v17 = vadd.f32 %v2633_v12, %v5550_v9  ;;  %v3836_v19 = vadd.f32 %v3560_v10, %v2906_v48  ;;  %v3564_v22 = vadd.f32 %v3563_v51, %v5550_v9  ;;  %v2242_v12 = vld [vmem:[%s5575_s7 + $0x130] sm:$0xff] }
 0x27f   : > { %v2635_v55 = vpop.f32.mrf.mxu0  ;;  %v3565_v56 = vpop.f32.mrf.mxu1 }
 0x280   : > { %v2908_v57 = vadd.f32 %v2634_v17, %v2234_v54  ;;  %3964 = vst [vmem:[%s5575_s7 + $0xe0] sm:$0xff] %v3836_v19  ;;  %v2636_v58 = vadd.f32 %v2635_v55, %v5552_v46  ;;  %v3837_v21 = vadd.f32 %v3562_v53, %v2907_v52  ;;  %v3566_v23 = vadd.f32 %v3565_v56, %v5552_v46  ;;  %v2243_v55 = vld [vmem:[%s5575_s7 + $0x138] sm:$0xff] }
 0x281   : > { %v2639_v60 = vpop.f32.mrf.mxu0  ;;  %v3569_v24 = vpop.f32.mrf.mxu1 }
 0x282   : > { %v2909_v61 = vadd.f32 %v2636_v58, %v2235_v59  ;;  %3965 = vst [vmem:[%s5575_s7 + $0xe8] sm:$0xff] %v3837_v21  ;;  %v2640_v62 = vadd.f32 %v2639_v60, %v5550_v9  ;;  %v3838_v63 = vadd.f32 %v3564_v22, %v2908_v57  ;;  %v3570_v0 = vadd.f32 %v3569_v24, %v5550_v9 }
 0x283   : > { %v2641_v2 = vpop.f32.mrf.mxu0  ;;  %v3571_v25 = vpop.f32.mrf.mxu1 }
 0x284   : > { %v2910_v26 = vadd.f32 %v2640_v62, %v2236_v1  ;;  %3966 = vst [vmem:[%s5575_s7 + $0xf0] sm:$0xff] %v3838_v63  ;;  %v2642_v13 = vadd.f32 %v2641_v2, %v5552_v46  ;;  %v3839_v14 = vadd.f32 %v3566_v23, %v2909_v61  ;;  %v3572_v18 = vadd.f32 %v3571_v25, %v5552_v46  ;;  %v2244_v23 = vld [vmem:[%s5575_s7 + $0x140] sm:$0xff]  ;;  %v2245_v1 = vld [vmem:[%s5575_s7 + $0x148] sm:$0xff] }
 0x285   : > { %v2643_v28 = vpop.f32.mrf.mxu0  ;;  %v3573_v15 = vpop.f32.mrf.mxu1 }
 0x286   : > { %v2911_v3 = vadd.f32 %v2642_v13, %v2237_v27  ;;  %3967 = vst [vmem:[%s5575_s7 + $0xf8] sm:$0xff] %v3839_v14  ;;  %v2644_v4 = vadd.f32 %v2643_v28, %v5550_v9  ;;  %v3840_v16 = vadd.f32 %v3570_v0, %v2910_v26  ;;  %v3574_v32 = vadd.f32 %v3573_v15, %v5550_v9  ;;  %v2246_v28 = vld [vmem:[%s5575_s7 + $0x150] sm:$0xff] }
 0x287   : > { %v2645_v29 = vpop.f32.mrf.mxu0  ;;  %v3575_v30 = vpop.f32.mrf.mxu1 }
 0x288   : > { %v2912_v6 = vadd.f32 %v2644_v4, %v2238_v5  ;;  %3968 = vst [vmem:[%s5575_s7 + $0x100] sm:$0xff] %v3840_v16  ;;  %v2646_v20 = vadd.f32 %v2645_v29, %v5552_v46  ;;  %v3841_v31 = vadd.f32 %v3572_v18, %v2911_v3  ;;  %v3576_v40 = vadd.f32 %v3575_v30, %v5552_v46  ;;  %v2247_v29 = vld [vmem:[%s5575_s7 + $0x158] sm:$0xff] }
 0x289   : > { %v2649_v39 = vpop.f32.mrf.mxu0  ;;  %v3579_v41 = vpop.f32.mrf.mxu1 }
 0x28a   : > { %v2913_v42 = vadd.f32 %v2646_v20, %v2239_v38  ;;  %3969 = vst [vmem:[%s5575_s7 + $0x108] sm:$0xff] %v3841_v31  ;;  %v2650_v7 = vadd.f32 %v2649_v39, %v5550_v9  ;;  %v3842_v33 = vadd.f32 %v3574_v32, %v2912_v6  ;;  %v3580_v34 = vadd.f32 %v3579_v41, %v5550_v9 }
 0x28b   : > { %v2651_v43 = vpop.f32.mrf.mxu0  ;;  %v3581_v35 = vpop.f32.mrf.mxu1 }
 0x28c   : > { %v2914_v44 = vadd.f32 %v2650_v7, %v2240_v8  ;;  %3970 = vst [vmem:[%s5575_s7 + $0x110] sm:$0xff] %v3842_v33  ;;  %v2652_v36 = vadd.f32 %v2651_v43, %v5552_v46  ;;  %v3843_v10 = vadd.f32 %v3576_v40, %v2913_v42  ;;  %v3582_v11 = vadd.f32 %v3581_v35, %v5552_v46  ;;  %v2248_v40 = vld [vmem:[%s5575_s7 + $0x160] sm:$0xff]  ;;  %v2249_v8 = vld [vmem:[%s5575_s7 + $0x168] sm:$0xff] }
 0x28d   : > { %v2653_v47 = vpop.f32.mrf.mxu0  ;;  %v3583_v37 = vpop.f32.mrf.mxu1 }
 0x28e   : > { %v2915_v48 = vadd.f32 %v2652_v36, %v2241_v45  ;;  %3971 = vst [vmem:[%s5575_s7 + $0x118] sm:$0xff] %v3843_v10  ;;  %v2654_v49 = vadd.f32 %v2653_v47, %v5550_v9  ;;  %v3844_v50 = vadd.f32 %v3580_v34, %v2914_v44  ;;  %v3584_v54 = vadd.f32 %v3583_v37, %v5550_v9  ;;  %v2250_v47 = vld [vmem:[%s5575_s7 + $0x170] sm:$0xff] }
 0x28f   : > { %v2655_v51 = vpop.f32.mrf.mxu0  ;;  %v3585_v52 = vpop.f32.mrf.mxu1 }
 0x290   : > { %v2916_v17 = vadd.f32 %v2654_v49, %v2242_v12  ;;  %3972 = vst [vmem:[%s5575_s7 + $0x120] sm:$0xff] %v3844_v50  ;;  %v2656_v19 = vadd.f32 %v2655_v51, %v5552_v46  ;;  %v3845_v53 = vadd.f32 %v3582_v11, %v2915_v48  ;;  %v3586_v57 = vadd.f32 %v3585_v52, %v5552_v46  ;;  %v2251_v51 = vld [vmem:[%s5575_s7 + $0x178] sm:$0xff] }
 0x291   : > { %v2659_v56 = vpop.f32.mrf.mxu0  ;;  %v3589_v58 = vpop.f32.mrf.mxu1 }
 0x292   : > { %v2917_v21 = vadd.f32 %v2656_v19, %v2243_v55  ;;  %3973 = vst [vmem:[%s5575_s7 + $0x128] sm:$0xff] %v3845_v53  ;;  %v2660_v22 = vadd.f32 %v2659_v56, %v5550_v9  ;;  %v3846_v59 = vadd.f32 %v3584_v54, %v2916_v17  ;;  %v3590_v60 = vadd.f32 %v3589_v58, %v5550_v9 }
 0x293   : > { %v2661_v24 = vpop.f32.mrf.mxu0  ;;  %v3591_v61 = vpop.f32.mrf.mxu1 }
 0x294   : > { %v2918_v62 = vadd.f32 %v2660_v22, %v2244_v23  ;;  %3974 = vst [vmem:[%s5575_s7 + $0x130] sm:$0xff] %v3846_v59  ;;  %v2662_v63 = vadd.f32 %v2661_v24, %v5552_v46  ;;  %v3847_v0 = vadd.f32 %v3586_v57, %v2917_v21  ;;  %v3592_v27 = vadd.f32 %v3591_v61, %v5552_v46  ;;  %v2252_v57 = vld [vmem:[%s5575_s7 + $0x180] sm:$0xff]  ;;  %v2253_v23 = vld [vmem:[%s5575_s7 + $0x188] sm:$0xff] }
 0x295   : > { %v2663_v2 = vpop.f32.mrf.mxu0  ;;  %v3593_v25 = vpop.f32.mrf.mxu1 }
 0x296   : > { %v2919_v26 = vadd.f32 %v2662_v63, %v2245_v1  ;;  %3975 = vst [vmem:[%s5575_s7 + $0x138] sm:$0xff] %v3847_v0  ;;  %v2664_v13 = vadd.f32 %v2663_v2, %v5550_v9  ;;  %v3848_v14 = vadd.f32 %v3590_v60, %v2918_v62  ;;  %v3594_v5 = vadd.f32 %v3593_v25, %v5550_v9  ;;  %v2254_v2 = vld [vmem:[%s5575_s7 + $0x190] sm:$0xff] }
 0x297   : > { %v2665_v15 = vpop.f32.mrf.mxu0  ;;  %v3595_v3 = vpop.f32.mrf.mxu1 }
 0x298   : > { %v2920_v4 = vadd.f32 %v2664_v13, %v2246_v28  ;;  %3976 = vst [vmem:[%s5575_s7 + $0x140] sm:$0xff] %v3848_v14  ;;  %v2666_v16 = vadd.f32 %v2665_v15, %v5552_v46  ;;  %v3849_v18 = vadd.f32 %v3592_v27, %v2919_v26  ;;  %v3596_v6 = vadd.f32 %v3595_v3, %v5552_v46  ;;  %v2255_v15 = vld [vmem:[%s5575_s7 + $0x198] sm:$0xff] }
 0x299   : > { %v2669_v30 = vpop.f32.mrf.mxu0  ;;  %v3599_v20 = vpop.f32.mrf.mxu1 }
 0x29a   : > { %v2921_v31 = vadd.f32 %v2666_v16, %v2247_v29  ;;  %3977 = vst [vmem:[%s5575_s7 + $0x148] sm:$0xff] %v3849_v18  ;;  %v2670_v32 = vadd.f32 %v2669_v30, %v5550_v9  ;;  %v3850_v38 = vadd.f32 %v3594_v5, %v2920_v4  ;;  %v3600_v39 = vadd.f32 %v3599_v20, %v5550_v9 }
 0x29b   : > { %v2671_v41 = vpop.f32.mrf.mxu0  ;;  %v3601_v42 = vpop.f32.mrf.mxu1 }
 0x29c   : > { %v2922_v7 = vadd.f32 %v2670_v32, %v2248_v40  ;;  %3978 = vst [vmem:[%s5575_s7 + $0x150] sm:$0xff] %v3850_v38  ;;  %v2672_v33 = vadd.f32 %v2671_v41, %v5552_v46  ;;  %v3851_v34 = vadd.f32 %v3596_v6, %v2921_v31  ;;  %v3602_v45 = vadd.f32 %v3601_v42, %v5552_v46  ;;  %v2256_v6 = vld [vmem:[%s5575_s7 + $0x1a0] sm:$0xff]  ;;  %v2257_v40 = vld [vmem:[%s5575_s7 + $0x1a8] sm:$0xff] }
 0x29d   : > { %v2673_v43 = vpop.f32.mrf.mxu0  ;;  %v3603_v35 = vpop.f32.mrf.mxu1 }
 0x29e   : > { %v2923_v44 = vadd.f32 %v2672_v33, %v2249_v8  ;;  %3979 = vst [vmem:[%s5575_s7 + $0x158] sm:$0xff] %v3851_v34  ;;  %v2674_v36 = vadd.f32 %v2673_v43, %v5550_v9  ;;  %v3852_v10 = vadd.f32 %v3600_v39, %v2922_v7  ;;  %v3604_v12 = vadd.f32 %v3603_v35, %v5550_v9  ;;  %v2258_v43 = vld [vmem:[%s5575_s7 + $0x1b0] sm:$0xff] }
 0x29f   : > { %v2675_v37 = vpop.f32.mrf.mxu0  ;;  %v3605_v48 = vpop.f32.mrf.mxu1 }
 0x2a0   : > { %v2924_v49 = vadd.f32 %v2674_v36, %v2250_v47  ;;  %3980 = vst [vmem:[%s5575_s7 + $0x160] sm:$0xff] %v3852_v10  ;;  %v2676_v50 = vadd.f32 %v2675_v37, %v5552_v46  ;;  %v3853_v11 = vadd.f32 %v3602_v45, %v2923_v44  ;;  %v3606_v17 = vadd.f32 %v3605_v48, %v5552_v46  ;;  %v2259_v37 = vld [vmem:[%s5575_s7 + $0x1b8] sm:$0xff] }
 0x2a1   : > { %v2679_v52 = vpop.f32.mrf.mxu0  ;;  %v3609_v19 = vpop.f32.mrf.mxu1 }
 0x2a2   : > { %v2925_v53 = vadd.f32 %v2676_v50, %v2251_v51  ;;  %3981 = vst [vmem:[%s5575_s7 + $0x168] sm:$0xff] %v3853_v11  ;;  %v2680_v54 = vadd.f32 %v2679_v52, %v5550_v9  ;;  %v3854_v55 = vadd.f32 %v3604_v12, %v2924_v49  ;;  %v3610_v56 = vadd.f32 %v3609_v19, %v5550_v9 }
 0x2a3   : > { %v2681_v58 = vpop.f32.mrf.mxu0  ;;  %v3611_v21 = vpop.f32.mrf.mxu1 }
 0x2a4   : > { %v2926_v22 = vadd.f32 %v2680_v54, %v2252_v57  ;;  %3982 = vst [vmem:[%s5575_s7 + $0x170] sm:$0xff] %v3854_v55  ;;  %v2682_v59 = vadd.f32 %v2681_v58, %v5552_v46  ;;  %v3855_v60 = vadd.f32 %v3606_v17, %v2925_v53  ;;  %v3612_v1 = vadd.f32 %v3611_v21, %v5552_v46  ;;  %v2260_v17 = vld [vmem:[%s5575_s7 + $0x1c0] sm:$0xff]  ;;  %v2261_v57 = vld [vmem:[%s5575_s7 + $0x1c8] sm:$0xff] }
 0x2a5   : > { %v2683_v24 = vpop.f32.mrf.mxu0  ;;  %v3613_v61 = vpop.f32.mrf.mxu1 }
 0x2a6   : > { %v2927_v62 = vadd.f32 %v2682_v59, %v2253_v23  ;;  %3983 = vst [vmem:[%s5575_s7 + $0x178] sm:$0xff] %v3855_v60  ;;  %v2684_v63 = vadd.f32 %v2683_v24, %v5550_v9  ;;  %v3856_v0 = vadd.f32 %v3610_v56, %v2926_v22  ;;  %v3614_v28 = vadd.f32 %v3613_v61, %v5550_v9  ;;  %v2262_v24 = vld [vmem:[%s5575_s7 + $0x1d0] sm:$0xff] }
 0x2a7   : > { %v2685_v25 = vpop.f32.mrf.mxu0  ;;  %v3615_v26 = vpop.f32.mrf.mxu1 }
 0x2a8   : > { %v2928_v13 = vadd.f32 %v2684_v63, %v2254_v2  ;;  %3984 = vst [vmem:[%s5575_s7 + $0x180] sm:$0xff] %v3856_v0  ;;  %v2686_v14 = vadd.f32 %v2685_v25, %v5552_v46  ;;  %v3857_v27 = vadd.f32 %v3612_v1, %v2927_v62  ;;  %v3616_v4 = vadd.f32 %v3615_v26, %v5552_v46  ;;  %v2263_v25 = vld [vmem:[%s5575_s7 + $0x1d8] sm:$0xff] }
 0x2a9   : > { %v2689_v3 = vpop.f32.mrf.mxu0  ;;  %v3619_v16 = vpop.f32.mrf.mxu1 }
 0x2aa   : > { %v2929_v18 = vadd.f32 %v2686_v14, %v2255_v15  ;;  %3985 = vst [vmem:[%s5575_s7 + $0x188] sm:$0xff] %v3857_v27  ;;  %v2690_v5 = vadd.f32 %v2689_v3, %v5550_v9  ;;  %v3858_v29 = vadd.f32 %v3614_v28, %v2928_v13  ;;  %v3620_v30 = vadd.f32 %v3619_v16, %v5550_v9 }
 0x2ab   : > { %v2691_v20 = vpop.f32.mrf.mxu0  ;;  %v3621_v31 = vpop.f32.mrf.mxu1 }
 0x2ac   : > { %v2930_v32 = vadd.f32 %v2690_v5, %v2256_v6  ;;  %3986 = vst [vmem:[%s5575_s7 + $0x190] sm:$0xff] %v3858_v29  ;;  %v2692_v38 = vadd.f32 %v2691_v20, %v5552_v46  ;;  %v3859_v39 = vadd.f32 %v3616_v4, %v2929_v18  ;;  %v3622_v8 = vadd.f32 %v3621_v31, %v5552_v46  ;;  %v2264_v4 = vld [vmem:[%s5575_s7 + $0x1e0] sm:$0xff]  ;;  %v2265_v6 = vld [vmem:[%s5575_s7 + $0x1e8] sm:$0xff] }
 0x2ad   : > { %v2693_v41 = vpop.f32.mrf.mxu0  ;;  %v3623_v42 = vpop.f32.mrf.mxu1 }
 0x2ae   : > { %v2931_v7 = vadd.f32 %v2692_v38, %v2257_v40  ;;  %3987 = vst [vmem:[%s5575_s7 + $0x198] sm:$0xff] %v3859_v39  ;;  %v2694_v33 = vadd.f32 %v2693_v41, %v5550_v9  ;;  %v3860_v34 = vadd.f32 %v3620_v30, %v2930_v32  ;;  %v3624_v47 = vadd.f32 %v3623_v42, %v5550_v9  ;;  %v2266_v41 = vld [vmem:[%s5575_s7 + $0x1f0] sm:$0xff] }
 0x2af   : > { %v2695_v35 = vpop.f32.mrf.mxu0  ;;  %v3625_v44 = vpop.f32.mrf.mxu1 }
 0x2b0   : > { %v2932_v36 = vadd.f32 %v2694_v33, %v2258_v43  ;;  %3988 = vst [vmem:[%s5575_s7 + $0x1a0] sm:$0xff] %v3860_v34  ;;  %v2696_v10 = vadd.f32 %v2695_v35, %v5552_v46  ;;  %v3861_v45 = vadd.f32 %v3622_v8, %v2931_v7  ;;  %v3626_v49 = vadd.f32 %v3625_v44, %v5552_v46  ;;  %v2267_v35 = vld [vmem:[%s5575_s7 + $0x1f8] sm:$0xff] }
 0x2b1   : > { %v2699_v48 = vpop.f32.mrf.mxu0  ;;  %v3629_v50 = vpop.f32.mrf.mxu1 }
 0x2b2   : > { %v2933_v11 = vadd.f32 %v2696_v10, %v2259_v37  ;;  %3989 = vst [vmem:[%s5575_s7 + $0x1a8] sm:$0xff] %v3861_v45  ;;  %v2700_v12 = vadd.f32 %v2699_v48, %v5550_v9  ;;  %v3862_v51 = vadd.f32 %v3624_v47, %v2932_v36  ;;  %v3630_v52 = vadd.f32 %v3629_v50, %v5550_v9 }
 0x2b3   : > { %v2701_v19 = vpop.f32.mrf.mxu0  ;;  %v3631_v53 = vpop.f32.mrf.mxu1 }
 0x2b4   : > { %v2934_v54 = vadd.f32 %v2700_v12, %v2260_v17  ;;  %3990 = vst [vmem:[%s5575_s7 + $0x1b0] sm:$0xff] %v3862_v51  ;;  %v2702_v55 = vadd.f32 %v2701_v19, %v5552_v46  ;;  %v3863_v56 = vadd.f32 %v3626_v49, %v2933_v11  ;;  %v3632_v23 = vadd.f32 %v3631_v53, %v5552_v46  ;;  %v2268_v49 = vld [vmem:[%s5575_s7 + $0x200] sm:$0xff]  ;;  %v2269_v17 = vld [vmem:[%s5575_s7 + $0x208] sm:$0xff] }
 0x2b5   : > { %v2703_v58 = vpop.f32.mrf.mxu0  ;;  %v3633_v21 = vpop.f32.mrf.mxu1 }
 0x2b6   : > { %v2935_v22 = vadd.f32 %v2702_v55, %v2261_v57  ;;  %3991 = vst [vmem:[%s5575_s7 + $0x1b8] sm:$0xff] %v3863_v56  ;;  %v2704_v59 = vadd.f32 %v2703_v58, %v5550_v9  ;;  %v3864_v60 = vadd.f32 %v3630_v52, %v2934_v54  ;;  %v3634_v2 = vadd.f32 %v3633_v21, %v5550_v9  ;;  %v2270_v58 = vld [vmem:[%s5575_s7 + $0x210] sm:$0xff] }
 0x2b7   : > { %v2705_v61 = vpop.f32.mrf.mxu0  ;;  %v3635_v62 = vpop.f32.mrf.mxu1 }
 0x2b8   : > { %v2936_v63 = vadd.f32 %v2704_v59, %v2262_v24  ;;  %3992 = vst [vmem:[%s5575_s7 + $0x1c0] sm:$0xff] %v3864_v60  ;;  %v2706_v0 = vadd.f32 %v2705_v61, %v5552_v46  ;;  %v3865_v1 = vadd.f32 %v3632_v23, %v2935_v22  ;;  %v3636_v13 = vadd.f32 %v3635_v62, %v5552_v46  ;;  %v2271_v61 = vld [vmem:[%s5575_s7 + $0x218] sm:$0xff] }
 0x2b9   : > { %v2709_v26 = vpop.f32.mrf.mxu0  ;;  %v3639_v14 = vpop.f32.mrf.mxu1 }
 0x2ba   : > { %v2937_v27 = vadd.f32 %v2706_v0, %v2263_v25  ;;  %3993 = vst [vmem:[%s5575_s7 + $0x1c8] sm:$0xff] %v3865_v1  ;;  %v2710_v28 = vadd.f32 %v2709_v26, %v5550_v9  ;;  %v3866_v15 = vadd.f32 %v3634_v2, %v2936_v63  ;;  %v3640_v3 = vadd.f32 %v3639_v14, %v5550_v9 }
 0x2bb   : > { %v2711_v16 = vpop.f32.mrf.mxu0  ;;  %v3641_v18 = vpop.f32.mrf.mxu1 }
 0x2bc   : > { %v2938_v5 = vadd.f32 %v2710_v28, %v2264_v4  ;;  %3994 = vst [vmem:[%s5575_s7 + $0x1d0] sm:$0xff] %v3866_v15  ;;  %v2712_v29 = vadd.f32 %v2711_v16, %v5552_v46  ;;  %v3867_v30 = vadd.f32 %v3636_v13, %v2937_v27  ;;  %v3642_v40 = vadd.f32 %v3641_v18, %v5552_v46 }
 0x2bd   : > { %v2713_v20 = vpop.f32.mrf.mxu0  ;;  %v3643_v31 = vpop.f32.mrf.mxu1 }
 0x2be   : > { %v2939_v32 = vadd.f32 %v2712_v29, %v2265_v6  ;;  %3995 = vst [vmem:[%s5575_s7 + $0x1d8] sm:$0xff] %v3867_v30  ;;  %v2714_v38 = vadd.f32 %v2713_v20, %v5550_v9  ;;  %v3868_v39 = vadd.f32 %v3640_v3, %v2938_v5  ;;  %v3644_v43 = vadd.f32 %v3643_v31, %v5550_v9 }
 0x2bf   : > { %v2715_v42 = vpop.f32.mrf.mxu0  ;;  %v3645_v7 = vpop.f32.mrf.mxu1 }
 0x2c0   : > { %v2940_v33 = vadd.f32 %v2714_v38, %v2266_v41  ;;  %3996 = vst [vmem:[%s5575_s7 + $0x1e0] sm:$0xff] %v3868_v39  ;;  %v2716_v34 = vadd.f32 %v2715_v42, %v5552_v46  ;;  %v3869_v8 = vadd.f32 %v3642_v40, %v2939_v32  ;;  %v3646_v36 = vadd.f32 %v3645_v7, %v5552_v46 }
 0x2c1   : > { %v2719_v44 = vpop.f32.mrf.mxu0  ;;  %v3649_v10 = vpop.f32.mrf.mxu1 }
 0x2c2   : > { %v2941_v45 = vadd.f32 %v2716_v34, %v2267_v35  ;;  %3997 = vst [vmem:[%s5575_s7 + $0x1e8] sm:$0xff] %v3869_v8  ;;  %v2720_v47 = vadd.f32 %v2719_v44, %v5550_v9  ;;  %v3870_v37 = vadd.f32 %v3644_v43, %v2940_v33  ;;  %v3650_v48 = vadd.f32 %v3649_v10, %v5550_v9 }
 0x2c3   : > { %v2721_v50 = vpop.f32.mrf.mxu0  ;;  %v3651_v11 = vpop.f32.mrf.mxu1 }
 0x2c4   : > { %v2942_v12 = vadd.f32 %v2720_v47, %v2268_v49  ;;  %3998 = vst [vmem:[%s5575_s7 + $0x1f0] sm:$0xff] %v3870_v37  ;;  %v2722_v51 = vadd.f32 %v2721_v50, %v5552_v46  ;;  %v3871_v52 = vadd.f32 %v3646_v36, %v2941_v45  ;;  %v3652_v57 = vadd.f32 %v3651_v11, %v5552_v46 }
 0x2c5   : > { %v2723_v19 = vpop.f32.mrf.mxu0  ;;  %v3653_v53 = vpop.f32.mrf.mxu1 }
 0x2c6   : > { %v2943_v54 = vadd.f32 %v2722_v51, %v2269_v17  ;;  %3999 = vst [vmem:[%s5575_s7 + $0x1f8] sm:$0xff] %v3871_v52  ;;  %v2724_v55 = vadd.f32 %v2723_v19, %v5550_v9  ;;  %v3872_v56 = vadd.f32 %v3650_v48, %v2942_v12  ;;  %v3654_v24 = vadd.f32 %v3653_v53, %v5550_v9 }
 0x2c7   : > { %v2725_v21 = vpop.f32.mrf.mxu0  ;;  %v3655_v22 = vpop.f32.mrf.mxu1 }
 0x2c8   : > { %v2944_v59 = vadd.f32 %v2724_v55, %v2270_v58  ;;  %4000 = vst [vmem:[%s5575_s7 + $0x200] sm:$0xff] %v3872_v56  ;;  %v2726_v60 = vadd.f32 %v2725_v21, %v5552_v46  ;;  %v3873_v23 = vadd.f32 %v3652_v57, %v2943_v54  ;;  %v3656_v63 = vadd.f32 %v3655_v22, %v5552_v46 }
 0x2c9   : > { %v2729_v62 = vpop.f32.mrf.mxu0  ;;  %v3659_v0 = vpop.f32.mrf.mxu1 }
 0x2ca   : > { %v2945_v1 = vadd.f32 %v2726_v60, %v2271_v61  ;;  %4001 = vst [vmem:[%s5575_s7 + $0x208] sm:$0xff] %v3873_v23  ;;  %v2730_v2 = vadd.f32 %v2729_v62, %v5550_v9  ;;  %v3874_v25 = vadd.f32 %v3654_v24, %v2944_v59  ;;  %v3660_v26 = vadd.f32 %v3659_v0, %v5550_v9 }
 0x2cb   : > { %4822 = shalt.err (!%p4819_p0)
}
 0x2cc   : > { %s4823_s29 = scalar_lea.hbm %s6652_s11, 16384  ;;  %s4827_s26 = scalar_lea.hbm %s6986_s3, 32768 }
 0x2cd   : > { %p4824_p7 = scmp.ne.s32.totalorder %s6652_s11, %s4823_s29  ;;  %p4828_p9 = scmp.lt.s32.totalorder %s6652_s11, %s6986_s3 }
 0x2ce   : > { %p4829_p6 = scmp.lt.s32.totalorder %s4827_s26, %s4823_s29 }
 0x2cf   : > { %p4825_p3 = pnand %p4824_p7, %p6996_p5 }
 0x2d0   : > { %p4830_p4 = por %p4829_p6, %p4828_p9 }
 0x2d1   : > { %p4826_p8 = pneg %p4825_p3 }
 0x2d3   : > { %p4831_p11 = pnand %p4830_p4, %p4826_p8 }
 0x2d5   : > { %4834 = shalt.err (!%p4831_p11)
}
 0x2d6   : > { %s4917_s10 = smov 256   ;;  %s4918_s20 = smov 16   ;;  %v2272_v13 = vld [vmem:[%s5575_s7 + $0x220] sm:$0xff]  ;;  %v2731_v14 = vpop.f32.mrf.mxu0  ;;  %v3661_v27 = vpop.f32.mrf.mxu1  ;;  %4002 = vst [vmem:[%s5575_s7 + $0x210] sm:$0xff] %v3874_v25  ;;  %v3875_v3 = vadd.f32 %v3656_v63, %v2945_v1  ;;  %v2273_v4 = vld [vmem:[%s5575_s7 + $0x228] sm:$0xff]  ;;  %v2274_v20 = vld [vmem:[%s5575_s7 + $0x230] sm:$0xff] }
 0x2d7   : > { %4676 = dma.vmem_to_hbm [thread:$0]  (%p6996_p5), %s6658_s12, 16384, %s6652_s11, %s4065_s13, %s4917_s10, %s4917_s10, %s4918_s20   ;;  %v2946_v28 = vadd.f32 %v2730_v2, %v2272_v13  ;;  %v2732_v15 = vadd.f32 %v2731_v14, %v5552_v46  ;;  %v3662_v6 = vadd.f32 %v3661_v27, %v5552_v46 }
 0x2d8   : > { %v2733_v16 = vpop.f32.mrf.mxu0  ;;  %v3663_v18 = vpop.f32.mrf.mxu1  ;;  %4003 = vst [vmem:[%s5575_s7 + $0x218] sm:$0xff] %v3875_v3  ;;  %v2275_v42 = vld [vmem:[%s5575_s7 + $0x238] sm:$0xff]  ;;  %v2276_v36 = vld [vmem:[%s5575_s7 + $0x240] sm:$0xff]  ;;  %v2277_v49 = vld [vmem:[%s5575_s7 + $0x248] sm:$0xff]  ;;  %s4101_s11 = sshll.u32 %s5575_s7, 4  ;;  %s6936_s5 = scalar_lea.hbm %s6987_s4, %s4660_s6  ;;  %s6938_s11 = int_to_ptr.vmem [resolvable:$true] %s4101_s11 }
 0x2d9   : > { %v2947_v5 = vadd.f32 %v2732_v15, %v2273_v4  ;;  %v2734_v29 = vadd.f32 %v2733_v16, %v5550_v9  ;;  %v3876_v30 = vadd.f32 %v3660_v26, %v2946_v28  ;;  %v3664_v41 = vadd.f32 %v3663_v18, %v5550_v9  ;;  %v2278_v19 = vld [vmem:[%s5575_s7 + $0x250] sm:$0xff]  ;;  %v2279_v21 = vld [vmem:[%s5575_s7 + $0x258] sm:$0xff]  ;;  %v2280_v63 = vld [vmem:[%s5575_s7 + $0x260] sm:$0xff]  ;;  %s4070_s30 = scalar_lea.sflag [#allocation9], %s5043_s22  ;;  %s4835_s25 = scalar_lea.vmem %s6938_s11, 16384 }
 0x2da   : > { %v2735_v31 = vpop.f32.mrf.mxu0  ;;  %v3665_v32 = vpop.f32.mrf.mxu1  ;;  %v2281_v13 = vld [vmem:[%s5575_s7 + $0x268] sm:$0xff]  ;;  %v2282_v16 = vld [vmem:[%s5575_s7 + $0x270] sm:$0xff]  ;;  %p4836_p12 = scmp.ne.s32.totalorder %s6938_s11, %s4835_s25  ;;  %s4919_s29 = smov [#allocation8]  }
 0x2db   : > { %v2948_v38 = vadd.f32 %v2734_v29, %v2274_v20  ;;  %4004 = vst [vmem:[%s5575_s7 + $0x220] sm:$0xff] %v3876_v30  ;;  %v2736_v39 = vadd.f32 %v2735_v31, %v5552_v46  ;;  %v3877_v40 = vadd.f32 %v3662_v6, %v2947_v5  ;;  %v3666_v33 = vadd.f32 %v3665_v32, %v5552_v46  ;;  %v2283_v31 = vld [vmem:[%s5575_s7 + $0x278] sm:$0xff]  ;;  %s4839_s9 = sshll.u32 %s4919_s29, 4  ;;  %s4840_s9 = int_to_ptr.vmem [resolvable:$false] %s4839_s9 }
 0x2dc   : > { %v2739_v7 = vpop.f32.mrf.mxu0  ;;  %v3669_v34 = vpop.f32.mrf.mxu1  ;;  %p4837_p13 = pnand %p4836_p12, %p6996_p5  ;;  %s4841_s19 = scalar_lea.vmem %s4840_s9, 32768 }
 0x2dd   : > { %v2949_v8 = vadd.f32 %v2736_v39, %v2275_v42  ;;  %4005 = vst [vmem:[%s5575_s7 + $0x228] sm:$0xff] %v3877_v40  ;;  %v2740_v43 = vadd.f32 %v2739_v7, %v5550_v9  ;;  %v3878_v35 = vadd.f32 %v3664_v41, %v2948_v38  ;;  %v3670_v44 = vadd.f32 %v3669_v34, %v5550_v9  ;;  %p4842_p2 = scmp.lt.s32.totalorder %s6938_s11, %s4840_s9  ;;  %p4843_p0 = scmp.lt.s32.totalorder %s4841_s19, %s4835_s25 }
 0x2de   : > { %v2741_v10 = vpop.f32.mrf.mxu0  ;;  %v3671_v45 = vpop.f32.mrf.mxu1  ;;  %p4838_p1 = pneg %p4837_p13 }
 0x2df   : > { %v2950_v47 = vadd.f32 %v2740_v43, %v2276_v36  ;;  %4006 = vst [vmem:[%s5575_s7 + $0x230] sm:$0xff] %v3878_v35  ;;  %v2742_v37 = vadd.f32 %v2741_v10, %v5552_v46  ;;  %v3879_v48 = vadd.f32 %v3666_v33, %v2949_v8  ;;  %v3672_v17 = vadd.f32 %v3671_v45, %v5552_v46  ;;  %v2284_v33 = vld [vmem:[%s5575_s7 + $0x280] sm:$0xff]  ;;  %v2285_v36 = vld [vmem:[%s5575_s7 + $0x288] sm:$0xff]  ;;  %p4844_p7 = por %p4843_p0, %p4842_p2 }
 0x2e0   : > { %v2743_v50 = vpop.f32.mrf.mxu0  ;;  %v3673_v11 = vpop.f32.mrf.mxu1 }
 0x2e1   : > { %v2951_v12 = vadd.f32 %v2742_v37, %v2277_v49  ;;  %4007 = vst [vmem:[%s5575_s7 + $0x238] sm:$0xff] %v3879_v48  ;;  %v2744_v51 = vadd.f32 %v2743_v50, %v5550_v9  ;;  %v3880_v52 = vadd.f32 %v3670_v44, %v2950_v47  ;;  %v3674_v58 = vadd.f32 %v3673_v11, %v5550_v9  ;;  %v2286_v50 = vld [vmem:[%s5575_s7 + $0x290] sm:$0xff]  ;;  %p4845_p3 = pnand %p4844_p7, %p4838_p1 }
 0x2e2   : > { %v2745_v53 = vpop.f32.mrf.mxu0  ;;  %v3675_v54 = vpop.f32.mrf.mxu1 }
 0x2e3   : > { %v2952_v55 = vadd.f32 %v2744_v51, %v2278_v19  ;;  %4008 = vst [vmem:[%s5575_s7 + $0x240] sm:$0xff] %v3880_v52  ;;  %v2746_v56 = vadd.f32 %v2745_v53, %v5552_v46  ;;  %v3881_v57 = vadd.f32 %v3672_v17, %v2951_v12  ;;  %v3676_v59 = vadd.f32 %v3675_v54, %v5552_v46  ;;  %v2287_v53 = vld [vmem:[%s5575_s7 + $0x298] sm:$0xff] }
 0x2e4   : > { %v2749_v22 = vpop.f32.mrf.mxu0  ;;  %v3679_v60 = vpop.f32.mrf.mxu1 }
 0x2e5   : > { %v2953_v23 = vadd.f32 %v2746_v56, %v2279_v21  ;;  %4009 = vst [vmem:[%s5575_s7 + $0x248] sm:$0xff] %v3881_v57  ;;  %v2750_v24 = vadd.f32 %v2749_v22, %v5550_v9  ;;  %v3882_v61 = vadd.f32 %v3674_v58, %v2952_v55  ;;  %v3680_v62 = vadd.f32 %v3679_v60, %v5550_v9 }
 0x2e6   : > { %v2751_v0 = vpop.f32.mrf.mxu0  ;;  %v3681_v1 = vpop.f32.mrf.mxu1 }
 0x2e7   : > { %v2954_v2 = vadd.f32 %v2750_v24, %v2280_v63  ;;  %4010 = vst [vmem:[%s5575_s7 + $0x250] sm:$0xff] %v3882_v61  ;;  %v2752_v25 = vadd.f32 %v2751_v0, %v5552_v46  ;;  %v3883_v26 = vadd.f32 %v3676_v59, %v2953_v23  ;;  %v3682_v4 = vadd.f32 %v3681_v1, %v5552_v46  ;;  %v2288_v59 = vld [vmem:[%s5575_s7 + $0x2a0] sm:$0xff]  ;;  %v2289_v63 = vld [vmem:[%s5575_s7 + $0x2a8] sm:$0xff] }
 0x2e8   : > { %v2753_v14 = vpop.f32.mrf.mxu0  ;;  %v3683_v27 = vpop.f32.mrf.mxu1 }
 0x2e9   : > { %v2955_v28 = vadd.f32 %v2752_v25, %v2281_v13  ;;  %4011 = vst [vmem:[%s5575_s7 + $0x258] sm:$0xff] %v3883_v26  ;;  %v2754_v15 = vadd.f32 %v2753_v14, %v5550_v9  ;;  %v3884_v3 = vadd.f32 %v3680_v62, %v2954_v2  ;;  %v3684_v20 = vadd.f32 %v3683_v27, %v5550_v9  ;;  %v2290_v14 = vld [vmem:[%s5575_s7 + $0x2b0] sm:$0xff] }
 0x2ea   : > { %v2755_v18 = vpop.f32.mrf.mxu0  ;;  %v3685_v5 = vpop.f32.mrf.mxu1 }
 0x2eb   : > { %v2956_v29 = vadd.f32 %v2754_v15, %v2282_v16  ;;  %4012 = vst [vmem:[%s5575_s7 + $0x260] sm:$0xff] %v3884_v3  ;;  %v2756_v30 = vadd.f32 %v2755_v18, %v5552_v46  ;;  %v3885_v6 = vadd.f32 %v3682_v4, %v2955_v28  ;;  %v3686_v38 = vadd.f32 %v3685_v5, %v5552_v46  ;;  %v2291_v18 = vld [vmem:[%s5575_s7 + $0x2b8] sm:$0xff] }
 0x2ec   : > { %v2759_v32 = vpop.f32.mrf.mxu0  ;;  %v3689_v39 = vpop.f32.mrf.mxu1 }
 0x2ed   : > { %v2957_v40 = vadd.f32 %v2756_v30, %v2283_v31  ;;  %4013 = vst [vmem:[%s5575_s7 + $0x268] sm:$0xff] %v3885_v6  ;;  %v2760_v41 = vadd.f32 %v2759_v32, %v5550_v9  ;;  %v3886_v42 = vadd.f32 %v3684_v20, %v2956_v29  ;;  %v3690_v7 = vadd.f32 %v3689_v39, %v5550_v9 }
 0x2ee   : > { %v2761_v34 = vpop.f32.mrf.mxu0  ;;  %v3691_v8 = vpop.f32.mrf.mxu1 }
 0x2ef   : > { %v2958_v43 = vadd.f32 %v2760_v41, %v2284_v33  ;;  %4014 = vst [vmem:[%s5575_s7 + $0x270] sm:$0xff] %v3886_v42  ;;  %v2762_v35 = vadd.f32 %v2761_v34, %v5552_v46  ;;  %v3887_v44 = vadd.f32 %v3686_v38, %v2957_v40  ;;  %v3692_v49 = vadd.f32 %v3691_v8, %v5552_v46  ;;  %v2292_v38 = vld [vmem:[%s5575_s7 + $0x2c0] sm:$0xff]  ;;  %v2293_v33 = vld [vmem:[%s5575_s7 + $0x2c8] sm:$0xff] }
 0x2f0   : > { %v2763_v10 = vpop.f32.mrf.mxu0  ;;  %v3693_v45 = vpop.f32.mrf.mxu1 }
 0x2f1   : > { %v2959_v47 = vadd.f32 %v2762_v35, %v2285_v36  ;;  %4015 = vst [vmem:[%s5575_s7 + $0x278] sm:$0xff] %v3887_v44  ;;  %v2764_v37 = vadd.f32 %v2763_v10, %v5550_v9  ;;  %v3888_v48 = vadd.f32 %v3690_v7, %v2958_v43  ;;  %v3694_v19 = vadd.f32 %v3693_v45, %v5550_v9  ;;  %v2294_v10 = vld [vmem:[%s5575_s7 + $0x2d0] sm:$0xff] }
 0x2f2   : > { %v2765_v11 = vpop.f32.mrf.mxu0  ;;  %v3695_v12 = vpop.f32.mrf.mxu1 }
 0x2f3   : > { %v2960_v51 = vadd.f32 %v2764_v37, %v2286_v50  ;;  %4016 = vst [vmem:[%s5575_s7 + $0x280] sm:$0xff] %v3888_v48  ;;  %v2766_v52 = vadd.f32 %v2765_v11, %v5552_v46  ;;  %v3889_v17 = vadd.f32 %v3692_v49, %v2959_v47  ;;  %v3696_v55 = vadd.f32 %v3695_v12, %v5552_v46  ;;  %v2295_v11 = vld [vmem:[%s5575_s7 + $0x2d8] sm:$0xff] }
 0x2f4   : > { %v2769_v54 = vpop.f32.mrf.mxu0  ;;  %v3699_v56 = vpop.f32.mrf.mxu1 }
 0x2f5   : > { %v2961_v57 = vadd.f32 %v2766_v52, %v2287_v53  ;;  %4017 = vst [vmem:[%s5575_s7 + $0x288] sm:$0xff] %v3889_v17  ;;  %v2770_v58 = vadd.f32 %v2769_v54, %v5550_v9  ;;  %v3890_v21 = vadd.f32 %v3694_v19, %v2960_v51  ;;  %v3700_v22 = vadd.f32 %v3699_v56, %v5550_v9 }
 0x2f6   : > { %v2771_v60 = vpop.f32.mrf.mxu0  ;;  %v3701_v23 = vpop.f32.mrf.mxu1 }
 0x2f7   : > { %v2962_v24 = vadd.f32 %v2770_v58, %v2288_v59  ;;  %4018 = vst [vmem:[%s5575_s7 + $0x290] sm:$0xff] %v3890_v21  ;;  %v2772_v61 = vadd.f32 %v2771_v60, %v5552_v46  ;;  %v3891_v62 = vadd.f32 %v3696_v55, %v2961_v57  ;;  %v3702_v13 = vadd.f32 %v3701_v23, %v5552_v46  ;;  %v2296_v55 = vld [vmem:[%s5575_s7 + $0x2e0] sm:$0xff]  ;;  %v2297_v59 = vld [vmem:[%s5575_s7 + $0x2e8] sm:$0xff] }
 0x2f8   : > { %v2773_v0 = vpop.f32.mrf.mxu0  ;;  %v3703_v1 = vpop.f32.mrf.mxu1 }
 0x2f9   : > { %v2963_v2 = vadd.f32 %v2772_v61, %v2289_v63  ;;  %4019 = vst [vmem:[%s5575_s7 + $0x298] sm:$0xff] %v3891_v62  ;;  %v2774_v25 = vadd.f32 %v2773_v0, %v5550_v9  ;;  %v3892_v26 = vadd.f32 %v3700_v22, %v2962_v24  ;;  %v3704_v16 = vadd.f32 %v3703_v1, %v5550_v9  ;;  %v2298_v0 = vld [vmem:[%s5575_s7 + $0x2f0] sm:$0xff] }
 0x2fa   : > { %v2775_v27 = vpop.f32.mrf.mxu0  ;;  %v3705_v28 = vpop.f32.mrf.mxu1 }
 0x2fb   : > { %v2964_v15 = vadd.f32 %v2774_v25, %v2290_v14  ;;  %4020 = vst [vmem:[%s5575_s7 + $0x2a0] sm:$0xff] %v3892_v26  ;;  %v2776_v3 = vadd.f32 %v2775_v27, %v5552_v46  ;;  %v3893_v4 = vadd.f32 %v3702_v13, %v2963_v2  ;;  %v3706_v29 = vadd.f32 %v3705_v28, %v5552_v46  ;;  %v2299_v27 = vld [vmem:[%s5575_s7 + $0x2f8] sm:$0xff] }
 0x2fc   : > { %v2779_v5 = vpop.f32.mrf.mxu0  ;;  %v3709_v30 = vpop.f32.mrf.mxu1 }
 0x2fd   : > { %v2965_v6 = vadd.f32 %v2776_v3, %v2291_v18  ;;  %4021 = vst [vmem:[%s5575_s7 + $0x2a8] sm:$0xff] %v3893_v4  ;;  %v2780_v20 = vadd.f32 %v2779_v5, %v5550_v9  ;;  %v3894_v31 = vadd.f32 %v3704_v16, %v2964_v15  ;;  %v3710_v32 = vadd.f32 %v3709_v30, %v5550_v9 }
 0x2fe   : > { %v2781_v39 = vpop.f32.mrf.mxu0  ;;  %v3711_v40 = vpop.f32.mrf.mxu1 }
 0x2ff   : > { %v2966_v41 = vadd.f32 %v2780_v20, %v2292_v38  ;;  %4022 = vst [vmem:[%s5575_s7 + $0x2b0] sm:$0xff] %v3894_v31  ;;  %v2782_v42 = vadd.f32 %v2781_v39, %v5552_v46  ;;  %v3895_v7 = vadd.f32 %v3706_v29, %v2965_v6  ;;  %v3712_v36 = vadd.f32 %v3711_v40, %v5552_v46  ;;  %v2300_v29 = vld [vmem:[%s5575_s7 + $0x300] sm:$0xff]  ;;  %v2301_v38 = vld [vmem:[%s5575_s7 + $0x308] sm:$0xff] }
 0x300   : > { %v2783_v34 = vpop.f32.mrf.mxu0  ;;  %v3713_v8 = vpop.f32.mrf.mxu1 }
 0x301   : > { %v2967_v43 = vadd.f32 %v2782_v42, %v2293_v33  ;;  %4023 = vst [vmem:[%s5575_s7 + $0x2b8] sm:$0xff] %v3895_v7  ;;  %v2784_v35 = vadd.f32 %v2783_v34, %v5550_v9  ;;  %v3896_v44 = vadd.f32 %v3710_v32, %v2966_v41  ;;  %v3714_v50 = vadd.f32 %v3713_v8, %v5550_v9  ;;  %v2302_v34 = vld [vmem:[%s5575_s7 + $0x310] sm:$0xff] }
 0x302   : > { %v2785_v45 = vpop.f32.mrf.mxu0  ;;  %v3715_v47 = vpop.f32.mrf.mxu1 }
 0x303   : > { %v2968_v37 = vadd.f32 %v2784_v35, %v2294_v10  ;;  %4024 = vst [vmem:[%s5575_s7 + $0x2c0] sm:$0xff] %v3896_v44  ;;  %v2786_v48 = vadd.f32 %v2785_v45, %v5552_v46  ;;  %v3897_v49 = vadd.f32 %v3712_v36, %v2967_v43  ;;  %v3716_v51 = vadd.f32 %v3715_v47, %v5552_v46  ;;  %v2303_v45 = vld [vmem:[%s5575_s7 + $0x318] sm:$0xff] }
 0x304   : > { %v2789_v12 = vpop.f32.mrf.mxu0  ;;  %v3719_v52 = vpop.f32.mrf.mxu1 }
 0x305   : > { %v2969_v17 = vadd.f32 %v2786_v48, %v2295_v11  ;;  %4025 = vst [vmem:[%s5575_s7 + $0x2c8] sm:$0xff] %v3897_v49  ;;  %v2790_v19 = vadd.f32 %v2789_v12, %v5550_v9  ;;  %v3898_v53 = vadd.f32 %v3714_v50, %v2968_v37  ;;  %v3720_v54 = vadd.f32 %v3719_v52, %v5550_v9 }
 0x306   : > { %v2791_v56 = vpop.f32.mrf.mxu0  ;;  %v3721_v57 = vpop.f32.mrf.mxu1 }
 0x307   : > { %v2970_v58 = vadd.f32 %v2790_v19, %v2296_v55  ;;  %4026 = vst [vmem:[%s5575_s7 + $0x2d0] sm:$0xff] %v3898_v53  ;;  %v2792_v21 = vadd.f32 %v2791_v56, %v5552_v46  ;;  %v3899_v22 = vadd.f32 %v3716_v51, %v2969_v17  ;;  %v3722_v63 = vadd.f32 %v3721_v57, %v5552_v46  ;;  %v2304_v51 = vld [vmem:[%s5575_s7 + $0x320] sm:$0xff]  ;;  %v2305_v55 = vld [vmem:[%s5575_s7 + $0x328] sm:$0xff] }
 0x308   : > { %v2793_v60 = vpop.f32.mrf.mxu0  ;;  %v3723_v23 = vpop.f32.mrf.mxu1 }
 0x309   : > { %v2971_v24 = vadd.f32 %v2792_v21, %v2297_v59  ;;  %4027 = vst [vmem:[%s5575_s7 + $0x2d8] sm:$0xff] %v3899_v22  ;;  %v2794_v61 = vadd.f32 %v2793_v60, %v5550_v9  ;;  %v3900_v62 = vadd.f32 %v3720_v54, %v2970_v58  ;;  %v3724_v14 = vadd.f32 %v3723_v23, %v5550_v9  ;;  %v2306_v60 = vld [vmem:[%s5575_s7 + $0x330] sm:$0xff] }
 0x30a   : > { %v2795_v1 = vpop.f32.mrf.mxu0  ;;  %v3725_v2 = vpop.f32.mrf.mxu1 }
 0x30b   : > { %v2972_v25 = vadd.f32 %v2794_v61, %v2298_v0  ;;  %4028 = vst [vmem:[%s5575_s7 + $0x2e0] sm:$0xff] %v3900_v62  ;;  %v2796_v26 = vadd.f32 %v2795_v1, %v5552_v46  ;;  %v3901_v13 = vadd.f32 %v3722_v63, %v2971_v24  ;;  %v3726_v15 = vadd.f32 %v3725_v2, %v5552_v46  ;;  %v2307_v1 = vld [vmem:[%s5575_s7 + $0x338] sm:$0xff] }
 0x30c   : > { %v2799_v28 = vpop.f32.mrf.mxu0  ;;  %v3729_v3 = vpop.f32.mrf.mxu1 }
 0x30d   : > { %v2973_v4 = vadd.f32 %v2796_v26, %v2299_v27  ;;  %4029 = vst [vmem:[%s5575_s7 + $0x2e8] sm:$0xff] %v3901_v13  ;;  %v2800_v16 = vadd.f32 %v2799_v28, %v5550_v9  ;;  %v3902_v18 = vadd.f32 %v3724_v14, %v2972_v25  ;;  %v3730_v5 = vadd.f32 %v3729_v3, %v5550_v9 }
 0x30e   : > { %v2801_v30 = vpop.f32.mrf.mxu0  ;;  %v3731_v6 = vpop.f32.mrf.mxu1 }
 0x30f   : > { %v2974_v20 = vadd.f32 %v2800_v16, %v2300_v29  ;;  %4030 = vst [vmem:[%s5575_s7 + $0x2f0] sm:$0xff] %v3902_v18  ;;  %v2802_v31 = vadd.f32 %v2801_v30, %v5552_v46  ;;  %v3903_v32 = vadd.f32 %v3726_v15, %v2973_v4  ;;  %v3732_v33 = vadd.f32 %v3731_v6, %v5552_v46  ;;  %v2308_v15 = vld [vmem:[%s5575_s7 + $0x340] sm:$0xff]  ;;  %v2309_v29 = vld [vmem:[%s5575_s7 + $0x348] sm:$0xff] }
 0x310   : > { %v2803_v39 = vpop.f32.mrf.mxu0  ;;  %v3733_v40 = vpop.f32.mrf.mxu1 }
 0x311   : > { %v2975_v41 = vadd.f32 %v2802_v31, %v2301_v38  ;;  %4031 = vst [vmem:[%s5575_s7 + $0x2f8] sm:$0xff] %v3903_v32  ;;  %v2804_v42 = vadd.f32 %v2803_v39, %v5550_v9  ;;  %v3904_v7 = vadd.f32 %v3730_v5, %v2974_v20  ;;  %v3734_v10 = vadd.f32 %v3733_v40, %v5550_v9  ;;  %v2310_v39 = vld [vmem:[%s5575_s7 + $0x350] sm:$0xff] }
 0x312   : > { %v2805_v8 = vpop.f32.mrf.mxu0  ;;  %v3735_v43 = vpop.f32.mrf.mxu1 }
 0x313   : > { %v2976_v35 = vadd.f32 %v2804_v42, %v2302_v34  ;;  %4032 = vst [vmem:[%s5575_s7 + $0x300] sm:$0xff] %v3904_v7  ;;  %v2806_v44 = vadd.f32 %v2805_v8, %v5552_v46  ;;  %v3905_v36 = vadd.f32 %v3732_v33, %v2975_v41  ;;  %v3736_v37 = vadd.f32 %v3735_v43, %v5552_v46  ;;  %v2311_v8 = vld [vmem:[%s5575_s7 + $0x358] sm:$0xff] }
 0x314   : > { %v2809_v47 = vpop.f32.mrf.mxu0  ;;  %v3739_v48 = vpop.f32.mrf.mxu1 }
 0x315   : > { %v2977_v49 = vadd.f32 %v2806_v44, %v2303_v45  ;;  %4033 = vst [vmem:[%s5575_s7 + $0x308] sm:$0xff] %v3905_v36  ;;  %v2810_v50 = vadd.f32 %v2809_v47, %v5550_v9  ;;  %v3906_v11 = vadd.f32 %v3734_v10, %v2976_v35  ;;  %v3740_v12 = vadd.f32 %v3739_v48, %v5550_v9 }
 0x316   : > { %v2811_v52 = vpop.f32.mrf.mxu0  ;;  %v3741_v17 = vpop.f32.mrf.mxu1 }
 0x317   : > { %v2978_v19 = vadd.f32 %v2810_v50, %v2304_v51  ;;  %4034 = vst [vmem:[%s5575_s7 + $0x310] sm:$0xff] %v3906_v11  ;;  %v2812_v53 = vadd.f32 %v2811_v52, %v5552_v46  ;;  %v3907_v54 = vadd.f32 %v3736_v37, %v2977_v49  ;;  %v3742_v59 = vadd.f32 %v3741_v17, %v5552_v46  ;;  %v2312_v37 = vld [vmem:[%s5575_s7 + $0x360] sm:$0xff]  ;;  %v2313_v51 = vld [vmem:[%s5575_s7 + $0x368] sm:$0xff] }
 0x318   : > { %v2813_v56 = vpop.f32.mrf.mxu0  ;;  %v3743_v57 = vpop.f32.mrf.mxu1 }
 0x319   : > { %v2979_v58 = vadd.f32 %v2812_v53, %v2305_v55  ;;  %4035 = vst [vmem:[%s5575_s7 + $0x318] sm:$0xff] %v3907_v54  ;;  %v2814_v21 = vadd.f32 %v2813_v56, %v5550_v9  ;;  %v3908_v22 = vadd.f32 %v3740_v12, %v2978_v19  ;;  %v3744_v0 = vadd.f32 %v3743_v57, %v5550_v9  ;;  %v2314_v56 = vld [vmem:[%s5575_s7 + $0x370] sm:$0xff] }
 0x31a   : > { %v2815_v23 = vpop.f32.mrf.mxu0  ;;  %v3745_v24 = vpop.f32.mrf.mxu1 }
 0x31b   : > { %v2980_v61 = vadd.f32 %v2814_v21, %v2306_v60  ;;  %4036 = vst [vmem:[%s5575_s7 + $0x320] sm:$0xff] %v3908_v22  ;;  %v2816_v62 = vadd.f32 %v2815_v23, %v5552_v46  ;;  %v3909_v63 = vadd.f32 %v3742_v59, %v2979_v58  ;;  %v3746_v25 = vadd.f32 %v3745_v24, %v5552_v46  ;;  %v2315_v23 = vld [vmem:[%s5575_s7 + $0x378] sm:$0xff] }
 0x31c   : > { %v2819_v2 = vpop.f32.mrf.mxu0  ;;  %v3749_v26 = vpop.f32.mrf.mxu1 }
 0x31d   : > { %v2981_v13 = vadd.f32 %v2816_v62, %v2307_v1  ;;  %4037 = vst [vmem:[%s5575_s7 + $0x328] sm:$0xff] %v3909_v63  ;;  %v2820_v14 = vadd.f32 %v2819_v2, %v5550_v9  ;;  %v3910_v27 = vadd.f32 %v3744_v0, %v2980_v61  ;;  %v3750_v28 = vadd.f32 %v3749_v26, %v5550_v9 }
 0x31e   : > { %v2821_v3 = vpop.f32.mrf.mxu0  ;;  %v3751_v4 = vpop.f32.mrf.mxu1 }
 0x31f   : > { %v2982_v16 = vadd.f32 %v2820_v14, %v2308_v15  ;;  %4038 = vst [vmem:[%s5575_s7 + $0x330] sm:$0xff] %v3910_v27  ;;  %v2822_v18 = vadd.f32 %v2821_v3, %v5552_v46  ;;  %v3911_v5 = vadd.f32 %v3746_v25, %v2981_v13  ;;  %v3752_v38 = vadd.f32 %v3751_v4, %v5552_v46  ;;  %v2316_v25 = vld [vmem:[%s5575_s7 + $0x380] sm:$0xff]  ;;  %v2317_v15 = vld [vmem:[%s5575_s7 + $0x388] sm:$0xff] }
 0x320   : > { %v2823_v30 = vpop.f32.mrf.mxu0  ;;  %v3753_v6 = vpop.f32.mrf.mxu1 }
 0x321   : > { %v2983_v20 = vadd.f32 %v2822_v18, %v2309_v29  ;;  %4039 = vst [vmem:[%s5575_s7 + $0x338] sm:$0xff] %v3911_v5  ;;  %v2824_v31 = vadd.f32 %v2823_v30, %v5550_v9  ;;  %v3912_v32 = vadd.f32 %v3750_v28, %v2982_v16  ;;  %v3754_v34 = vadd.f32 %v3753_v6, %v5550_v9  ;;  %v2318_v30 = vld [vmem:[%s5575_s7 + $0x390] sm:$0xff] }
 0x322   : > { %v2825_v40 = vpop.f32.mrf.mxu0  ;;  %v3755_v41 = vpop.f32.mrf.mxu1 }
 0x323   : > { %v2984_v42 = vadd.f32 %v2824_v31, %v2310_v39  ;;  %4040 = vst [vmem:[%s5575_s7 + $0x340] sm:$0xff] %v3912_v32  ;;  %v2826_v7 = vadd.f32 %v2825_v40, %v5552_v46  ;;  %v3913_v33 = vadd.f32 %v3752_v38, %v2983_v20  ;;  %v3756_v35 = vadd.f32 %v3755_v41, %v5552_v46  ;;  %v2319_v40 = vld [vmem:[%s5575_s7 + $0x398] sm:$0xff] }
 0x324   : > { %v2829_v43 = vpop.f32.mrf.mxu0  ;;  %v3759_v44 = vpop.f32.mrf.mxu1 }
 0x325   : > { %v2985_v36 = vadd.f32 %v2826_v7, %v2311_v8  ;;  %4041 = vst [vmem:[%s5575_s7 + $0x348] sm:$0xff] %v3913_v33  ;;  %v2830_v10 = vadd.f32 %v2829_v43, %v5550_v9  ;;  %v3914_v45 = vadd.f32 %v3754_v34, %v2984_v42  ;;  %v3760_v47 = vadd.f32 %v3759_v44, %v5550_v9 }
 0x326   : > { %v2831_v48 = vpop.f32.mrf.mxu0  ;;  %v3761_v49 = vpop.f32.mrf.mxu1 }
 0x327   : > { %v2986_v50 = vadd.f32 %v2830_v10, %v2312_v37  ;;  %4042 = vst [vmem:[%s5575_s7 + $0x350] sm:$0xff] %v3914_v45  ;;  %v2832_v11 = vadd.f32 %v2831_v48, %v5552_v46  ;;  %v3915_v12 = vadd.f32 %v3756_v35, %v2985_v36  ;;  %v3762_v55 = vadd.f32 %v3761_v49, %v5552_v46  ;;  %v2320_v35 = vld [vmem:[%s5575_s7 + $0x3a0] sm:$0xff]  ;;  %v2321_v37 = vld [vmem:[%s5575_s7 + $0x3a8] sm:$0xff] }
 0x328   : > { %v2833_v52 = vpop.f32.mrf.mxu0  ;;  %v3763_v17 = vpop.f32.mrf.mxu1 }
 0x329   : > { %v2987_v19 = vadd.f32 %v2832_v11, %v2313_v51  ;;  %4043 = vst [vmem:[%s5575_s7 + $0x358] sm:$0xff] %v3915_v12  ;;  %v2834_v53 = vadd.f32 %v2833_v52, %v5550_v9  ;;  %v3916_v54 = vadd.f32 %v3760_v47, %v2986_v50  ;;  %v3764_v60 = vadd.f32 %v3763_v17, %v5550_v9  ;;  %v2322_v52 = vld [vmem:[%s5575_s7 + $0x3b0] sm:$0xff] }
 0x32a   : > { %v2835_v57 = vpop.f32.mrf.mxu0  ;;  %v3765_v58 = vpop.f32.mrf.mxu1 }
 0x32b   : > { %v2988_v21 = vadd.f32 %v2834_v53, %v2314_v56  ;;  %4044 = vst [vmem:[%s5575_s7 + $0x360] sm:$0xff] %v3916_v54  ;;  %v2836_v22 = vadd.f32 %v2835_v57, %v5552_v46  ;;  %v3917_v59 = vadd.f32 %v3762_v55, %v2987_v19  ;;  %v3766_v61 = vadd.f32 %v3765_v58, %v5552_v46  ;;  %v2323_v57 = vld [vmem:[%s5575_s7 + $0x3b8] sm:$0xff] }
 0x32c   : > { %v2839_v24 = vpop.f32.mrf.mxu0  ;;  %v3769_v62 = vpop.f32.mrf.mxu1 }
 0x32d   : > { %v2989_v63 = vadd.f32 %v2836_v22, %v2315_v23  ;;  %4045 = vst [vmem:[%s5575_s7 + $0x368] sm:$0xff] %v3917_v59  ;;  %v2840_v0 = vadd.f32 %v2839_v24, %v5550_v9  ;;  %v3918_v1 = vadd.f32 %v3764_v60, %v2988_v21  ;;  %v3770_v2 = vadd.f32 %v3769_v62, %v5550_v9 }
 0x32e   : > { %v2841_v26 = vpop.f32.mrf.mxu0  ;;  %v3771_v13 = vpop.f32.mrf.mxu1 }
 0x32f   : > { %v2990_v14 = vadd.f32 %v2840_v0, %v2316_v25  ;;  %4046 = vst [vmem:[%s5575_s7 + $0x370] sm:$0xff] %v3918_v1  ;;  %v2842_v27 = vadd.f32 %v2841_v26, %v5552_v46  ;;  %v3919_v28 = vadd.f32 %v3766_v61, %v2989_v63  ;;  %v3772_v29 = vadd.f32 %v3771_v13, %v5552_v46  ;;  %v2324_v61 = vld [vmem:[%s5575_s7 + $0x3c0] sm:$0xff]  ;;  %v2325_v25 = vld [vmem:[%s5575_s7 + $0x3c8] sm:$0xff] }
 0x330   : > { %v2843_v3 = vpop.f32.mrf.mxu0  ;;  %v3773_v4 = vpop.f32.mrf.mxu1 }
 0x331   : > { %v2991_v16 = vadd.f32 %v2842_v27, %v2317_v15  ;;  %4047 = vst [vmem:[%s5575_s7 + $0x378] sm:$0xff] %v3919_v28  ;;  %v2844_v18 = vadd.f32 %v2843_v3, %v5550_v9  ;;  %v3920_v5 = vadd.f32 %v3770_v2, %v2990_v14  ;;  %v3774_v39 = vadd.f32 %v3773_v4, %v5550_v9  ;;  %v2326_v3 = vld [vmem:[%s5575_s7 + $0x3d0] sm:$0xff] }
 0x332   : > { %v2845_v6 = vpop.f32.mrf.mxu0  ;;  %v3775_v20 = vpop.f32.mrf.mxu1 }
 0x333   : > { %v2992_v31 = vadd.f32 %v2844_v18, %v2318_v30  ;;  %4048 = vst [vmem:[%s5575_s7 + $0x380] sm:$0xff] %v3920_v5  ;;  %v2846_v32 = vadd.f32 %v2845_v6, %v5552_v46  ;;  %v3921_v38 = vadd.f32 %v3772_v29, %v2991_v16  ;;  %v3776_v42 = vadd.f32 %v3775_v20, %v5552_v46  ;;  %v2327_v6 = vld [vmem:[%s5575_s7 + $0x3d8] sm:$0xff] }
 0x334   : > { %v2849_v41 = vpop.f32.mrf.mxu0  ;;  %v3779_v7 = vpop.f32.mrf.mxu1 }
 0x335   : > { %v2993_v33 = vadd.f32 %v2846_v32, %v2319_v40  ;;  %4049 = vst [vmem:[%s5575_s7 + $0x388] sm:$0xff] %v3921_v38  ;;  %v2850_v34 = vadd.f32 %v2849_v41, %v5550_v9  ;;  %v3922_v8 = vadd.f32 %v3774_v39, %v2992_v31  ;;  %v3780_v43 = vadd.f32 %v3779_v7, %v5550_v9 }
 0x336   : > { %v2851_v44 = vpop.f32.mrf.mxu0  ;;  %v3781_v36 = vpop.f32.mrf.mxu1 }
 0x337   : > { %v2994_v10 = vadd.f32 %v2850_v34, %v2320_v35  ;;  %4050 = vst [vmem:[%s5575_s7 + $0x390] sm:$0xff] %v3922_v8  ;;  %v2852_v45 = vadd.f32 %v2851_v44, %v5552_v46  ;;  %v3923_v47 = vadd.f32 %v3776_v42, %v2993_v33  ;;  %v3782_v51 = vadd.f32 %v3781_v36, %v5552_v46  ;;  %v2328_v42 = vld [vmem:[%s5575_s7 + $0x3e0] sm:$0xff]  ;;  %v2329_v35 = vld [vmem:[%s5575_s7 + $0x3e8] sm:$0xff] }
 0x338   : > { %v2853_v48 = vpop.f32.mrf.mxu0  ;;  %v3783_v49 = vpop.f32.mrf.mxu1 }
 0x339   : > { %v2995_v50 = vadd.f32 %v2852_v45, %v2321_v37  ;;  %4051 = vst [vmem:[%s5575_s7 + $0x398] sm:$0xff] %v3923_v47  ;;  %v2854_v11 = vadd.f32 %v2853_v48, %v5550_v9  ;;  %v3924_v12 = vadd.f32 %v3780_v43, %v2994_v10  ;;  %v3784_v56 = vadd.f32 %v3783_v49, %v5550_v9  ;;  %v2330_v48 = vld [vmem:[%s5575_s7 + $0x3f0] sm:$0xff] }
 0x33a   : > { %v2855_v17 = vpop.f32.mrf.mxu0  ;;  %v3785_v19 = vpop.f32.mrf.mxu1 }
 0x33b   : > { %v2996_v53 = vadd.f32 %v2854_v11, %v2322_v52  ;;  %4052 = vst [vmem:[%s5575_s7 + $0x3a0] sm:$0xff] %v3924_v12  ;;  %v2856_v54 = vadd.f32 %v2855_v17, %v5552_v46  ;;  %v3925_v55 = vadd.f32 %v3782_v51, %v2995_v50  ;;  %v3786_v21 = vadd.f32 %v3785_v19, %v5552_v46  ;;  %v2331_v17 = vld [vmem:[%s5575_s7 + $0x3f8] sm:$0xff] }
 0x33c   : > { %v2859_v58 = vpop.f32.mrf.mxu0  ;;  %v3789_v22 = vpop.f32.mrf.mxu1 }
 0x33d   : > { %v2997_v59 = vadd.f32 %v2856_v54, %v2323_v57  ;;  %4053 = vst [vmem:[%s5575_s7 + $0x3a8] sm:$0xff] %v3925_v55  ;;  %v2860_v60 = vadd.f32 %v2859_v58, %v5550_v9  ;;  %v3926_v23 = vadd.f32 %v3784_v56, %v2996_v53  ;;  %v3790_v24 = vadd.f32 %v3789_v22, %v5550_v9 }
 0x33e   : > { %v2861_v62 = vpop.f32.mrf.mxu0  ;;  %v3791_v63 = vpop.f32.mrf.mxu1 }
 0x33f   : > { %v2998_v0 = vadd.f32 %v2860_v60, %v2324_v61  ;;  %4054 = vst [vmem:[%s5575_s7 + $0x3b0] sm:$0xff] %v3926_v23  ;;  %v2862_v1 = vadd.f32 %v2861_v62, %v5552_v46  ;;  %v3927_v2 = vadd.f32 %v3786_v21, %v2997_v59  ;;  %v3792_v15 = vadd.f32 %v3791_v63, %v5552_v46 }
 0x340   : > { %v2863_v26 = vpop.f32.mrf.mxu0  ;;  %v3793_v13 = vpop.f32.mrf.mxu1 }
 0x341   : > { %v2999_v14 = vadd.f32 %v2862_v1, %v2325_v25  ;;  %4055 = vst [vmem:[%s5575_s7 + $0x3b8] sm:$0xff] %v3927_v2  ;;  %v2864_v27 = vadd.f32 %v2863_v26, %v5550_v9  ;;  %v3928_v28 = vadd.f32 %v3790_v24, %v2998_v0  ;;  %v3794_v30 = vadd.f32 %v3793_v13, %v5550_v9 }
 0x342   : > { %v2865_v4 = vpop.f32.mrf.mxu0  ;;  %v3795_v16 = vpop.f32.mrf.mxu1 }
 0x343   : > { %v3000_v18 = vadd.f32 %v2864_v27, %v2326_v3  ;;  %4056 = vst [vmem:[%s5575_s7 + $0x3c0] sm:$0xff] %v3928_v28  ;;  %v2866_v5 = vadd.f32 %v2865_v4, %v5552_v46  ;;  %v3929_v29 = vadd.f32 %v3792_v15, %v2999_v14  ;;  %v3796_v31 = vadd.f32 %v3795_v16, %v5552_v46 }
 0x344   : > { %v2869_v20 = vpop.f32.mrf.mxu0  ;;  %v3799_v32 = vpop.f32.mrf.mxu1 }
 0x345   : > { %v3001_v38 = vadd.f32 %v2866_v5, %v2327_v6  ;;  %4057 = vst [vmem:[%s5575_s7 + $0x3c8] sm:$0xff] %v3929_v29  ;;  %v2870_v39 = vadd.f32 %v2869_v20, %v5550_v9  ;;  %v3930_v40 = vadd.f32 %v3794_v30, %v3000_v18  ;;  %v3800_v41 = vadd.f32 %v3799_v32, %v5550_v9 }
 0x346   : > { %v2871_v7 = vpop.f32.mrf.mxu0  ;;  %v3801_v33 = vpop.f32.mrf.mxu1 }
 0x347   : > { %v3002_v34 = vadd.f32 %v2870_v39, %v2328_v42  ;;  %4058 = vst [vmem:[%s5575_s7 + $0x3d0] sm:$0xff] %v3930_v40  ;;  %v2872_v8 = vadd.f32 %v2871_v7, %v5552_v46  ;;  %v3931_v43 = vadd.f32 %v3796_v31, %v3001_v38  ;;  %v3802_v37 = vadd.f32 %v3801_v33, %v5552_v46 }
 0x348   : > { %v2873_v44 = vpop.f32.mrf.mxu0  ;;  %v3803_v36 = vpop.f32.mrf.mxu1 }
 0x349   : > { %v3003_v10 = vadd.f32 %v2872_v8, %v2329_v35  ;;  %4059 = vst [vmem:[%s5575_s7 + $0x3d8] sm:$0xff] %v3931_v43  ;;  %v2874_v45 = vadd.f32 %v2873_v44, %v5550_v9  ;;  %v3932_v47 = vadd.f32 %v3800_v41, %v3002_v34  ;;  %v3804_v52 = vadd.f32 %v3803_v36, %v5550_v9 }
 0x34a   : > { %v2875_v49 = vpop.f32.mrf.mxu0  ;;  %v3805_v50 = vpop.f32.mrf.mxu1 }
 0x34b   : > { %v3004_v11 = vadd.f32 %v2874_v45, %v2330_v48  ;;  %4060 = vst [vmem:[%s5575_s7 + $0x3e0] sm:$0xff] %v3932_v47  ;;  %v2876_v12 = vadd.f32 %v2875_v49, %v5552_v46  ;;  %v3933_v51 = vadd.f32 %v3802_v37, %v3003_v10  ;;  %v3806_v54 = vadd.f32 %v3805_v50, %v5552_v46 }
 0x34d   : > { %v3005_v19 = vadd.f32 %v2876_v12, %v2331_v17  ;;  %4061 = vst [vmem:[%s5575_s7 + $0x3e8] sm:$0xff] %v3933_v51  ;;  %v3934_v53 = vadd.f32 %v3804_v52, %v3004_v11 }
 0x34f   : > { %4062 = vst [vmem:[%s5575_s7 + $0x3f0] sm:$0xff] %v3934_v53  ;;  %v3935_v55 = vadd.f32 %v3806_v54, %v3005_v19 }
 0x351   : > { %4063 = vst [vmem:[%s5575_s7 + $0x3f8] sm:$0xff] %v3935_v55 }
 0x352   : > { %4848 = shalt.err (!%p4845_p3)
}
 0x353   : > { %s4849_s7 = scalar_lea.hbm %s6936_s5, 16384  ;;  %s4853_s14 = scalar_lea.hbm %s6987_s4, 32768 }
 0x354   : > { %p4850_p8 = scmp.ne.s32.totalorder %s6936_s5, %s4849_s7  ;;  %p4854_p4 = scmp.lt.s32.totalorder %s6936_s5, %s6987_s4 }
 0x355   : > { %p4855_p11 = scmp.lt.s32.totalorder %s4853_s14, %s4849_s7 }
 0x356   : > { %p4851_p9 = pnand %p4850_p8, %p6996_p5 }
 0x357   : > { %p4856_p12 = por %p4855_p11, %p4854_p4 }
 0x358   : > { %p4852_p6 = pneg %p4851_p9 }
 0x35a   : > { %p4857_p13 = pnand %p4856_p12, %p4852_p6 }
 0x35c   : > { %4860 = shalt.err (!%p4857_p13)
}
 0x35d   : > { %4677 = dma.vmem_to_hbm [thread:$0]  (%p6996_p5), %s6938_s11, 16384, %s6936_s5, %s4070_s30, %s4917_s10, %s4917_s10, %s4918_s20  }
 0x35e PF: > { %s4116_s8 = sand.u32 1, %s4895_s15   ;;  %p6997_p1 = scmp.ne.s32.totalorder %s6993_s28, 0 }
 0x35f   : > { %s4117_s12 = scalar_lea.sflag [#allocation4], %s4116_s8 }
 0x360   : > { %p4685_p2 = pnand %p4219_p10, %p6997_p1 }
 0x362   : > { %p4686_p0 = pneg %p4685_p2 }
 0x364   : > { %4886 = dma.done.wait (%p4686_p0), %s4117_s12, 16384  }
 0x365   : > { %4888 = vsyncadd (%p4686_p0), %s4117_s12, 4294950912  ;;  %s4126_s13 = scalar_lea.sflag [#allocation9], %s4116_s8 }
 0x366   : > { %4890 = dma.done.wait (%p4686_p0), %s4126_s13, 16384  }
 0x367   : > { %4892 = vsyncadd (%p4686_p0), %s4126_s13, 4294950912  ;;  %p22_p5 = scmp.ge.s32.totalorder %s4970_s21, 4   ;;  %s6998_s15 = smov %s4899_s16 }
 0x368   : > { %s6999_s16 = smov %s4903_s17  ;;  %s7000_s17 = smov %s4982_s24 }
 0x369   : > { %s7001_s18 = smov %s4970_s21  ;;  %24 = sbr.rel (!%p22_p5) target bundleno = 8 (0x8), region = 106 }
 0x36e   :  { %4131 = vsyncpa [#allocation3], 1 }
 0x36f   :  { %4133 = vsyncpa [#allocation3 + $0x1], 1 }
 0x370   :  { %4134 = vsyncpa [#allocation6], 1 }
 0x371   :  { %4135 = vsyncpa [#allocation4], 1 }
 0x372   :  { %4137 = vsyncpa [#allocation4 + $0x1], 1 }
 0x373   :  { %4138 = vsyncpa [#allocation9], 1 }
 0x374   :  { %4140 = vsyncpa [#allocation9 + $0x1], 1 }

</bundles_post_ra>
